<compile_context>
chip_gen: v7x
topology: tpu7x:2x2x1
jax: 0.10.0
libtpu: 0.0.40
codegen_flags: <defaults>
</compile_context>

<pallas_src>
import functools

import jax
import jax.numpy as jnp
from jax.experimental import pallas as pl
from jax.experimental.pallas import tpu as pltpu

LEAKY_SLOPE = 0.2
BN_EPS = 1e-5
LANE = 128
# MXU input dtype. float32 keeps the 11 fused conv layers within the 1e-2
# validation tolerance of the f32 reference; flip to jnp.bfloat16 for ~2x MXU
# throughput at production shapes (accumulation stays f32 either way).
MATMUL_DTYPE = jnp.float32


def _round_up(n, m):
    return ((n + m - 1) // m) * m


# ----------------------------------------------------------------------------
# In-kernel helpers
# ----------------------------------------------------------------------------
def _mm(a, b):
    return jnp.dot(a.astype(MATMUL_DTYPE), b.astype(MATMUL_DTYPE),
                   preferred_element_type=jnp.float32)


def _shift_prev(x):
    """row t <- x[t-1]; row 0 <- 0.  x: (T, C) in VMEM/vregs (XLU roll + mask)."""
    r = pltpu.roll(x, shift=1, axis=0)
    t = jax.lax.broadcasted_iota(jnp.int32, x.shape, 0)
    return jnp.where(t == 0, 0.0, r)


def _shift_next(x):
    """row t <- x[t+1]; row T-1 <- 0."""
    T = x.shape[0]
    r = pltpu.roll(x, shift=T - 1, axis=0)
    t = jax.lax.broadcasted_iota(jnp.int32, x.shape, 0)
    return jnp.where(t == T - 1, 0.0, r)


# ----------------------------------------------------------------------------
# Fused stage kernel:
#   [x @ Win + sin]  ->  L x [ (concat[x,prev,next] @ Wl + sl) + x -> leaky ]
#   ->  tail: merged up-conv GEMM (+leaky)   OR   1x1 projection (linear)
# ----------------------------------------------------------------------------
def _stage_kernel(*refs, num_res_layers, has_in_proj, tail_leaky):
    if has_in_proj:
        (x_ref, inw_ref, ins_ref, dw_ref, ds_ref, tw_ref, ts_ref, o_ref) = refs
    else:
        (x_ref, dw_ref, ds_ref, tw_ref, ts_ref, o_ref) = refs

    x = x_ref[0]                                            # (T, Cin) f32

    if has_in_proj:
        # 1x1 conv (bias folded into shift); no normalization / activation.
        x = _mm(x, inw_ref[...]) + ins_ref[...]

    # Res_CNR stack: Conv1d(C,C,3,1,1) -> BN(eval, folded) -> +x -> LeakyReLU(0.2)
    for l in range(num_res_layers):                         # small L: unrolled
        xc = jnp.concatenate([x, _shift_prev(x), _shift_next(x)], axis=-1)
        y = _mm(xc, dw_ref[l]) + ds_ref[l]
        y = y + x                                           # residual, lane-0 aligned
        x = jnp.where(y >= 0, y, LEAKY_SLOPE * y)

    if tail_leaky:
        # Merged ConvTranspose1d(4,2,1)+BN+leaky: one GEMM -> [even|odd] columns.
        xc = jnp.concatenate([x, _shift_prev(x), _shift_next(x)], axis=-1)
        y = _mm(xc, tw_ref[...]) + ts_ref[...]
        y = jnp.where(y >= 0, y, LEAKY_SLOPE * y)
    else:
        # Final 1x1 projection (linear).
        y = _mm(x, tw_ref[...]) + ts_ref[...]

    o_ref[0] = y


def _run_stage(x_btc, weights, *, num_res_layers, has_in_proj, tail_leaky):
    B, T, Cin = x_btc.shape
    cout = weights[-2].shape[-1]                            # tail weight's out-width
    kernel = functools.partial(_stage_kernel, num_res_layers=num_res_layers,
                               has_in_proj=has_in_proj, tail_leaky=tail_leaky)

    def const_spec(a):                                      # whole-array, batch-invariant
        zeros = (0,) * a.ndim
        return pl.BlockSpec(a.shape, lambda b, _z=zeros: _z)

    return pl.pallas_call(
        kernel,
        out_shape=jax.ShapeDtypeStruct((B, T, cout), jnp.float32),
        grid=(B,),
        in_specs=[pl.BlockSpec((1, T, Cin), lambda b: (b, 0, 0))]
                 + [const_spec(w) for w in weights],
        out_specs=pl.BlockSpec((1, T, cout), lambda b: (b, 0, 0)),
        compiler_params=pltpu.CompilerParams(
            dimension_semantics=("parallel",)),             # batch across TCs (v7x)
    )(x_btc, *weights)


# ----------------------------------------------------------------------------
# One-time parameter preparation: BN/bias folding, tap merging, lane padding,
# per-stack weight stacking.  Runs once, NOT inside the per-step forward.
# ----------------------------------------------------------------------------
def prepare_params(params):
    def bn_affine(bn):
        scale = bn["gamma"] / jnp.sqrt(bn["var"] + BN_EPS)
        shift = bn["beta"] - bn["mean"] * scale
        return scale, shift

    def pad2(m, rows, cols):
        return jnp.pad(m, ((0, rows - m.shape[0]), (0, cols - m.shape[1])))

    def conv1x1(layer, cin_pad):
        w, b = layer["w"], layer["b"]                       # (Cout, Cin, 1), (Cout,)
        cop = _round_up(w.shape[0], LANE)
        wm = pad2(w[:, :, 0].T, cin_pad, cop)               # (cin_pad, cop)
        sm = pad2(b[None, :], 1, cop)                       # (1, cop)
        return wm.astype(MATMUL_DTYPE), sm

    def res_stack(layers):
        c = layers[0]["w"].shape[0]
        cp = _round_up(c, LANE)
        ws, ss = [], []
        for lyr in layers:
            w, b = lyr["w"], lyr["b"]                       # (C, C, 3) torch Conv1d
            scale, shift = bn_affine(lyr["bn"])
            # im2col order inside the kernel: [x(t), x(t-1), x(t+1)]  -> taps k = 1, 0, 2
            taps = [pad2(w[:, :, k].T * scale[None, :], cp, cp) for k in (1, 0, 2)]
            ws.append(jnp.concatenate(taps, axis=0))        # (3*cp, cp), BN folded
            ss.append(pad2((b * scale + shift)[None, :], 1, cp))
        return jnp.stack(ws).astype(MATMUL_DTYPE), jnp.stack(ss)   # (L,3cp,cp), (L,1,cp)

    def up_conv(layer):
        w, b = layer["w"], layer["b"]                       # (Cin, Cout, 4) ConvTranspose1d
        cin, cout, _ = w.shape
        cip, cop = _round_up(cin, LANE), _round_up(cout, LANE)
        scale, shift = bn_affine(layer["bn"])
        zero = jnp.zeros((cip, cop), jnp.float32)

        def half(wk):                                       # (Cin, Cout) -> padded, BN folded
            return pad2(wk * scale[None, :], cip, cop)

        # out[2t]   = x[t] @ W1 + x[t-1] @ W3 + b
        # out[2t+1] = x[t] @ W2 + x[t+1] @ W0 + b
        # Merged GEMM columns = [even | odd]; im2col rows = [x, x(t-1), x(t+1)].
        w_x = jnp.concatenate([half(w[:, :, 1]), half(w[:, :, 2])], axis=1)
        w_p = jnp.concatenate([half(w[:, :, 3]), zero], axis=1)
        w_n = jnp.concatenate([zero, half(w[:, :, 0])], axis=1)
        wm = jnp.concatenate([w_x, w_p, w_n], axis=0)       # (3*cip, 2*cop)
        sh = pad2((b * scale + shift)[None, :], 1, cop)
        sm = jnp.concatenate([sh, sh], axis=1)              # (1, 2*cop)
        return wm.astype(MATMUL_DTYPE), sm

    in_w, in_s = conv1x1(params["aft_vq_conv"], params["aft_vq_conv"]["w"].shape[1])
    d1_w, d1_s = res_stack(params["dec_1"])
    u2_w, u2_s = up_conv(params["up_2"])
    d2_w, d2_s = res_stack(params["dec_2"])
    u3_w, u3_s = up_conv(params["up_3"])
    d3_w, d3_s = res_stack(params["dec_3"])
    u4_w, u4_s = up_conv(params["up_4"])
    d4_w, d4_s = res_stack(params["dec_4"])
    p_w, p_s = conv1x1(params["project"],
                       _round_up(params["project"]["w"].shape[1], LANE))
    return dict(in_w=in_w, in_s=in_s, d1_w=d1_w, d1_s=d1_s, u2_w=u2_w, u2_s=u2_s,
                d2_w=d2_w, d2_s=d2_s, u3_w=u3_w, u3_s=u3_s,
                d3_w=d3_w, d3_s=d3_s, u4_w=u4_w, u4_s=u4_s,
                d4_w=d4_w, d4_s=d4_s, p_w=p_w, p_s=p_s)


# ----------------------------------------------------------------------------
# Forward: 4 fused pallas_calls + free interleave reshapes between them.
# ----------------------------------------------------------------------------
def decoder_forward(prep, h_bct, *, out_dim):
    """DecoderSC.forward(h, out) — the torch `out` argument is unused by forward."""
    B, _, T = h_bct.shape
    L = prep["d1_w"].shape[0]
    x = jnp.transpose(h_bct, (0, 2, 1))                     # NCT -> (B, T, E)

    # Stage 1: aft_vq 1x1 conv -> dec_1 -> up_2 (merged even|odd GEMM)
    y = _run_stage(x, (prep["in_w"], prep["in_s"], prep["d1_w"], prep["d1_s"],
                       prep["u2_w"], prep["u2_s"]),
                   num_res_layers=L, has_in_proj=True, tail_leaky=True)
    x = y.reshape(B, 2 * T, y.shape[-1] // 2)   # free row-major even/odd interleave

    # Stage 2: dec_2 -> up_3
    y = _run_stage(x, (prep["d2_w"], prep["d2_s"], prep["u3_w"], prep["u3_s"]),
                   num_res_layers=L, has_in_proj=False, tail_leaky=True)
    x = y.reshape(B, 4 * T, y.shape[-1] // 2)

    # Stage 3: dec_3 -> up_4
    y = _run_stage(x, (prep["d3_w"], prep["d3_s"], prep["u4_w"], prep["u4_s"]),
                   num_res_layers=L, has_in_proj=False, tail_leaky=True)
    x = y.reshape(B, 8 * T, y.shape[-1] // 2)

    # Stage 4: dec_4 -> project (linear 1x1)
    y = _run_stage(x, (prep["d4_w"], prep["d4_s"], prep["p_w"], prep["p_s"]),
                   num_res_layers=L, has_in_proj=False, tail_leaky=False)

    return jnp.transpose(y[:, :, :out_dim], (0, 2, 1))      # (B, out_dim, 8*T)


# ----------------------------------------------------------------------------
# Pure-JAX reference (torch-layout params, same math) for validation.
# ----------------------------------------------------------------------------
def ref_forward(params, h_bct):
    P = jax.lax.Precision.HIGHEST

    def bn_affine(bn):
        scale = bn["gamma"] / jnp.sqrt(bn["var"] + BN_EPS)
        return scale, bn["beta"] - bn["mean"] * scale

    def sp(x):  # x[t-1], zero-padded
        return jnp.pad(x, ((0, 0), (1, 0), (0, 0)))[:, :-1, :]

    def sn(x):  # x[t+1], zero-padded
        return jnp.pad(x, ((0, 0), (0, 1), (0, 0)))[:, 1:, :]

    def leaky(y):
        return jnp.where(y >= 0, y, LEAKY_SLOPE * y)

    x = jnp.transpose(h_bct, (0, 2, 1))
    w, b = params["aft_vq_conv"]["w"], params["aft_vq_conv"]["b"]
    x = jnp.einsum("btc,oc->bto", x, w[:, :, 0], precision=P) + b

    def res_stack(x, layers):
        for lyr in layers:
            w, b = lyr["w"], lyr["b"]
            scale, shift = bn_affine(lyr["bn"])
            y = (jnp.einsum("btc,oc->bto", sp(x), w[:, :, 0], precision=P)
                 + jnp.einsum("btc,oc->bto", x, w[:, :, 1], precision=P)
                 + jnp.einsum("btc,oc->bto", sn(x), w[:, :, 2], precision=P) + b)
            x = leaky(y * scale + shift + x)
        return x

    def up(x, lyr):
        w, b = lyr["w"], lyr["b"]
        scale, shift = bn_affine(lyr["bn"])
        B, T, _ = x.shape
        ev = (jnp.einsum("btc,co->bto", x, w[:, :, 1], precision=P)
              + jnp.einsum("btc,co->bto", sp(x), w[:, :, 3], precision=P) + b)
        od = (jnp.einsum("btc,co->bto", x, w[:, :, 2], precision=P)
              + jnp.einsum("btc,co->bto", sn(x), w[:, :, 0], precision=P) + b)
        y = jnp.stack([ev, od], axis=2).reshape(B, 2 * T, -1)
        return leaky(y * scale + shift)

    x = res_stack(x, params["dec_1"]); x = up(x, params["up_2"])
    x = res_stack(x, params["dec_2"]); x = up(x, params["up_3"])
    x = res_stack(x, params["dec_3"]); x = up(x, params["up_4"])
    x = res_stack(x, params["dec_4"])
    w, b = params["project"]["w"], params["project"]["b"]
    x = jnp.einsum("btc,oc->bto", x, w[:, :, 0], precision=P) + b
    return jnp.transpose(x, (0, 2, 1))


# ----------------------------------------------------------------------------
# Deterministic parameter initialization (shapes follow the torch __init__)
# ----------------------------------------------------------------------------
def init_params(key, out_dim, embedding_dim, num_hiddens, num_res_layers):
    keys = iter(jax.random.split(key, 128))

    def rnd(shape, s=0.2):
        return jax.random.normal(next(keys), shape, jnp.float32) * s

    def bn(c):
        return dict(
            gamma=1.0 + 0.1 * jax.random.normal(next(keys), (c,), jnp.float32),
            beta=0.1 * jax.random.normal(next(keys), (c,), jnp.float32),
            mean=0.1 * jax.random.normal(next(keys), (c,), jnp.float32),
            var=jax.random.uniform(next(keys), (c,), jnp.float32, 0.5, 1.5),
        )

    def res_stack(c):
        return [dict(w=rnd((c, c, 3)), b=rnd((c,), 0.05), bn=bn(c))
                for _ in range(num_res_layers)]

    nh = num_hiddens
    return dict(
        aft_vq_conv=dict(w=rnd((nh, embedding_dim, 1)), b=rnd((nh,), 0.05)),
        dec_1=res_stack(nh),
        up_2=dict(w=rnd((nh, nh // 2, 4)), b=rnd((nh // 2,), 0.05), bn=bn(nh // 2)),
        dec_2=res_stack(nh // 2),
        up_3=dict(w=rnd((nh // 2, nh // 4, 4)), b=rnd((nh // 4,), 0.05), bn=bn(nh // 4)),
        dec_3=res_stack(nh // 4),
        up_4=dict(w=rnd((nh // 4, nh // 4, 4)), b=rnd((nh // 4,), 0.05), bn=bn(nh // 4)),
        dec_4=res_stack(nh // 4),
        project=dict(w=rnd((out_dim, nh // 4, 1)), b=rnd((out_dim,), 0.05)),
    )


if __name__ == "__main__":
    B, T = 2, 8
    out_dim, embedding_dim, num_hiddens, num_res_layers = 12, 16, 32, 2

    key = jax.random.PRNGKey(0)
    pkey, hkey = jax.random.split(key)
    params = init_params(pkey, out_dim, embedding_dim, num_hiddens, num_res_layers)
    prep = prepare_params(params)                            # one-time fold/pad/stack

    h = jax.random.normal(hkey, (B, embedding_dim, T), jnp.float32)   # NCT input
    # (the `out` argument of DecoderSC.forward is unused by the torch forward)

    fwd = jax.jit(functools.partial(decoder_forward, out_dim=out_dim))
    recon = jax.block_until_ready(fwd(prep, h))

    ref = ref_forward(params, h)

    assert recon.shape == (B, out_dim, T * 8), recon.shape
    assert bool(jnp.all(jnp.isfinite(recon)))
    max_err = float(jnp.max(jnp.abs(recon - ref)))
    assert bool(jnp.allclose(recon, ref, rtol=1e-2, atol=1e-2)), max_err

    print("KERNEL_OK")
</pallas_src>

<mosaic_0001>
module attributes {stable_mosaic.version = 11 : i64} {
  func.func @_stage_kernel(%arg0: i32, %arg1: memref<1x16x128xf32, #tpu.memory_space<vmem>>, %arg2: memref<2x384x128xf32, #tpu.memory_space<vmem>>, %arg3: memref<2x1x128xf32, #tpu.memory_space<vmem>>, %arg4: memref<384x256xf32, #tpu.memory_space<vmem>>, %arg5: memref<1x256xf32, #tpu.memory_space<vmem>>, %arg6: memref<1x16x256xf32, #tpu.memory_space<vmem>>) attributes {dimension_semantics = [#tpu.dimension_semantics<parallel>], iteration_bounds = array<i64: 2>, scalar_prefetch = 0 : i64, scratch_operands = 0 : i64, tpu.core_type = #tpu.core_type<tc>, window_params = [{transform_indices = @transform_0, window_bounds = array<i64: 1, 16, 128>}, {pipeline_mode = #tpu.pipeline_mode<synchronous>, transform_indices = @transform_1, window_bounds = array<i64: 2, 384, 128>}, {pipeline_mode = #tpu.pipeline_mode<synchronous>, transform_indices = @transform_2, window_bounds = array<i64: 2, 1, 128>}, {pipeline_mode = #tpu.pipeline_mode<synchronous>, transform_indices = @transform_3, window_bounds = array<i64: 384, 256>}, {pipeline_mode = #tpu.pipeline_mode<synchronous>, transform_indices = @transform_4, window_bounds = array<i64: 1, 256>}, {transform_indices = @transform_5, window_bounds = array<i64: 1, 16, 256>}]} {
    %c0 = arith.constant 0 : index
    %c0_0 = arith.constant 0 : index
    %c0_1 = arith.constant 0 : index
    %0 = vector.load %arg1[%c0, %c0_0, %c0_1] : memref<1x16x128xf32, #tpu.memory_space<vmem>>, vector<1x16x128xf32>
    %1 = vector.shape_cast %0 : vector<1x16x128xf32> to vector<16x128xf32>
    %c1_i32 = arith.constant 1 : i32
    %2 = tpu.dynamic_rotate %1 by %c1_i32 dim 0 : vector<16x128xf32>, i32 -> vector<16x128xf32>
    %3 = tpu.iota {dimensions = array<i32: 0>} : vector<16x128xi32>
    %c0_i32 = arith.constant 0 : i32
    %4 = vector.broadcast %c0_i32 : i32 to vector<16x128xi32>
    %5 = arith.cmpi eq, %3, %4 : vector<16x128xi32>
    %cst = arith.constant 0.000000e+00 : f32
    %6 = vector.broadcast %cst : f32 to vector<16x128xf32>
    %7 = arith.select %5, %6, %2 : vector<16x128xi1>, vector<16x128xf32>
    %c15_i32 = arith.constant 15 : i32
    %8 = tpu.dynamic_rotate %1 by %c15_i32 dim 0 : vector<16x128xf32>, i32 -> vector<16x128xf32>
    %9 = tpu.iota {dimensions = array<i32: 0>} : vector<16x128xi32>
    %c15_i32_2 = arith.constant 15 : i32
    %10 = vector.broadcast %c15_i32_2 : i32 to vector<16x128xi32>
    %11 = arith.cmpi eq, %9, %10 : vector<16x128xi32>
    %cst_3 = arith.constant 0.000000e+00 : f32
    %12 = vector.broadcast %cst_3 : f32 to vector<16x128xf32>
    %13 = arith.select %11, %12, %8 : vector<16x128xi1>, vector<16x128xf32>
    %14 = tpu.concatenate %1, %7, %13 in 1 : vector<16x128xf32>, vector<16x128xf32>, vector<16x128xf32> -> vector<16x384xf32>
    %c0_4 = arith.constant 0 : index
    %c0_5 = arith.constant 0 : index
    %c0_6 = arith.constant 0 : index
    %15 = vector.load %arg2[%c0_4, %c0_5, %c0_6] : memref<2x384x128xf32, #tpu.memory_space<vmem>>, vector<1x384x128xf32>
    %16 = vector.shape_cast %15 : vector<1x384x128xf32> to vector<384x128xf32>
    %cst_7 = arith.constant dense<0.000000e+00> : vector<16x128xf32>
    %17 = tpu.matmul %14, %16, %cst_7 {dimension_numbers = #tpu.dot_dimension_numbers<[1], [0], [0], [1], [0, 0, 1, 1], [], []>} : vector<16x384xf32>, vector<384x128xf32>, vector<16x128xf32> -> vector<16x128xf32>
    %c0_8 = arith.constant 0 : index
    %c0_9 = arith.constant 0 : index
    %c0_10 = arith.constant 0 : index
    %18 = vector.load %arg3[%c0_8, %c0_9, %c0_10] : memref<2x1x128xf32, #tpu.memory_space<vmem>>, vector<1x1x128xf32>
    %19 = vector.shape_cast %18 : vector<1x1x128xf32> to vector<1x128xf32>
    %20 = vector.broadcast %19 : vector<1x128xf32> to vector<16x128xf32>
    %21 = arith.addf %17, %20 : vector<16x128xf32>
    %22 = arith.addf %21, %1 : vector<16x128xf32>
    %cst_11 = arith.constant 0.000000e+00 : f32
    %23 = vector.broadcast %cst_11 : f32 to vector<16x128xf32>
    %24 = arith.cmpf oge, %22, %23 : vector<16x128xf32>
    %cst_12 = arith.constant 2.000000e-01 : f32
    %25 = vector.broadcast %cst_12 : f32 to vector<16x128xf32>
    %26 = arith.mulf %25, %22 : vector<16x128xf32>
    %27 = arith.select %24, %22, %26 : vector<16x128xi1>, vector<16x128xf32>
    %c1_i32_13 = arith.constant 1 : i32
    %28 = tpu.dynamic_rotate %27 by %c1_i32_13 dim 0 : vector<16x128xf32>, i32 -> vector<16x128xf32>
    %29 = tpu.iota {dimensions = array<i32: 0>} : vector<16x128xi32>
    %c0_i32_14 = arith.constant 0 : i32
    %30 = vector.broadcast %c0_i32_14 : i32 to vector<16x128xi32>
    %31 = arith.cmpi eq, %29, %30 : vector<16x128xi32>
    %cst_15 = arith.constant 0.000000e+00 : f32
    %32 = vector.broadcast %cst_15 : f32 to vector<16x128xf32>
    %33 = arith.select %31, %32, %28 : vector<16x128xi1>, vector<16x128xf32>
    %c15_i32_16 = arith.constant 15 : i32
    %34 = tpu.dynamic_rotate %27 by %c15_i32_16 dim 0 : vector<16x128xf32>, i32 -> vector<16x128xf32>
    %35 = tpu.iota {dimensions = array<i32: 0>} : vector<16x128xi32>
    %c15_i32_17 = arith.constant 15 : i32
    %36 = vector.broadcast %c15_i32_17 : i32 to vector<16x128xi32>
    %37 = arith.cmpi eq, %35, %36 : vector<16x128xi32>
    %cst_18 = arith.constant 0.000000e+00 : f32
    %38 = vector.broadcast %cst_18 : f32 to vector<16x128xf32>
    %39 = arith.select %37, %38, %34 : vector<16x128xi1>, vector<16x128xf32>
    %40 = tpu.concatenate %27, %33, %39 in 1 : vector<16x128xf32>, vector<16x128xf32>, vector<16x128xf32> -> vector<16x384xf32>
    %c1 = arith.constant 1 : index
    %c0_19 = arith.constant 0 : index
    %c0_20 = arith.constant 0 : index
    %41 = vector.load %arg2[%c1, %c0_19, %c0_20] : memref<2x384x128xf32, #tpu.memory_space<vmem>>, vector<1x384x128xf32>
    %42 = vector.shape_cast %41 : vector<1x384x128xf32> to vector<384x128xf32>
    %cst_21 = arith.constant dense<0.000000e+00> : vector<16x128xf32>
    %43 = tpu.matmul %40, %42, %cst_21 {dimension_numbers = #tpu.dot_dimension_numbers<[1], [0], [0], [1], [0, 0, 1, 1], [], []>} : vector<16x384xf32>, vector<384x128xf32>, vector<16x128xf32> -> vector<16x128xf32>
    %c1_22 = arith.constant 1 : index
    %c0_23 = arith.constant 0 : index
    %c0_24 = arith.constant 0 : index
    %44 = vector.load %arg3[%c1_22, %c0_23, %c0_24] : memref<2x1x128xf32, #tpu.memory_space<vmem>>, vector<1x1x128xf32>
    %45 = vector.shape_cast %44 : vector<1x1x128xf32> to vector<1x128xf32>
    %46 = vector.broadcast %45 : vector<1x128xf32> to vector<16x128xf32>
    %47 = arith.addf %43, %46 : vector<16x128xf32>
    %48 = arith.addf %47, %27 : vector<16x128xf32>
    %cst_25 = arith.constant 0.000000e+00 : f32
    %49 = vector.broadcast %cst_25 : f32 to vector<16x128xf32>
    %50 = arith.cmpf oge, %48, %49 : vector<16x128xf32>
    %cst_26 = arith.constant 2.000000e-01 : f32
    %51 = vector.broadcast %cst_26 : f32 to vector<16x128xf32>
    %52 = arith.mulf %51, %48 : vector<16x128xf32>
    %53 = arith.select %50, %48, %52 : vector<16x128xi1>, vector<16x128xf32>
    %c1_i32_27 = arith.constant 1 : i32
    %54 = tpu.dynamic_rotate %53 by %c1_i32_27 dim 0 : vector<16x128xf32>, i32 -> vector<16x128xf32>
    %55 = tpu.iota {dimensions = array<i32: 0>} : vector<16x128xi32>
    %c0_i32_28 = arith.constant 0 : i32
    %56 = vector.broadcast %c0_i32_28 : i32 to vector<16x128xi32>
    %57 = arith.cmpi eq, %55, %56 : vector<16x128xi32>
    %cst_29 = arith.constant 0.000000e+00 : f32
    %58 = vector.broadcast %cst_29 : f32 to vector<16x128xf32>
    %59 = arith.select %57, %58, %54 : vector<16x128xi1>, vector<16x128xf32>
    %c15_i32_30 = arith.constant 15 : i32
    %60 = tpu.dynamic_rotate %53 by %c15_i32_30 dim 0 : vector<16x128xf32>, i32 -> vector<16x128xf32>
    %61 = tpu.iota {dimensions = array<i32: 0>} : vector<16x128xi32>
    %c15_i32_31 = arith.constant 15 : i32
    %62 = vector.broadcast %c15_i32_31 : i32 to vector<16x128xi32>
    %63 = arith.cmpi eq, %61, %62 : vector<16x128xi32>
    %cst_32 = arith.constant 0.000000e+00 : f32
    %64 = vector.broadcast %cst_32 : f32 to vector<16x128xf32>
    %65 = arith.select %63, %64, %60 : vector<16x128xi1>, vector<16x128xf32>
    %66 = tpu.concatenate %53, %59, %65 in 1 : vector<16x128xf32>, vector<16x128xf32>, vector<16x128xf32> -> vector<16x384xf32>
    %c0_33 = arith.constant 0 : index
    %c0_34 = arith.constant 0 : index
    %67 = vector.load %arg4[%c0_33, %c0_34] : memref<384x256xf32, #tpu.memory_space<vmem>>, vector<384x256xf32>
    %cst_35 = arith.constant dense<0.000000e+00> : vector<16x256xf32>
    %68 = tpu.matmul %66, %67, %cst_35 {dimension_numbers = #tpu.dot_dimension_numbers<[1], [0], [0], [1], [0, 0, 1, 1], [], []>} : vector<16x384xf32>, vector<384x256xf32>, vector<16x256xf32> -> vector<16x256xf32>
    %c0_36 = arith.constant 0 : index
    %c0_37 = arith.constant 0 : index
    %69 = vector.load %arg5[%c0_36, %c0_37] : memref<1x256xf32, #tpu.memory_space<vmem>>, vector<1x256xf32>
    %70 = vector.broadcast %69 : vector<1x256xf32> to vector<16x256xf32>
    %71 = arith.addf %68, %70 : vector<16x256xf32>
    %cst_38 = arith.constant 0.000000e+00 : f32
    %72 = vector.broadcast %cst_38 : f32 to vector<16x256xf32>
    %73 = arith.cmpf oge, %71, %72 : vector<16x256xf32>
    %cst_39 = arith.constant 2.000000e-01 : f32
    %74 = vector.broadcast %cst_39 : f32 to vector<16x256xf32>
    %75 = arith.mulf %74, %71 : vector<16x256xf32>
    %76 = arith.select %73, %71, %75 : vector<16x256xi1>, vector<16x256xf32>
    %c0_40 = arith.constant 0 : index
    %c0_41 = arith.constant 0 : index
    %c0_42 = arith.constant 0 : index
    %77 = vector.load %arg6[%c0_40, %c0_41, %c0_42] : memref<1x16x256xf32, #tpu.memory_space<vmem>>, vector<1x16x256xf32>
    %78 = vector.shape_cast %77 : vector<1x16x256xf32> to vector<16x256xf32>
    %79 = vector.shape_cast %76 : vector<16x256xf32> to vector<1x16x256xf32>
    tpu.vector_store %arg6[%c0_40, %c0_41, %c0_42], %79 {strides = array<i32>} : memref<1x16x256xf32, #tpu.memory_space<vmem>>, vector<1x16x256xf32>,
    return
  }
  func.func @transform_0(%arg0: i32) -> (i32, i32, i32) {
    %c0_i32 = arith.constant 0 : i32
    %c0_i32_0 = arith.constant 0 : i32
    %c0_i32_1 = arith.constant 0 : i32
    return %arg0, %c0_i32, %c0_i32_0 : i32, i32, i32
  }
  func.func @transform_1(%arg0: i32) -> (i32, i32, i32) {
    %c0_i32 = arith.constant 0 : i32
    %c0_i32_0 = arith.constant 0 : i32
    %c0_i32_1 = arith.constant 0 : i32
    %c0_i32_2 = arith.constant 0 : i32
    return %c0_i32, %c0_i32_0, %c0_i32_1 : i32, i32, i32
  }
  func.func @transform_2(%arg0: i32) -> (i32, i32, i32) {
    %c0_i32 = arith.constant 0 : i32
    %c0_i32_0 = arith.constant 0 : i32
    %c0_i32_1 = arith.constant 0 : i32
    %c0_i32_2 = arith.constant 0 : i32
    return %c0_i32, %c0_i32_0, %c0_i32_1 : i32, i32, i32
  }
  func.func @transform_3(%arg0: i32) -> (i32, i32) {
    %c0_i32 = arith.constant 0 : i32
    %c0_i32_0 = arith.constant 0 : i32
    %c0_i32_1 = arith.constant 0 : i32
    return %c0_i32, %c0_i32_0 : i32, i32
  }
  func.func @transform_4(%arg0: i32) -> (i32, i32) {
    %c0_i32 = arith.constant 0 : i32
    %c0_i32_0 = arith.constant 0 : i32
    %c0_i32_1 = arith.constant 0 : i32
    return %c0_i32, %c0_i32_0 : i32, i32
  }
  func.func @transform_5(%arg0: i32) -> (i32, i32, i32) {
    %c0_i32 = arith.constant 0 : i32
    %c0_i32_0 = arith.constant 0 : i32
    %c0_i32_1 = arith.constant 0 : i32
    return %arg0, %c0_i32, %c0_i32_0 : i32, i32, i32
  }
}

module attributes {stable_mosaic.version = 11 : i64} {
  func.func @_stage_kernel(%arg0: i32, %arg1: memref<1x8x16xf32, #tpu.memory_space<vmem>>, %arg2: memref<16x128xf32, #tpu.memory_space<vmem>>, %arg3: memref<1x128xf32, #tpu.memory_space<vmem>>, %arg4: memref<2x384x128xf32, #tpu.memory_space<vmem>>, %arg5: memref<2x1x128xf32, #tpu.memory_space<vmem>>, %arg6: memref<384x256xf32, #tpu.memory_space<vmem>>, %arg7: memref<1x256xf32, #tpu.memory_space<vmem>>, %arg8: memref<1x8x256xf32, #tpu.memory_space<vmem>>) attributes {dimension_semantics = [#tpu.dimension_semantics<parallel>], iteration_bounds = array<i64: 2>, scalar_prefetch = 0 : i64, scratch_operands = 0 : i64, tpu.core_type = #tpu.core_type<tc>, window_params = [{transform_indices = @transform_0, window_bounds = array<i64: 1, 8, 16>}, {pipeline_mode = #tpu.pipeline_mode<synchronous>, transform_indices = @transform_1, window_bounds = array<i64: 16, 128>}, {pipeline_mode = #tpu.pipeline_mode<synchronous>, transform_indices = @transform_2, window_bounds = array<i64: 1, 128>}, {pipeline_mode = #tpu.pipeline_mode<synchronous>, transform_indices = @transform_3, window_bounds = array<i64: 2, 384, 128>}, {pipeline_mode = #tpu.pipeline_mode<synchronous>, transform_indices = @transform_4, window_bounds = array<i64: 2, 1, 128>}, {pipeline_mode = #tpu.pipeline_mode<synchronous>, transform_indices = @transform_5, window_bounds = array<i64: 384, 256>}, {pipeline_mode = #tpu.pipeline_mode<synchronous>, transform_indices = @transform_6, window_bounds = array<i64: 1, 256>}, {transform_indices = @transform_7, window_bounds = array<i64: 1, 8, 256>}]} {
    %c0 = arith.constant 0 : index
    %c0_0 = arith.constant 0 : index
    %c0_1 = arith.constant 0 : index
    %0 = vector.load %arg1[%c0, %c0_0, %c0_1] : memref<1x8x16xf32, #tpu.memory_space<vmem>>, vector<1x8x16xf32>
    %1 = vector.shape_cast %0 : vector<1x8x16xf32> to vector<8x16xf32>
    %c0_2 = arith.constant 0 : index
    %c0_3 = arith.constant 0 : index
    %2 = vector.load %arg2[%c0_2, %c0_3] : memref<16x128xf32, #tpu.memory_space<vmem>>, vector<16x128xf32>
    %cst = arith.constant dense<0.000000e+00> : vector<8x128xf32>
    %3 = tpu.matmul %1, %2, %cst {dimension_numbers = #tpu.dot_dimension_numbers<[1], [0], [0], [1], [0, 0, 1, 1], [], []>} : vector<8x16xf32>, vector<16x128xf32>, vector<8x128xf32> -> vector<8x128xf32>
    %c0_4 = arith.constant 0 : index
    %c0_5 = arith.constant 0 : index
    %4 = vector.load %arg3[%c0_4, %c0_5] : memref<1x128xf32, #tpu.memory_space<vmem>>, vector<1x128xf32>
    %5 = vector.broadcast %4 : vector<1x128xf32> to vector<8x128xf32>
    %6 = arith.addf %3, %5 : vector<8x128xf32>
    %c1_i32 = arith.constant 1 : i32
    %7 = tpu.dynamic_rotate %6 by %c1_i32 dim 0 : vector<8x128xf32>, i32 -> vector<8x128xf32>
    %8 = tpu.iota {dimensions = array<i32: 0>} : vector<8x128xi32>
    %c0_i32 = arith.constant 0 : i32
    %9 = vector.broadcast %c0_i32 : i32 to vector<8x128xi32>
    %10 = arith.cmpi eq, %8, %9 : vector<8x128xi32>
    %cst_6 = arith.constant 0.000000e+00 : f32
    %11 = vector.broadcast %cst_6 : f32 to vector<8x128xf32>
    %12 = arith.select %10, %11, %7 : vector<8x128xi1>, vector<8x128xf32>
    %c7_i32 = arith.constant 7 : i32
    %13 = tpu.dynamic_rotate %6 by %c7_i32 dim 0 : vector<8x128xf32>, i32 -> vector<8x128xf32>
    %14 = tpu.iota {dimensions = array<i32: 0>} : vector<8x128xi32>
    %c7_i32_7 = arith.constant 7 : i32
    %15 = vector.broadcast %c7_i32_7 : i32 to vector<8x128xi32>
    %16 = arith.cmpi eq, %14, %15 : vector<8x128xi32>
    %cst_8 = arith.constant 0.000000e+00 : f32
    %17 = vector.broadcast %cst_8 : f32 to vector<8x128xf32>
    %18 = arith.select %16, %17, %13 : vector<8x128xi1>, vector<8x128xf32>
    %19 = tpu.concatenate %6, %12, %18 in 1 : vector<8x128xf32>, vector<8x128xf32>, vector<8x128xf32> -> vector<8x384xf32>
    %c0_9 = arith.constant 0 : index
    %c0_10 = arith.constant 0 : index
    %c0_11 = arith.constant 0 : index
    %20 = vector.load %arg4[%c0_9, %c0_10, %c0_11] : memref<2x384x128xf32, #tpu.memory_space<vmem>>, vector<1x384x128xf32>
    %21 = vector.shape_cast %20 : vector<1x384x128xf32> to vector<384x128xf32>
    %cst_12 = arith.constant dense<0.000000e+00> : vector<8x128xf32>
    %22 = tpu.matmul %19, %21, %cst_12 {dimension_numbers = #tpu.dot_dimension_numbers<[1], [0], [0], [1], [0, 0, 1, 1], [], []>} : vector<8x384xf32>, vector<384x128xf32>, vector<8x128xf32> -> vector<8x128xf32>
    %c0_13 = arith.constant 0 : index
    %c0_14 = arith.constant 0 : index
    %c0_15 = arith.constant 0 : index
    %23 = vector.load %arg5[%c0_13, %c0_14, %c0_15] : memref<2x1x128xf32, #tpu.memory_space<vmem>>, vector<1x1x128xf32>
    %24 = vector.shape_cast %23 : vector<1x1x128xf32> to vector<1x128xf32>
    %25 = vector.broadcast %24 : vector<1x128xf32> to vector<8x128xf32>
    %26 = arith.addf %22, %25 : vector<8x128xf32>
    %27 = arith.addf %26, %6 : vector<8x128xf32>
    %cst_16 = arith.constant 0.000000e+00 : f32
    %28 = vector.broadcast %cst_16 : f32 to vector<8x128xf32>
    %29 = arith.cmpf oge, %27, %28 : vector<8x128xf32>
    %cst_17 = arith.constant 2.000000e-01 : f32
    %30 = vector.broadcast %cst_17 : f32 to vector<8x128xf32>
    %31 = arith.mulf %30, %27 : vector<8x128xf32>
    %32 = arith.select %29, %27, %31 : vector<8x128xi1>, vector<8x128xf32>
    %c1_i32_18 = arith.constant 1 : i32
    %33 = tpu.dynamic_rotate %32 by %c1_i32_18 dim 0 : vector<8x128xf32>, i32 -> vector<8x128xf32>
    %34 = tpu.iota {dimensions = array<i32: 0>} : vector<8x128xi32>
    %c0_i32_19 = arith.constant 0 : i32
    %35 = vector.broadcast %c0_i32_19 : i32 to vector<8x128xi32>
    %36 = arith.cmpi eq, %34, %35 : vector<8x128xi32>
    %cst_20 = arith.constant 0.000000e+00 : f32
    %37 = vector.broadcast %cst_20 : f32 to vector<8x128xf32>
    %38 = arith.select %36, %37, %33 : vector<8x128xi1>, vector<8x128xf32>
    %c7_i32_21 = arith.constant 7 : i32
    %39 = tpu.dynamic_rotate %32 by %c7_i32_21 dim 0 : vector<8x128xf32>, i32 -> vector<8x128xf32>
    %40 = tpu.iota {dimensions = array<i32: 0>} : vector<8x128xi32>
    %c7_i32_22 = arith.constant 7 : i32
    %41 = vector.broadcast %c7_i32_22 : i32 to vector<8x128xi32>
    %42 = arith.cmpi eq, %40, %41 : vector<8x128xi32>
    %cst_23 = arith.constant 0.000000e+00 : f32
    %43 = vector.broadcast %cst_23 : f32 to vector<8x128xf32>
    %44 = arith.select %42, %43, %39 : vector<8x128xi1>, vector<8x128xf32>
    %45 = tpu.concatenate %32, %38, %44 in 1 : vector<8x128xf32>, vector<8x128xf32>, vector<8x128xf32> -> vector<8x384xf32>
    %c1 = arith.constant 1 : index
    %c0_24 = arith.constant 0 : index
    %c0_25 = arith.constant 0 : index
    %46 = vector.load %arg4[%c1, %c0_24, %c0_25] : memref<2x384x128xf32, #tpu.memory_space<vmem>>, vector<1x384x128xf32>
    %47 = vector.shape_cast %46 : vector<1x384x128xf32> to vector<384x128xf32>
    %cst_26 = arith.constant dense<0.000000e+00> : vector<8x128xf32>
    %48 = tpu.matmul %45, %47, %cst_26 {dimension_numbers = #tpu.dot_dimension_numbers<[1], [0], [0], [1], [0, 0, 1, 1], [], []>} : vector<8x384xf32>, vector<384x128xf32>, vector<8x128xf32> -> vector<8x128xf32>
    %c1_27 = arith.constant 1 : index
    %c0_28 = arith.constant 0 : index
    %c0_29 = arith.constant 0 : index
    %49 = vector.load %arg5[%c1_27, %c0_28, %c0_29] : memref<2x1x128xf32, #tpu.memory_space<vmem>>, vector<1x1x128xf32>
    %50 = vector.shape_cast %49 : vector<1x1x128xf32> to vector<1x128xf32>
    %51 = vector.broadcast %50 : vector<1x128xf32> to vector<8x128xf32>
    %52 = arith.addf %48, %51 : vector<8x128xf32>
    %53 = arith.addf %52, %32 : vector<8x128xf32>
    %cst_30 = arith.constant 0.000000e+00 : f32
    %54 = vector.broadcast %cst_30 : f32 to vector<8x128xf32>
    %55 = arith.cmpf oge, %53, %54 : vector<8x128xf32>
    %cst_31 = arith.constant 2.000000e-01 : f32
    %56 = vector.broadcast %cst_31 : f32 to vector<8x128xf32>
    %57 = arith.mulf %56, %53 : vector<8x128xf32>
    %58 = arith.select %55, %53, %57 : vector<8x128xi1>, vector<8x128xf32>
    %c1_i32_32 = arith.constant 1 : i32
    %59 = tpu.dynamic_rotate %58 by %c1_i32_32 dim 0 : vector<8x128xf32>, i32 -> vector<8x128xf32>
    %60 = tpu.iota {dimensions = array<i32: 0>} : vector<8x128xi32>
    %c0_i32_33 = arith.constant 0 : i32
    %61 = vector.broadcast %c0_i32_33 : i32 to vector<8x128xi32>
    %62 = arith.cmpi eq, %60, %61 : vector<8x128xi32>
    %cst_34 = arith.constant 0.000000e+00 : f32
    %63 = vector.broadcast %cst_34 : f32 to vector<8x128xf32>
    %64 = arith.select %62, %63, %59 : vector<8x128xi1>, vector<8x128xf32>
    %c7_i32_35 = arith.constant 7 : i32
    %65 = tpu.dynamic_rotate %58 by %c7_i32_35 dim 0 : vector<8x128xf32>, i32 -> vector<8x128xf32>
    %66 = tpu.iota {dimensions = array<i32: 0>} : vector<8x128xi32>
    %c7_i32_36 = arith.constant 7 : i32
    %67 = vector.broadcast %c7_i32_36 : i32 to vector<8x128xi32>
    %68 = arith.cmpi eq, %66, %67 : vector<8x128xi32>
    %cst_37 = arith.constant 0.000000e+00 : f32
    %69 = vector.broadcast %cst_37 : f32 to vector<8x128xf32>
    %70 = arith.select %68, %69, %65 : vector<8x128xi1>, vector<8x128xf32>
    %71 = tpu.concatenate %58, %64, %70 in 1 : vector<8x128xf32>, vector<8x128xf32>, vector<8x128xf32> -> vector<8x384xf32>
    %c0_38 = arith.constant 0 : index
    %c0_39 = arith.constant 0 : index
    %72 = vector.load %arg6[%c0_38, %c0_39] : memref<384x256xf32, #tpu.memory_space<vmem>>, vector<384x256xf32>
    %cst_40 = arith.constant dense<0.000000e+00> : vector<8x256xf32>
    %73 = tpu.matmul %71, %72, %cst_40 {dimension_numbers = #tpu.dot_dimension_numbers<[1], [0], [0], [1], [0, 0, 1, 1], [], []>} : vector<8x384xf32>, vector<384x256xf32>, vector<8x256xf32> -> vector<8x256xf32>
    %c0_41 = arith.constant 0 : index
    %c0_42 = arith.constant 0 : index
    %74 = vector.load %arg7[%c0_41, %c0_42] : memref<1x256xf32, #tpu.memory_space<vmem>>, vector<1x256xf32>
    %75 = vector.broadcast %74 : vector<1x256xf32> to vector<8x256xf32>
    %76 = arith.addf %73, %75 : vector<8x256xf32>
    %cst_43 = arith.constant 0.000000e+00 : f32
    %77 = vector.broadcast %cst_43 : f32 to vector<8x256xf32>
    %78 = arith.cmpf oge, %76, %77 : vector<8x256xf32>
    %cst_44 = arith.constant 2.000000e-01 : f32
    %79 = vector.broadcast %cst_44 : f32 to vector<8x256xf32>
    %80 = arith.mulf %79, %76 : vector<8x256xf32>
    %81 = arith.select %78, %76, %80 : vector<8x256xi1>, vector<8x256xf32>
    %c0_45 = arith.constant 0 : index
    %c0_46 = arith.constant 0 : index
    %c0_47 = arith.constant 0 : index
    %82 = vector.load %arg8[%c0_45, %c0_46, %c0_47] : memref<1x8x256xf32, #tpu.memory_space<vmem>>, vector<1x8x256xf32>
    %83 = vector.shape_cast %82 : vector<1x8x256xf32> to vector<8x256xf32>
    %84 = vector.shape_cast %81 : vector<8x256xf32> to vector<1x8x256xf32>
    tpu.vector_store %arg8[%c0_45, %c0_46, %c0_47], %84 {strides = array<i32>} : memref<1x8x256xf32, #tpu.memory_space<vmem>>, vector<1x8x256xf32>,
    return
  }
  func.func @transform_0(%arg0: i32) -> (i32, i32, i32) {
    %c0_i32 = arith.constant 0 : i32
    %c0_i32_0 = arith.constant 0 : i32
    %c0_i32_1 = arith.constant 0 : i32
    return %arg0, %c0_i32, %c0_i32_0 : i32, i32, i32
  }
  func.func @transform_1(%arg0: i32) -> (i32, i32) {
    %c0_i32 = arith.constant 0 : i32
    %c0_i32_0 = arith.constant 0 : i32
    %c0_i32_1 = arith.constant 0 : i32
    return %c0_i32, %c0_i32_0 : i32, i32
  }
  func.func @transform_2(%arg0: i32) -> (i32, i32) {
    %c0_i32 = arith.constant 0 : i32
    %c0_i32_0 = arith.constant 0 : i32
    %c0_i32_1 = arith.constant 0 : i32
    return %c0_i32, %c0_i32_0 : i32, i32
  }
  func.func @transform_3(%arg0: i32) -> (i32, i32, i32) {
    %c0_i32 = arith.constant 0 : i32
    %c0_i32_0 = arith.constant 0 : i32
    %c0_i32_1 = arith.constant 0 : i32
    %c0_i32_2 = arith.constant 0 : i32
    return %c0_i32, %c0_i32_0, %c0_i32_1 : i32, i32, i32
  }
  func.func @transform_4(%arg0: i32) -> (i32, i32, i32) {
    %c0_i32 = arith.constant 0 : i32
    %c0_i32_0 = arith.constant 0 : i32
    %c0_i32_1 = arith.constant 0 : i32
    %c0_i32_2 = arith.constant 0 : i32
    return %c0_i32, %c0_i32_0, %c0_i32_1 : i32, i32, i32
  }
  func.func @transform_5(%arg0: i32) -> (i32, i32) {
    %c0_i32 = arith.constant 0 : i32
    %c0_i32_0 = arith.constant 0 : i32
    %c0_i32_1 = arith.constant 0 : i32
    return %c0_i32, %c0_i32_0 : i32, i32
  }
  func.func @transform_6(%arg0: i32) -> (i32, i32) {
    %c0_i32 = arith.constant 0 : i32
    %c0_i32_0 = arith.constant 0 : i32
    %c0_i32_1 = arith.constant 0 : i32
    return %c0_i32, %c0_i32_0 : i32, i32
  }
  func.func @transform_7(%arg0: i32) -> (i32, i32, i32) {
    %c0_i32 = arith.constant 0 : i32
    %c0_i32_0 = arith.constant 0 : i32
    %c0_i32_1 = arith.constant 0 : i32
    return %arg0, %c0_i32, %c0_i32_0 : i32, i32, i32
  }
}

module attributes {stable_mosaic.version = 11 : i64} {
  func.func @_stage_kernel(%arg0: i32, %arg1: memref<1x32x128xf32, #tpu.memory_space<vmem>>, %arg2: memref<2x384x128xf32, #tpu.memory_space<vmem>>, %arg3: memref<2x1x128xf32, #tpu.memory_space<vmem>>, %arg4: memref<384x256xf32, #tpu.memory_space<vmem>>, %arg5: memref<1x256xf32, #tpu.memory_space<vmem>>, %arg6: memref<1x32x256xf32, #tpu.memory_space<vmem>>) attributes {dimension_semantics = [#tpu.dimension_semantics<parallel>], iteration_bounds = array<i64: 2>, scalar_prefetch = 0 : i64, scratch_operands = 0 : i64, tpu.core_type = #tpu.core_type<tc>, window_params = [{transform_indices = @transform_0, window_bounds = array<i64: 1, 32, 128>}, {pipeline_mode = #tpu.pipeline_mode<synchronous>, transform_indices = @transform_1, window_bounds = array<i64: 2, 384, 128>}, {pipeline_mode = #tpu.pipeline_mode<synchronous>, transform_indices = @transform_2, window_bounds = array<i64: 2, 1, 128>}, {pipeline_mode = #tpu.pipeline_mode<synchronous>, transform_indices = @transform_3, window_bounds = array<i64: 384, 256>}, {pipeline_mode = #tpu.pipeline_mode<synchronous>, transform_indices = @transform_4, window_bounds = array<i64: 1, 256>}, {transform_indices = @transform_5, window_bounds = array<i64: 1, 32, 256>}]} {
    %c0 = arith.constant 0 : index
    %c0_0 = arith.constant 0 : index
    %c0_1 = arith.constant 0 : index
    %0 = vector.load %arg1[%c0, %c0_0, %c0_1] : memref<1x32x128xf32, #tpu.memory_space<vmem>>, vector<1x32x128xf32>
    %1 = vector.shape_cast %0 : vector<1x32x128xf32> to vector<32x128xf32>
    %c1_i32 = arith.constant 1 : i32
    %2 = tpu.dynamic_rotate %1 by %c1_i32 dim 0 : vector<32x128xf32>, i32 -> vector<32x128xf32>
    %3 = tpu.iota {dimensions = array<i32: 0>} : vector<32x128xi32>
    %c0_i32 = arith.constant 0 : i32
    %4 = vector.broadcast %c0_i32 : i32 to vector<32x128xi32>
    %5 = arith.cmpi eq, %3, %4 : vector<32x128xi32>
    %cst = arith.constant 0.000000e+00 : f32
    %6 = vector.broadcast %cst : f32 to vector<32x128xf32>
    %7 = arith.select %5, %6, %2 : vector<32x128xi1>, vector<32x128xf32>
    %c31_i32 = arith.constant 31 : i32
    %8 = tpu.dynamic_rotate %1 by %c31_i32 dim 0 : vector<32x128xf32>, i32 -> vector<32x128xf32>
    %9 = tpu.iota {dimensions = array<i32: 0>} : vector<32x128xi32>
    %c31_i32_2 = arith.constant 31 : i32
    %10 = vector.broadcast %c31_i32_2 : i32 to vector<32x128xi32>
    %11 = arith.cmpi eq, %9, %10 : vector<32x128xi32>
    %cst_3 = arith.constant 0.000000e+00 : f32
    %12 = vector.broadcast %cst_3 : f32 to vector<32x128xf32>
    %13 = arith.select %11, %12, %8 : vector<32x128xi1>, vector<32x128xf32>
    %14 = tpu.concatenate %1, %7, %13 in 1 : vector<32x128xf32>, vector<32x128xf32>, vector<32x128xf32> -> vector<32x384xf32>
    %c0_4 = arith.constant 0 : index
    %c0_5 = arith.constant 0 : index
    %c0_6 = arith.constant 0 : index
    %15 = vector.load %arg2[%c0_4, %c0_5, %c0_6] : memref<2x384x128xf32, #tpu.memory_space<vmem>>, vector<1x384x128xf32>
    %16 = vector.shape_cast %15 : vector<1x384x128xf32> to vector<384x128xf32>
    %cst_7 = arith.constant dense<0.000000e+00> : vector<32x128xf32>
    %17 = tpu.matmul %14, %16, %cst_7 {dimension_numbers = #tpu.dot_dimension_numbers<[1], [0], [0], [1], [0, 0, 1, 1], [], []>} : vector<32x384xf32>, vector<384x128xf32>, vector<32x128xf32> -> vector<32x128xf32>
    %c0_8 = arith.constant 0 : index
    %c0_9 = arith.constant 0 : index
    %c0_10 = arith.constant 0 : index
    %18 = vector.load %arg3[%c0_8, %c0_9, %c0_10] : memref<2x1x128xf32, #tpu.memory_space<vmem>>, vector<1x1x128xf32>
    %19 = vector.shape_cast %18 : vector<1x1x128xf32> to vector<1x128xf32>
    %20 = vector.broadcast %19 : vector<1x128xf32> to vector<32x128xf32>
    %21 = arith.addf %17, %20 : vector<32x128xf32>
    %22 = arith.addf %21, %1 : vector<32x128xf32>
    %cst_11 = arith.constant 0.000000e+00 : f32
    %23 = vector.broadcast %cst_11 : f32 to vector<32x128xf32>
    %24 = arith.cmpf oge, %22, %23 : vector<32x128xf32>
    %cst_12 = arith.constant 2.000000e-01 : f32
    %25 = vector.broadcast %cst_12 : f32 to vector<32x128xf32>
    %26 = arith.mulf %25, %22 : vector<32x128xf32>
    %27 = arith.select %24, %22, %26 : vector<32x128xi1>, vector<32x128xf32>
    %c1_i32_13 = arith.constant 1 : i32
    %28 = tpu.dynamic_rotate %27 by %c1_i32_13 dim 0 : vector<32x128xf32>, i32 -> vector<32x128xf32>
    %29 = tpu.iota {dimensions = array<i32: 0>} : vector<32x128xi32>
    %c0_i32_14 = arith.constant 0 : i32
    %30 = vector.broadcast %c0_i32_14 : i32 to vector<32x128xi32>
    %31 = arith.cmpi eq, %29, %30 : vector<32x128xi32>
    %cst_15 = arith.constant 0.000000e+00 : f32
    %32 = vector.broadcast %cst_15 : f32 to vector<32x128xf32>
    %33 = arith.select %31, %32, %28 : vector<32x128xi1>, vector<32x128xf32>
    %c31_i32_16 = arith.constant 31 : i32
    %34 = tpu.dynamic_rotate %27 by %c31_i32_16 dim 0 : vector<32x128xf32>, i32 -> vector<32x128xf32>
    %35 = tpu.iota {dimensions = array<i32: 0>} : vector<32x128xi32>
    %c31_i32_17 = arith.constant 31 : i32
    %36 = vector.broadcast %c31_i32_17 : i32 to vector<32x128xi32>
    %37 = arith.cmpi eq, %35, %36 : vector<32x128xi32>
    %cst_18 = arith.constant 0.000000e+00 : f32
    %38 = vector.broadcast %cst_18 : f32 to vector<32x128xf32>
    %39 = arith.select %37, %38, %34 : vector<32x128xi1>, vector<32x128xf32>
    %40 = tpu.concatenate %27, %33, %39 in 1 : vector<32x128xf32>, vector<32x128xf32>, vector<32x128xf32> -> vector<32x384xf32>
    %c1 = arith.constant 1 : index
    %c0_19 = arith.constant 0 : index
    %c0_20 = arith.constant 0 : index
    %41 = vector.load %arg2[%c1, %c0_19, %c0_20] : memref<2x384x128xf32, #tpu.memory_space<vmem>>, vector<1x384x128xf32>
    %42 = vector.shape_cast %41 : vector<1x384x128xf32> to vector<384x128xf32>
    %cst_21 = arith.constant dense<0.000000e+00> : vector<32x128xf32>
    %43 = tpu.matmul %40, %42, %cst_21 {dimension_numbers = #tpu.dot_dimension_numbers<[1], [0], [0], [1], [0, 0, 1, 1], [], []>} : vector<32x384xf32>, vector<384x128xf32>, vector<32x128xf32> -> vector<32x128xf32>
    %c1_22 = arith.constant 1 : index
    %c0_23 = arith.constant 0 : index
    %c0_24 = arith.constant 0 : index
    %44 = vector.load %arg3[%c1_22, %c0_23, %c0_24] : memref<2x1x128xf32, #tpu.memory_space<vmem>>, vector<1x1x128xf32>
    %45 = vector.shape_cast %44 : vector<1x1x128xf32> to vector<1x128xf32>
    %46 = vector.broadcast %45 : vector<1x128xf32> to vector<32x128xf32>
    %47 = arith.addf %43, %46 : vector<32x128xf32>
    %48 = arith.addf %47, %27 : vector<32x128xf32>
    %cst_25 = arith.constant 0.000000e+00 : f32
    %49 = vector.broadcast %cst_25 : f32 to vector<32x128xf32>
    %50 = arith.cmpf oge, %48, %49 : vector<32x128xf32>
    %cst_26 = arith.constant 2.000000e-01 : f32
    %51 = vector.broadcast %cst_26 : f32 to vector<32x128xf32>
    %52 = arith.mulf %51, %48 : vector<32x128xf32>
    %53 = arith.select %50, %48, %52 : vector<32x128xi1>, vector<32x128xf32>
    %c1_i32_27 = arith.constant 1 : i32
    %54 = tpu.dynamic_rotate %53 by %c1_i32_27 dim 0 : vector<32x128xf32>, i32 -> vector<32x128xf32>
    %55 = tpu.iota {dimensions = array<i32: 0>} : vector<32x128xi32>
    %c0_i32_28 = arith.constant 0 : i32
    %56 = vector.broadcast %c0_i32_28 : i32 to vector<32x128xi32>
    %57 = arith.cmpi eq, %55, %56 : vector<32x128xi32>
    %cst_29 = arith.constant 0.000000e+00 : f32
    %58 = vector.broadcast %cst_29 : f32 to vector<32x128xf32>
    %59 = arith.select %57, %58, %54 : vector<32x128xi1>, vector<32x128xf32>
    %c31_i32_30 = arith.constant 31 : i32
    %60 = tpu.dynamic_rotate %53 by %c31_i32_30 dim 0 : vector<32x128xf32>, i32 -> vector<32x128xf32>
    %61 = tpu.iota {dimensions = array<i32: 0>} : vector<32x128xi32>
    %c31_i32_31 = arith.constant 31 : i32
    %62 = vector.broadcast %c31_i32_31 : i32 to vector<32x128xi32>
    %63 = arith.cmpi eq, %61, %62 : vector<32x128xi32>
    %cst_32 = arith.constant 0.000000e+00 : f32
    %64 = vector.broadcast %cst_32 : f32 to vector<32x128xf32>
    %65 = arith.select %63, %64, %60 : vector<32x128xi1>, vector<32x128xf32>
    %66 = tpu.concatenate %53, %59, %65 in 1 : vector<32x128xf32>, vector<32x128xf32>, vector<32x128xf32> -> vector<32x384xf32>
    %c0_33 = arith.constant 0 : index
    %c0_34 = arith.constant 0 : index
    %67 = vector.load %arg4[%c0_33, %c0_34] : memref<384x256xf32, #tpu.memory_space<vmem>>, vector<384x256xf32>
    %cst_35 = arith.constant dense<0.000000e+00> : vector<32x256xf32>
    %68 = tpu.matmul %66, %67, %cst_35 {dimension_numbers = #tpu.dot_dimension_numbers<[1], [0], [0], [1], [0, 0, 1, 1], [], []>} : vector<32x384xf32>, vector<384x256xf32>, vector<32x256xf32> -> vector<32x256xf32>
    %c0_36 = arith.constant 0 : index
    %c0_37 = arith.constant 0 : index
    %69 = vector.load %arg5[%c0_36, %c0_37] : memref<1x256xf32, #tpu.memory_space<vmem>>, vector<1x256xf32>
    %70 = vector.broadcast %69 : vector<1x256xf32> to vector<32x256xf32>
    %71 = arith.addf %68, %70 : vector<32x256xf32>
    %cst_38 = arith.constant 0.000000e+00 : f32
    %72 = vector.broadcast %cst_38 : f32 to vector<32x256xf32>
    %73 = arith.cmpf oge, %71, %72 : vector<32x256xf32>
    %cst_39 = arith.constant 2.000000e-01 : f32
    %74 = vector.broadcast %cst_39 : f32 to vector<32x256xf32>
    %75 = arith.mulf %74, %71 : vector<32x256xf32>
    %76 = arith.select %73, %71, %75 : vector<32x256xi1>, vector<32x256xf32>
    %c0_40 = arith.constant 0 : index
    %c0_41 = arith.constant 0 : index
    %c0_42 = arith.constant 0 : index
    %77 = vector.load %arg6[%c0_40, %c0_41, %c0_42] : memref<1x32x256xf32, #tpu.memory_space<vmem>>, vector<1x32x256xf32>
    %78 = vector.shape_cast %77 : vector<1x32x256xf32> to vector<32x256xf32>
    %79 = vector.shape_cast %76 : vector<32x256xf32> to vector<1x32x256xf32>
    tpu.vector_store %arg6[%c0_40, %c0_41, %c0_42], %79 {strides = array<i32>} : memref<1x32x256xf32, #tpu.memory_space<vmem>>, vector<1x32x256xf32>,
    return
  }
  func.func @transform_0(%arg0: i32) -> (i32, i32, i32) {
    %c0_i32 = arith.constant 0 : i32
    %c0_i32_0 = arith.constant 0 : i32
    %c0_i32_1 = arith.constant 0 : i32
    return %arg0, %c0_i32, %c0_i32_0 : i32, i32, i32
  }
  func.func @transform_1(%arg0: i32) -> (i32, i32, i32) {
    %c0_i32 = arith.constant 0 : i32
    %c0_i32_0 = arith.constant 0 : i32
    %c0_i32_1 = arith.constant 0 : i32
    %c0_i32_2 = arith.constant 0 : i32
    return %c0_i32, %c0_i32_0, %c0_i32_1 : i32, i32, i32
  }
  func.func @transform_2(%arg0: i32) -> (i32, i32, i32) {
    %c0_i32 = arith.constant 0 : i32
    %c0_i32_0 = arith.constant 0 : i32
    %c0_i32_1 = arith.constant 0 : i32
    %c0_i32_2 = arith.constant 0 : i32
    return %c0_i32, %c0_i32_0, %c0_i32_1 : i32, i32, i32
  }
  func.func @transform_3(%arg0: i32) -> (i32, i32) {
    %c0_i32 = arith.constant 0 : i32
    %c0_i32_0 = arith.constant 0 : i32
    %c0_i32_1 = arith.constant 0 : i32
    return %c0_i32, %c0_i32_0 : i32, i32
  }
  func.func @transform_4(%arg0: i32) -> (i32, i32) {
    %c0_i32 = arith.constant 0 : i32
    %c0_i32_0 = arith.constant 0 : i32
    %c0_i32_1 = arith.constant 0 : i32
    return %c0_i32, %c0_i32_0 : i32, i32
  }
  func.func @transform_5(%arg0: i32) -> (i32, i32, i32) {
    %c0_i32 = arith.constant 0 : i32
    %c0_i32_0 = arith.constant 0 : i32
    %c0_i32_1 = arith.constant 0 : i32
    return %arg0, %c0_i32, %c0_i32_0 : i32, i32, i32
  }
}

module attributes {stable_mosaic.version = 11 : i64} {
  func.func @_stage_kernel(%arg0: i32, %arg1: memref<1x64x128xf32, #tpu.memory_space<vmem>>, %arg2: memref<2x384x128xf32, #tpu.memory_space<vmem>>, %arg3: memref<2x1x128xf32, #tpu.memory_space<vmem>>, %arg4: memref<128x128xf32, #tpu.memory_space<vmem>>, %arg5: memref<1x128xf32, #tpu.memory_space<vmem>>, %arg6: memref<1x64x128xf32, #tpu.memory_space<vmem>>) attributes {dimension_semantics = [#tpu.dimension_semantics<parallel>], iteration_bounds = array<i64: 2>, scalar_prefetch = 0 : i64, scratch_operands = 0 : i64, tpu.core_type = #tpu.core_type<tc>, window_params = [{transform_indices = @transform_0, window_bounds = array<i64: 1, 64, 128>}, {pipeline_mode = #tpu.pipeline_mode<synchronous>, transform_indices = @transform_1, window_bounds = array<i64: 2, 384, 128>}, {pipeline_mode = #tpu.pipeline_mode<synchronous>, transform_indices = @transform_2, window_bounds = array<i64: 2, 1, 128>}, {pipeline_mode = #tpu.pipeline_mode<synchronous>, transform_indices = @transform_3, window_bounds = array<i64: 128, 128>}, {pipeline_mode = #tpu.pipeline_mode<synchronous>, transform_indices = @transform_4, window_bounds = array<i64: 1, 128>}, {transform_indices = @transform_5, window_bounds = array<i64: 1, 64, 128>}]} {
    %c0 = arith.constant 0 : index
    %c0_0 = arith.constant 0 : index
    %c0_1 = arith.constant 0 : index
    %0 = vector.load %arg1[%c0, %c0_0, %c0_1] : memref<1x64x128xf32, #tpu.memory_space<vmem>>, vector<1x64x128xf32>
    %1 = vector.shape_cast %0 : vector<1x64x128xf32> to vector<64x128xf32>
    %c1_i32 = arith.constant 1 : i32
    %2 = tpu.dynamic_rotate %1 by %c1_i32 dim 0 : vector<64x128xf32>, i32 -> vector<64x128xf32>
    %3 = tpu.iota {dimensions = array<i32: 0>} : vector<64x128xi32>
    %c0_i32 = arith.constant 0 : i32
    %4 = vector.broadcast %c0_i32 : i32 to vector<64x128xi32>
    %5 = arith.cmpi eq, %3, %4 : vector<64x128xi32>
    %cst = arith.constant 0.000000e+00 : f32
    %6 = vector.broadcast %cst : f32 to vector<64x128xf32>
    %7 = arith.select %5, %6, %2 : vector<64x128xi1>, vector<64x128xf32>
    %c63_i32 = arith.constant 63 : i32
    %8 = tpu.dynamic_rotate %1 by %c63_i32 dim 0 : vector<64x128xf32>, i32 -> vector<64x128xf32>
    %9 = tpu.iota {dimensions = array<i32: 0>} : vector<64x128xi32>
    %c63_i32_2 = arith.constant 63 : i32
    %10 = vector.broadcast %c63_i32_2 : i32 to vector<64x128xi32>
    %11 = arith.cmpi eq, %9, %10 : vector<64x128xi32>
    %cst_3 = arith.constant 0.000000e+00 : f32
    %12 = vector.broadcast %cst_3 : f32 to vector<64x128xf32>
    %13 = arith.select %11, %12, %8 : vector<64x128xi1>, vector<64x128xf32>
    %14 = tpu.concatenate %1, %7, %13 in 1 : vector<64x128xf32>, vector<64x128xf32>, vector<64x128xf32> -> vector<64x384xf32>
    %c0_4 = arith.constant 0 : index
    %c0_5 = arith.constant 0 : index
    %c0_6 = arith.constant 0 : index
    %15 = vector.load %arg2[%c0_4, %c0_5, %c0_6] : memref<2x384x128xf32, #tpu.memory_space<vmem>>, vector<1x384x128xf32>
    %16 = vector.shape_cast %15 : vector<1x384x128xf32> to vector<384x128xf32>
    %cst_7 = arith.constant dense<0.000000e+00> : vector<64x128xf32>
    %17 = tpu.matmul %14, %16, %cst_7 {dimension_numbers = #tpu.dot_dimension_numbers<[1], [0], [0], [1], [0, 0, 1, 1], [], []>} : vector<64x384xf32>, vector<384x128xf32>, vector<64x128xf32> -> vector<64x128xf32>
    %c0_8 = arith.constant 0 : index
    %c0_9 = arith.constant 0 : index
    %c0_10 = arith.constant 0 : index
    %18 = vector.load %arg3[%c0_8, %c0_9, %c0_10] : memref<2x1x128xf32, #tpu.memory_space<vmem>>, vector<1x1x128xf32>
    %19 = vector.shape_cast %18 : vector<1x1x128xf32> to vector<1x128xf32>
    %20 = vector.broadcast %19 : vector<1x128xf32> to vector<64x128xf32>
    %21 = arith.addf %17, %20 : vector<64x128xf32>
    %22 = arith.addf %21, %1 : vector<64x128xf32>
    %cst_11 = arith.constant 0.000000e+00 : f32
    %23 = vector.broadcast %cst_11 : f32 to vector<64x128xf32>
    %24 = arith.cmpf oge, %22, %23 : vector<64x128xf32>
    %cst_12 = arith.constant 2.000000e-01 : f32
    %25 = vector.broadcast %cst_12 : f32 to vector<64x128xf32>
    %26 = arith.mulf %25, %22 : vector<64x128xf32>
    %27 = arith.select %24, %22, %26 : vector<64x128xi1>, vector<64x128xf32>
    %c1_i32_13 = arith.constant 1 : i32
    %28 = tpu.dynamic_rotate %27 by %c1_i32_13 dim 0 : vector<64x128xf32>, i32 -> vector<64x128xf32>
    %29 = tpu.iota {dimensions = array<i32: 0>} : vector<64x128xi32>
    %c0_i32_14 = arith.constant 0 : i32
    %30 = vector.broadcast %c0_i32_14 : i32 to vector<64x128xi32>
    %31 = arith.cmpi eq, %29, %30 : vector<64x128xi32>
    %cst_15 = arith.constant 0.000000e+00 : f32
    %32 = vector.broadcast %cst_15 : f32 to vector<64x128xf32>
    %33 = arith.select %31, %32, %28 : vector<64x128xi1>, vector<64x128xf32>
    %c63_i32_16 = arith.constant 63 : i32
    %34 = tpu.dynamic_rotate %27 by %c63_i32_16 dim 0 : vector<64x128xf32>, i32 -> vector<64x128xf32>
    %35 = tpu.iota {dimensions = array<i32: 0>} : vector<64x128xi32>
    %c63_i32_17 = arith.constant 63 : i32
    %36 = vector.broadcast %c63_i32_17 : i32 to vector<64x128xi32>
    %37 = arith.cmpi eq, %35, %36 : vector<64x128xi32>
    %cst_18 = arith.constant 0.000000e+00 : f32
    %38 = vector.broadcast %cst_18 : f32 to vector<64x128xf32>
    %39 = arith.select %37, %38, %34 : vector<64x128xi1>, vector<64x128xf32>
    %40 = tpu.concatenate %27, %33, %39 in 1 : vector<64x128xf32>, vector<64x128xf32>, vector<64x128xf32> -> vector<64x384xf32>
    %c1 = arith.constant 1 : index
    %c0_19 = arith.constant 0 : index
    %c0_20 = arith.constant 0 : index
    %41 = vector.load %arg2[%c1, %c0_19, %c0_20] : memref<2x384x128xf32, #tpu.memory_space<vmem>>, vector<1x384x128xf32>
    %42 = vector.shape_cast %41 : vector<1x384x128xf32> to vector<384x128xf32>
    %cst_21 = arith.constant dense<0.000000e+00> : vector<64x128xf32>
    %43 = tpu.matmul %40, %42, %cst_21 {dimension_numbers = #tpu.dot_dimension_numbers<[1], [0], [0], [1], [0, 0, 1, 1], [], []>} : vector<64x384xf32>, vector<384x128xf32>, vector<64x128xf32> -> vector<64x128xf32>
    %c1_22 = arith.constant 1 : index
    %c0_23 = arith.constant 0 : index
    %c0_24 = arith.constant 0 : index
    %44 = vector.load %arg3[%c1_22, %c0_23, %c0_24] : memref<2x1x128xf32, #tpu.memory_space<vmem>>, vector<1x1x128xf32>
    %45 = vector.shape_cast %44 : vector<1x1x128xf32> to vector<1x128xf32>
    %46 = vector.broadcast %45 : vector<1x128xf32> to vector<64x128xf32>
    %47 = arith.addf %43, %46 : vector<64x128xf32>
    %48 = arith.addf %47, %27 : vector<64x128xf32>
    %cst_25 = arith.constant 0.000000e+00 : f32
    %49 = vector.broadcast %cst_25 : f32 to vector<64x128xf32>
    %50 = arith.cmpf oge, %48, %49 : vector<64x128xf32>
    %cst_26 = arith.constant 2.000000e-01 : f32
    %51 = vector.broadcast %cst_26 : f32 to vector<64x128xf32>
    %52 = arith.mulf %51, %48 : vector<64x128xf32>
    %53 = arith.select %50, %48, %52 : vector<64x128xi1>, vector<64x128xf32>
    %c0_27 = arith.constant 0 : index
    %c0_28 = arith.constant 0 : index
    %54 = vector.load %arg4[%c0_27, %c0_28] : memref<128x128xf32, #tpu.memory_space<vmem>>, vector<128x128xf32>
    %cst_29 = arith.constant dense<0.000000e+00> : vector<64x128xf32>
    %55 = tpu.matmul %53, %54, %cst_29 {dimension_numbers = #tpu.dot_dimension_numbers<[1], [0], [0], [1], [0, 0, 1, 1], [], []>} : vector<64x128xf32>, vector<128x128xf32>, vector<64x128xf32> -> vector<64x128xf32>
    %c0_30 = arith.constant 0 : index
    %c0_31 = arith.constant 0 : index
    %56 = vector.load %arg5[%c0_30, %c0_31] : memref<1x128xf32, #tpu.memory_space<vmem>>, vector<1x128xf32>
    %57 = vector.broadcast %56 : vector<1x128xf32> to vector<64x128xf32>
    %58 = arith.addf %55, %57 : vector<64x128xf32>
    %c0_32 = arith.constant 0 : index
    %c0_33 = arith.constant 0 : index
    %c0_34 = arith.constant 0 : index
    %59 = vector.load %arg6[%c0_32, %c0_33, %c0_34] : memref<1x64x128xf32, #tpu.memory_space<vmem>>, vector<1x64x128xf32>
    %60 = vector.shape_cast %59 : vector<1x64x128xf32> to vector<64x128xf32>
    %61 = vector.shape_cast %58 : vector<64x128xf32> to vector<1x64x128xf32>
    tpu.vector_store %arg6[%c0_32, %c0_33, %c0_34], %61 {strides = array<i32>} : memref<1x64x128xf32, #tpu.memory_space<vmem>>, vector<1x64x128xf32>,
    return
  }
  func.func @transform_0(%arg0: i32) -> (i32, i32, i32) {
    %c0_i32 = arith.constant 0 : i32
    %c0_i32_0 = arith.constant 0 : i32
    %c0_i32_1 = arith.constant 0 : i32
    return %arg0, %c0_i32, %c0_i32_0 : i32, i32, i32
  }
  func.func @transform_1(%arg0: i32) -> (i32, i32, i32) {
    %c0_i32 = arith.constant 0 : i32
    %c0_i32_0 = arith.constant 0 : i32
    %c0_i32_1 = arith.constant 0 : i32
    %c0_i32_2 = arith.constant 0 : i32
    return %c0_i32, %c0_i32_0, %c0_i32_1 : i32, i32, i32
  }
  func.func @transform_2(%arg0: i32) -> (i32, i32, i32) {
    %c0_i32 = arith.constant 0 : i32
    %c0_i32_0 = arith.constant 0 : i32
    %c0_i32_1 = arith.constant 0 : i32
    %c0_i32_2 = arith.constant 0 : i32
    return %c0_i32, %c0_i32_0, %c0_i32_1 : i32, i32, i32
  }
  func.func @transform_3(%arg0: i32) -> (i32, i32) {
    %c0_i32 = arith.constant 0 : i32
    %c0_i32_0 = arith.constant 0 : i32
    %c0_i32_1 = arith.constant 0 : i32
    return %c0_i32, %c0_i32_0 : i32, i32
  }
  func.func @transform_4(%arg0: i32) -> (i32, i32) {
    %c0_i32 = arith.constant 0 : i32
    %c0_i32_0 = arith.constant 0 : i32
    %c0_i32_1 = arith.constant 0 : i32
    return %c0_i32, %c0_i32_0 : i32, i32
  }
  func.func @transform_5(%arg0: i32) -> (i32, i32, i32) {
    %c0_i32 = arith.constant 0 : i32
    %c0_i32_0 = arith.constant 0 : i32
    %c0_i32_1 = arith.constant 0 : i32
    return %arg0, %c0_i32, %c0_i32_0 : i32, i32, i32
  }
}

</mosaic_0001>

<bundles_post_ra>
// kernel: decoder_forward.4
= control target key start
LH: loop header
LB: loop body
LE: loop exit
PB: predicated region body
PF: predicated region fallthrough
CT: control target
= control target key end

     0   :  { %12 = vsyncpa [#allocation3], 0  ;;  %s1997_s0 = inlined_call_operand.vmem [shape: f32[2,8,16], index: 0, kind: input, shape index: {}]   ;;  %s1998_s1 = inlined_call_operand.vmem [shape: f32[16,128], index: 1, kind: input, shape index: {}]   ;;  %s1999_s2 = inlined_call_operand.hbm [shape: f32[1,128], index: 2, kind: input, shape index: {}]   ;;  %s2000_s3 = inlined_call_operand.hbm [shape: f32[2,384,128], index: 3, kind: input, shape index: {}]   ;;  %s2001_s4 = inlined_call_operand.vmem [shape: f32[2,1,128], index: 4, kind: input, shape index: {}]   ;;  %s2002_s5 = inlined_call_operand.hbm [shape: f32[384,256], index: 5, kind: input, shape index: {}]   ;;  %s2003_s6 = inlined_call_operand.vmem [shape: f32[1,256], index: 6, kind: input, shape index: {}]   ;;  %s2004_s7 = inlined_call_operand.vmem [shape: f32[2,8,256], index: 7, kind: output, shape index: {}]  }
   0x1   :  { %13 = vsyncpa [#allocation5], 0  ;;  %s1793_s24 = smov 0  }
   0x2 LB: > { %s1743_s25 = smov [#allocation4]   ;;  %s1799_s27 = sadd.s32 4294967295, %s1741_s24   ;;  %s1741_s24 = sphi %s1793_s24, %s19_s24  }
   0x3   : > { %s228_s26 = sshll.u32 %s1743_s25, 4  ;;  %p1164_p0 = scmp.ge.s32.totalorder %s1741_s24, 1  ;;  %s1804_s26 = int_to_ptr.vmem [resolvable:$true] %s228_s26 }
   0x4   : > { %p202_p1 = scmp.lt.s32.totalorder %s1741_s24, 3  ;;  %p1619_p2 = scmp.eq.s32.totalorder %s1799_s27, 0 }
   0x5   : > { %s1744_s29 = smov [#allocation2]   ;;  %s1745_s9 = smov [#allocation6]  }
   0x6   : > { %p1806_p3 = pnand %p1164_p0, %p202_p1  ;;  %s218_s30 = sshll.u32 %s1744_s29, 4  ;;  %s1812_s30 = int_to_ptr.vmem [resolvable:$true] %s218_s30 }
   0x7   : > { %s244_s10 = sshll.u32 %s1745_s9, 4  ;;  %s1643_s13 = scalar_lea.hbm %s2000_s3, 12288  ;;  %s1820_s10 = int_to_ptr.vmem [resolvable:$true] %s244_s10 }
   0x8   : > { %p1609_p4 = pneg %p1806_p3  ;;  %p1644_p6 = scmp.ne.s32.totalorder %s2000_s3, %s1643_s13 }
   0x9   : > { %p1650_p10 = scmp.lt.u32.totalorder %s1643_s13, %s2000_s3 }
   0xa   : > { %p1816_p5 = pnand %p1619_p2, %p1609_p4 }
   0xc   : > { %p1830_p7 = pneg %p1816_p5 }
   0xe   : > { %p1646_p8 = pnand %p1830_p7, %p1644_p6 }
  0x10   : > { %p1647_p9 = pneg %p1646_p8 }
  0x12   : > { %p1652_p11 = pnand %p1650_p10, %p1647_p9 }
  0x14   : > { %1655 = shalt.err (!%p1652_p11)
}
  0x15   : > { %s1656_s19 = scalar_lea.vmem %s1804_s26, 12288  ;;  %p1664_p1 = scmp.lt.s32.totalorder %s1804_s26, %s1804_s26 }
  0x16   : > { %p1657_p12 = scmp.ne.s32.totalorder %s1804_s26, %s1656_s19  ;;  %p1665_p4 = scmp.lt.s32.totalorder %s1656_s19, %s1656_s19 }
  0x18   : > { %p1659_p13 = pnand %p1657_p12, %p1830_p7  ;;  %p1666_p6 = por %p1665_p4, %p1664_p1 }
  0x1a   : > { %p1660_p0 = pneg %p1659_p13 }
  0x1c   : > { %p1667_p8 = pnand %p1666_p6, %p1660_p0 }
  0x1e   : > { %1670 = shalt.err (!%p1667_p8)
}
  0x1f   : > { %s1746_s20 = smov 128   ;;  %s1747_s21 = smov 8  }
  0x20   : > { %1615 = dma.hbm_to_vmem [thread:$0]  (!%p1816_p5), %s2000_s3, 12288, %s1804_s26, [#allocation5], %s1746_s20, %s1746_s20, %s1747_s21  }
  0x21   : > { %s1671_s9 = scalar_lea.hbm %s1999_s2, 16 }
  0x22   : > { %p1672_p9 = scmp.ne.s32.totalorder %s1999_s2, %s1671_s9  ;;  %p1678_p12 = scmp.lt.u32.totalorder %s1671_s9, %s1999_s2 }
  0x24   : > { %p1674_p10 = pnand %p1672_p9, %p1830_p7 }
  0x26   : > { %p1675_p11 = pneg %p1674_p10 }
  0x28   : > { %p1680_p13 = pnand %p1678_p12, %p1675_p11 }
  0x2a   : > { %1683 = shalt.err (!%p1680_p13)
}
  0x2b   : > { %s1684_s26 = scalar_lea.vmem %s1812_s30, 16  ;;  %s1691_s15 = scalar_lea.vmem %s1812_s30, 32 }
  0x2c   : > { %p1685_p0 = scmp.ne.s32.totalorder %s1812_s30, %s1684_s26  ;;  %p1692_p6 = scmp.lt.s32.totalorder %s1812_s30, %s1812_s30 }
  0x2d   : > { %p1693_p8 = scmp.lt.s32.totalorder %s1691_s15, %s1684_s26 }
  0x2e   : > { %p1687_p1 = pnand %p1685_p0, %p1830_p7 }
  0x2f   : > { %p1694_p9 = por %p1693_p8, %p1692_p6 }
  0x30   : > { %p1688_p4 = pneg %p1687_p1 }
  0x32   : > { %p1695_p10 = pnand %p1694_p9, %p1688_p4 }
  0x34   : > { %1698 = shalt.err (!%p1695_p10)
}
  0x35   : > { %1612 = dma.hbm_to_vmem [thread:$0]  (!%p1816_p5), %s1999_s2, 16, %s1812_s30, [#allocation3]  }
  0x36   : > { %s1699_s21 = scalar_lea.hbm %s2002_s5, 12288 }
  0x37   : > { %p1700_p11 = scmp.ne.s32.totalorder %s2002_s5, %s1699_s21  ;;  %p1706_p0 = scmp.lt.u32.totalorder %s1699_s21, %s2002_s5 }
  0x39   : > { %p1702_p12 = pnand %p1700_p11, %p1830_p7 }
  0x3b   : > { %p1703_p13 = pneg %p1702_p12 }
  0x3d   : > { %p1708_p1 = pnand %p1706_p0, %p1703_p13 }
  0x3f   : > { %1711 = shalt.err (!%p1708_p1)
}
  0x40   : > { %s1712_s30 = scalar_lea.vmem %s1820_s10, 12288  ;;  %p1720_p9 = scmp.lt.s32.totalorder %s1820_s10, %s1820_s10 }
  0x41   : > { %p1713_p4 = scmp.ne.s32.totalorder %s1820_s10, %s1712_s30  ;;  %p1721_p10 = scmp.lt.s32.totalorder %s1712_s30, %s1712_s30 }
  0x43   : > { %p1715_p6 = pnand %p1713_p4, %p1830_p7  ;;  %p1722_p11 = por %p1721_p10, %p1720_p9 }
  0x45   : > { %p1716_p8 = pneg %p1715_p6 }
  0x47   : > { %p1723_p12 = pnand %p1722_p11, %p1716_p8 }
  0x49   : > { %1726 = shalt.err (!%p1723_p12)
}
  0x4a   : > { %s1748_s9 = smov 256   ;;  %s1749_s11 = smov 16  }
  0x4b   : > { %1618 = dma.hbm_to_vmem [thread:$0]  (!%p1816_p5), %s2002_s5, 12288, %s1820_s10, [#allocation5], %s1748_s9, %s1748_s9, %s1749_s11  }
  0x4c   : > { %270 = sbr.rel (%p1806_p3) target bundleno = 1042 (0x412), region = 48 }
  0x53   : > { %1732 = dma.done.wait (%p1619_p2), [#allocation3], 16  }
  0x54   : > { %1734 = vsyncadd (%p1619_p2), [#allocation3], 4294967280 }
  0x55   : > { %1736 = dma.done.wait (%p1619_p2), [#allocation5], 24576  }
  0x56   : > { %1738 = vsyncadd (%p1619_p2), [#allocation5], 4294942720  ;;  %p309_p7 = scmp.lt.s32.totalorder %s1799_s27, 1  ;;  %v1750_v0 = vmov 0.0|0.0   ;;  %vm1751_vm0 = vmmov 0   ;;  %v1752_v1 = vmov 0.0   ;;  %v403_v54 = vlaneseq }
  0x57   : > { %1382 = vmatprep.subr.bf16.mxu0 %v1750_v0  ;;  %1309 = vmatprep.mubr.msk.f32.mxu0 %vm1751_vm0, %v1752_v1  ;;  %v319_v2 = vld [vmem:[%s1998_s1] sm:$0xff]  ;;  %v320_v3 = vld [vmem:[%s1998_s1 + $0x8] sm:$0xff]  ;;  %v428_v10 = vld [vmem:[#allocation4 + $0x90] sm:$0xff]  ;;  %vm328_vm1 = vcmask 130048  }
  0x58   : > { %s2009_s27 = smov (!%p309_p7, %s1799_s27), 1  ;;  %v1383_v4 = vpack.c.bf16 %v320_v3, %v319_v2  ;;  %v426_v5 = vld [vmem:[#allocation4 + $0x80] sm:$0xff]  ;;  %v427_v6 = vld [vmem:[#allocation4 + $0x88] sm:$0xff]  ;;  %v429_v11 = vld [vmem:[#allocation4 + $0x98] sm:$0xff]  ;;  %v1926_v56 = vshrl.u32 %v403_v54, 7 }
  0x59   : > { %s1173_s28 = sshll.u32 %s2009_s27, 3  ;;  %v410_v7 = vld [vmem:[#allocation4] sm:$0xff]  ;;  %v1385_v8 = vpack.c.bf16 %v427_v6, %v426_v5  ;;  %v411_v9 = vld [vmem:[#allocation4 + $0x8] sm:$0xff]  ;;  %v1389_v14 = vpack.c.bf16 %v429_v11, %v428_v10  ;;  %v412_v15 = vld [vmem:[#allocation4 + $0x10] sm:$0xff]  ;;  %s1195_s25 = sshll.u32 %s2009_s27, 4 }
  0x5a   : > { %s312_s17 = scalar_lea.vmem %s1997_s0, %s1173_s28  ;;  %1384 = vmatpush3.bf16.msra.mxu0 %v1383_v4  ;;  %v1387_v13 = vpack.c.bf16 %v411_v9, %v410_v7  ;;  %v413_v16 = vld [vmem:[#allocation4 + $0x18] sm:$0xff]  ;;  %v430_v17 = vld [vmem:[#allocation4 + $0xa0] sm:$0xff]  ;;  %v431_v18 = vld [vmem:[#allocation4 + $0xa8] sm:$0xff]  ;;  %vm1196_vm2 = vcmp.ne.s32.totalorder %v1926_v56, 0  ;;  %vm1197_vm3 = vcmp.ne.s32.totalorder %v1926_v56, 7  ;;  %s317_s9 = scalar_lea.vmem %s2004_s7, %s1195_s25 }
  0x5b   : > { %v318_v12 = vld [vmem:[%s312_s17] sm:$0xff]  ;;  %1386 = vmatprep.subr.bf16.mxu0 %v1385_v8  ;;  %v1391_v19 = vpack.c.bf16 %v413_v16, %v412_v15  ;;  %v1393_v20 = vpack.c.bf16 %v431_v18, %v430_v17  ;;  %v415_v22 = vld [vmem:[#allocation4 + $0x28] sm:$0xff]  ;;  %v432_v23 = vld [vmem:[#allocation4 + $0xb0] sm:$0xff] }
  0x5c   : > { %v414_v21 = vld [vmem:[#allocation4 + $0x20] sm:$0xff]  ;;  %v433_v24 = vld [vmem:[#allocation4 + $0xb8] sm:$0xff]  ;;  %v416_v27 = vld [vmem:[#allocation4 + $0x30] sm:$0xff] }
  0x5d   : > { %1310 = vmatmul.mubr.msk.f32.vlgmr.msra.gmra.mrb[0].mxu0 %vm328_vm1, %v318_v12  ;;  %v1395_v25 = vpack.c.bf16 %v415_v22, %v414_v21  ;;  %v1397_v26 = vpack.c.bf16 %v433_v24, %v432_v23  ;;  %v417_v28 = vld [vmem:[#allocation4 + $0x38] sm:$0xff]  ;;  %v434_v29 = vld [vmem:[#allocation4 + $0xc0] sm:$0xff]  ;;  %v435_v30 = vld [vmem:[#allocation4 + $0xc8] sm:$0xff] }
  0x5e   : > { %1388 = vmatpush3.bf16.msra.mxu0 %v1387_v13  ;;  %v1399_v31 = vpack.c.bf16 %v417_v28, %v416_v27  ;;  %v1401_v32 = vpack.c.bf16 %v435_v30, %v434_v29  ;;  %v418_v33 = vld [vmem:[#allocation4 + $0x40] sm:$0xff]  ;;  %v419_v34 = vld [vmem:[#allocation4 + $0x48] sm:$0xff]  ;;  %v436_v35 = vld [vmem:[#allocation4 + $0xd0] sm:$0xff] }
  0x5f   : > { %1390 = vmatprep.subr.bf16.mxu0 %v1389_v14  ;;  %v437_v36 = vld [vmem:[#allocation4 + $0xd8] sm:$0xff]  ;;  %v1403_v37 = vpack.c.bf16 %v419_v34, %v418_v33  ;;  %v420_v39 = vld [vmem:[#allocation4 + $0x50] sm:$0xff]  ;;  %v438_v41 = vld [vmem:[#allocation4 + $0xe0] sm:$0xff] }
  0x60   : > { %v1405_v38 = vpack.c.bf16 %v437_v36, %v436_v35  ;;  %v421_v40 = vld [vmem:[#allocation4 + $0x58] sm:$0xff]  ;;  %v439_v42 = vld [vmem:[#allocation4 + $0xe8] sm:$0xff]  ;;  %v422_v45 = vld [vmem:[#allocation4 + $0x60] sm:$0xff] }
  0x61   : > { %v1407_v43 = vpack.c.bf16 %v421_v40, %v420_v39  ;;  %v1409_v44 = vpack.c.bf16 %v439_v42, %v438_v41  ;;  %v423_v46 = vld [vmem:[#allocation4 + $0x68] sm:$0xff]  ;;  %v440_v48 = vld [vmem:[#allocation4 + $0xf0] sm:$0xff]  ;;  %v441_v49 = vld [vmem:[#allocation4 + $0xf8] sm:$0xff] }
  0x62   : > { %1392 = vmatpush3.bf16.msra.mxu0 %v1391_v19  ;;  %v1411_v47 = vpack.c.bf16 %v423_v46, %v422_v45  ;;  %v1413_v50 = vpack.c.bf16 %v441_v49, %v440_v48  ;;  %v424_v51 = vld [vmem:[#allocation4 + $0x70] sm:$0xff]  ;;  %v425_v52 = vld [vmem:[#allocation4 + $0x78] sm:$0xff]  ;;  %v442_v58 = vld [vmem:[#allocation4 + $0x100] sm:$0xff] }
  0x63   : > { %1394 = vmatprep.subr.bf16.mxu0 %v1393_v20  ;;  %v1415_v53 = vpack.c.bf16 %v425_v52, %v424_v51  ;;  %v1176_v55 = vld [vmem:[#allocation2] ss:$0 sm:$0xff]  ;;  %v443_v59 = vld [vmem:[#allocation4 + $0x108] sm:$0xff]  ;;  %v444_v2 = vld [vmem:[#allocation4 + $0x110] sm:$0xff] }
  0x64   : > { %v1418_v63 = vpack.c.bf16 %v443_v59, %v442_v58  ;;  %v445_v3 = vld [vmem:[#allocation4 + $0x118] sm:$0xff]  ;;  %v446_v5 = vld [vmem:[#allocation4 + $0x120] sm:$0xff]  ;;  %v447_v6 = vld [vmem:[#allocation4 + $0x128] sm:$0xff] }
  0x65   : > { %v1421_v4 = vpack.c.bf16 %v445_v3, %v444_v2  ;;  %v1424_v7 = vpack.c.bf16 %v447_v6, %v446_v5  ;;  %v448_v8 = vld [vmem:[#allocation4 + $0x130] sm:$0xff]  ;;  %v449_v9 = vld [vmem:[#allocation4 + $0x138] sm:$0xff]  ;;  %v450_v11 = vld [vmem:[#allocation4 + $0x140] sm:$0xff] }
  0x66   : > { %1396 = vmatpush3.bf16.msra.mxu0 %v1395_v25  ;;  %v1427_v10 = vpack.c.bf16 %v449_v9, %v448_v8  ;;  %v451_v12 = vld [vmem:[#allocation4 + $0x148] sm:$0xff]  ;;  %v452_v14 = vld [vmem:[#allocation4 + $0x150] sm:$0xff]  ;;  %v453_v15 = vld [vmem:[#allocation4 + $0x158] sm:$0xff] }
  0x67   : > { %1398 = vmatprep.subr.bf16.mxu0 %v1397_v26  ;;  %v1430_v13 = vpack.c.bf16 %v451_v12, %v450_v11  ;;  %v1433_v16 = vpack.c.bf16 %v453_v15, %v452_v14  ;;  %v454_v17 = vld [vmem:[#allocation4 + $0x160] sm:$0xff]  ;;  %v455_v18 = vld [vmem:[#allocation4 + $0x168] sm:$0xff]  ;;  %v456_v20 = vld [vmem:[#allocation4 + $0x170] sm:$0xff] }
  0x68   : > { %v1436_v19 = vpack.c.bf16 %v455_v18, %v454_v17  ;;  %v457_v21 = vld [vmem:[#allocation4 + $0x178] sm:$0xff]  ;;  %v630_v24 = vld [vmem:[#allocation4 + $0x200] sm:$0xff]  ;;  %v631_v25 = vld [vmem:[#allocation4 + $0x208] sm:$0xff] }
  0x69   : > { %v1439_v22 = vpack.c.bf16 %v457_v21, %v456_v20  ;;  %v646_v26 = vld [vmem:[#allocation4 + $0x280] sm:$0xff]  ;;  %v1441_v27 = vpack.c.bf16 %v631_v25, %v630_v24  ;;  %v647_v28 = vld [vmem:[#allocation4 + $0x288] sm:$0xff]  ;;  %v632_v33 = vld [vmem:[#allocation4 + $0x210] sm:$0xff] }
  0x6a   : > { %1400 = vmatpush3.bf16.msra.mxu0 %v1399_v31  ;;  %v614_v29 = vld [vmem:[#allocation4 + $0x180] sm:$0xff]  ;;  %v615_v30 = vld [vmem:[#allocation4 + $0x188] sm:$0xff]  ;;  %v1474_v31 = vpack.c.bf16 %v647_v28, %v646_v26  ;;  %v633_v34 = vld [vmem:[#allocation4 + $0x218] sm:$0xff] }
  0x6b   : > { %1402 = vmatprep.subr.bf16.mxu0 %v1401_v32  ;;  %v1443_v32 = vpack.c.bf16 %v615_v30, %v614_v29  ;;  %v648_v35 = vld [vmem:[#allocation4 + $0x290] sm:$0xff]  ;;  %1442 = vmatprep.subr.bf16.mxu1 %v1441_v27  ;;  %v1445_v36 = vpack.c.bf16 %v633_v34, %v632_v33  ;;  %v617_v39 = vld [vmem:[#allocation4 + $0x198] sm:$0xff]  ;;  %v634_v42 = vld [vmem:[#allocation4 + $0x220] sm:$0xff] }
  0x6c   : > { %v651_v46 = vld [vmem:[#allocation4 + $0x2a8] sm:$0xff]  ;;  %v636_v49 = vld [vmem:[#allocation4 + $0x230] sm:$0xff]  ;;  %v621_v58 = vld [vmem:[#allocation4 + $0x1b8] sm:$0xff] }
  0x6d   : > { %1444 = vmatpush3.bf16.msra.mxu1 %v1443_v32  ;;  %v619_v48 = vld [vmem:[#allocation4 + $0x1a8] sm:$0xff]  ;;  %v638_v59 = vld [vmem:[#allocation4 + $0x240] sm:$0xff]  ;;  %v641_v8 = vld [vmem:[#allocation4 + $0x258] sm:$0xff] }
  0x6e   : > { %1404 = vmatpush3.bf16.msra.mxu0 %v1403_v37  ;;  %v649_v37 = vld [vmem:[#allocation4 + $0x298] sm:$0xff]  ;;  %1446 = vmatprep.subr.bf16.mxu1 %v1445_v36  ;;  %v654_v2 = vld [vmem:[#allocation4 + $0x2c0] sm:$0xff]  ;;  %v623_v6 = vld [vmem:[#allocation4 + $0x1c8] sm:$0xff] }
  0x6f   : > { %1406 = vmatprep.subr.bf16.mxu0 %v1405_v38  ;;  %v616_v38 = vld [vmem:[#allocation4 + $0x190] sm:$0xff]  ;;  %v1477_v40 = vpack.c.bf16 %v649_v37, %v648_v35  ;;  %v622_v5 = vld [vmem:[#allocation4 + $0x1c0] sm:$0xff]  ;;  %v627_v24 = vld [vmem:[#allocation4 + $0x1e8] sm:$0xff] }
  0x70   : > { %v1447_v41 = vpack.c.bf16 %v617_v39, %v616_v38  ;;  %v656_v12 = vld [vmem:[#allocation4 + $0x2d0] sm:$0xff]  ;;  %v642_v18 = vld [vmem:[#allocation4 + $0x260] sm:$0xff]  ;;  %v645_v28 = vld [vmem:[#allocation4 + $0x278] sm:$0xff] }
  0x71   : > { %v624_v15 = vld [vmem:[#allocation4 + $0x1d0] sm:$0xff]  ;;  %v658_v20 = vld [vmem:[#allocation4 + $0x2e0] sm:$0xff]  ;;  %v629_v33 = vld [vmem:[#allocation4 + $0x1f8] sm:$0xff] }
  0x72   : > { %1408 = vmatpush3.bf16.msra.mxu0 %v1407_v43  ;;  %v635_v43 = vld [vmem:[#allocation4 + $0x228] sm:$0xff]  ;;  %1448 = vmatpush3.bf16.msra.mxu1 %v1447_v41  ;;  %v644_v27 = vld [vmem:[#allocation4 + $0x270] sm:$0xff]  ;;  %v821_v37 = vld [vmem:[#allocation6 + $0x18] sm:$0xff] }
  0x73   : > { %1410 = vmatprep.subr.bf16.mxu0 %v1409_v44  ;;  %v650_v44 = vld [vmem:[#allocation4 + $0x2a0] sm:$0xff]  ;;  %v1449_v45 = vpack.c.bf16 %v635_v43, %v634_v42  ;;  %v660_v29 = vld [vmem:[#allocation4 + $0x2f0] sm:$0xff]  ;;  %v1469_v30 = vpack.c.bf16 %v645_v28, %v644_v27  ;;  %v819_v36 = vld [vmem:[#allocation6 + $0x8] sm:$0xff] }
  0x74   : > { %v1480_v51 = vpack.c.bf16 %v651_v46, %v650_v44  ;;  %v628_v32 = vld [vmem:[#allocation4 + $0x1f0] sm:$0xff]  ;;  %v1497_v38 = vpack.c.bf16 %v821_v37, %v819_v36  ;;  %v847_v28 = vld [vmem:[#allocation6 + $0xe8] sm:$0xff] }
  0x75   : > { %1450 = vmatprep.subr.bf16.mxu1 %v1449_v45  ;;  %v1471_v35 = vpack.c.bf16 %v629_v33, %v628_v32  ;;  %v844_v27 = vld [vmem:[#allocation6 + $0xd0] sm:$0xff]  ;;  %v846_v32 = vld [vmem:[#allocation6 + $0xe0] sm:$0xff] }
  0x76   : > { %1412 = vmatpush3.bf16.msra.mxu0 %v1411_v47  ;;  %v618_v47 = vld [vmem:[#allocation4 + $0x1a0] sm:$0xff]  ;;  %v848_v33 = vld [vmem:[#allocation6 + $0xf0] sm:$0xff] }
  0x77   : > { %1414 = vmatprep.subr.bf16.mxu0 %v1413_v50  ;;  %v637_v50 = vld [vmem:[#allocation4 + $0x238] sm:$0xff]  ;;  %v1451_v52 = vpack.c.bf16 %v619_v48, %v618_v47  ;;  %v818_v48 = vld [vmem:[#allocation6] sm:$0xff]  ;;  %v1527_v36 = vpack.c.bf16 %v848_v33, %v846_v32 }
  0x78   : > { %v1453_v54 = vpack.c.bf16 %v637_v50, %v636_v49  ;;  %v820_v49 = vld [vmem:[#allocation6 + $0x10] sm:$0xff]  ;;  %v823_v50 = vld [vmem:[#allocation6 + $0x28] sm:$0xff] }
  0x79   : > { %1452 = vmatpush3.bf16.msra.mxu1 %v1451_v52 }
  0x7a   : > { %1416 = vmatpush3.bf16.msra.mxu0 %v1415_v53  ;;  %v652_v53 = vld [vmem:[#allocation4 + $0x2b0] sm:$0xff]  ;;  %1454 = vmatprep.subr.bf16.mxu1 %v1453_v54 }
  0x7b   : > { %1417 = vmatprep.subr.bf16.mxu0 %v1750_v0 }
 0x130   : > { %v398_v57 = vpop.f32.mrb[0].mxu0 }
 0x131   : > { %v1928_v60 = vadd.f32 %v1176_v55, %v398_v57  ;;  %v1311_v61 = vpop.f32.mrb[1].mxu0  ;;  %v653_v55 = vld [vmem:[#allocation4 + $0x2b8] sm:$0xff]  ;;  %v620_v57 = vld [vmem:[#allocation4 + $0x1b0] sm:$0xff] }
 0x132   : > { %v639_v61 = vld [vmem:[#allocation4 + $0x248] sm:$0xff] }
 0x133   : > { %v402_v62 = vrot.slane %v1928_v60, 7  ;;  %v407_v23 = vrot.slane %v1928_v60, 1  ;;  %v1457_v3 = vpack.c.bf16 %v639_v61, %v638_v59  ;;  %v824_v59 = vld [vmem:[#allocation6 + $0x30] sm:$0xff]  ;;  %v829_v61 = vld [vmem:[#allocation6 + $0x58] sm:$0xff] }
 0x135   : > { %1180 = vmatprep.mubr.msk.f32.mxu0 %vm1196_vm2, %v402_v62  ;;  %v1483_v62 = vpack.c.bf16 %v653_v55, %v652_v53  ;;  %v1499_v55 = vpack.c.bf16 %v820_v49, %v818_v48  ;;  %v858_v49 = vld [vmem:[#allocation6 + $0x140] sm:$0xff] }
 0x136   : > { %530 = vmatmul.mubr.f32.vlgmr.msra.gmra.mrb[2].mxu0 %v1928_v60 }
 0x137   : > { %1419 = vmatpush3.bf16.msra.mxu0 %v1418_v63  ;;  %1344 = vmatprep.mubr.msk.f32.mxu0 %vm1751_vm0, %v1752_v1  ;;  %v1455_v63 = vpack.c.bf16 %v621_v58, %v620_v57  ;;  %v822_v58 = vld [vmem:[#allocation6 + $0x20] sm:$0xff] }
 0x138   : > { %1420 = vmatprep.subr.bf16.mxu0 %v1750_v0 }
 0x139   : > { %1456 = vmatpush3.bf16.msra.mxu1 %v1455_v63 }
 0x13a   : > { %1458 = vmatprep.subr.bf16.mxu1 %v1457_v3  ;;  %v828_v3 = vld [vmem:[#allocation6 + $0x50] sm:$0xff] }
 0x13b   : > { %1422 = vmatpush3.bf16.msra.mxu0 %v1421_v4  ;;  %v655_v4 = vld [vmem:[#allocation4 + $0x2c8] sm:$0xff] }
 0x13c   : > { %1423 = vmatprep.subr.bf16.mxu0 %v1750_v0  ;;  %v1486_v9 = vpack.c.bf16 %v655_v4, %v654_v2  ;;  %v826_v2 = vld [vmem:[#allocation6 + $0x40] sm:$0xff]  ;;  %v831_v4 = vld [vmem:[#allocation6 + $0x68] sm:$0xff] }
 0x13f   : > { %1425 = vmatpush3.bf16.msra.mxu0 %v1424_v7  ;;  %v640_v7 = vld [vmem:[#allocation4 + $0x250] sm:$0xff] }
 0x140   : > { %1426 = vmatprep.subr.bf16.mxu0 %v1750_v0  ;;  %v1461_v11 = vpack.c.bf16 %v641_v8, %v640_v7  ;;  %v830_v8 = vld [vmem:[#allocation6 + $0x60] sm:$0xff] }
 0x143   : > { %1428 = vmatpush3.bf16.msra.mxu0 %v1427_v10  ;;  %v1459_v10 = vpack.c.bf16 %v623_v6, %v622_v5  ;;  %v833_v5 = vld [vmem:[#allocation6 + $0x78] sm:$0xff]  ;;  %v1507_v6 = vpack.c.bf16 %v828_v3, %v826_v2  ;;  %v868_v2 = vld [vmem:[#allocation6 + $0x190] sm:$0xff] }
 0x144   : > { %1429 = vmatprep.subr.bf16.mxu0 %v1750_v0  ;;  %v1509_v7 = vpack.c.bf16 %v833_v5, %v831_v4  ;;  %v871_v4 = vld [vmem:[#allocation6 + $0x1a8] sm:$0xff]  ;;  %v873_v5 = vld [vmem:[#allocation6 + $0x1b8] sm:$0xff] }
 0x145   : > { %1460 = vmatpush3.bf16.msra.mxu1 %v1459_v10  ;;  %v835_v10 = vld [vmem:[#allocation6 + $0x88] sm:$0xff] }
 0x146   : > { %1462 = vmatprep.subr.bf16.mxu1 %v1461_v11  ;;  %v837_v11 = vld [vmem:[#allocation6 + $0x98] sm:$0xff] }
 0x147   : > { %1431 = vmatpush3.bf16.msra.mxu0 %v1430_v13  ;;  %v657_v13 = vld [vmem:[#allocation4 + $0x2d8] sm:$0xff] }
 0x148   : > { %1432 = vmatprep.subr.bf16.mxu0 %v1750_v0  ;;  %v1489_v14 = vpack.c.bf16 %v657_v13, %v656_v12  ;;  %v1513_v13 = vpack.c.bf16 %v837_v11, %v835_v10  ;;  %v875_v10 = vld [vmem:[#allocation6 + $0x1c8] sm:$0xff]  ;;  %v877_v11 = vld [vmem:[#allocation6 + $0x1d8] sm:$0xff] }
 0x14b   : > { %1434 = vmatpush3.bf16.msra.mxu0 %v1433_v16  ;;  %v625_v16 = vld [vmem:[#allocation4 + $0x1d8] sm:$0xff] }
 0x14c   : > { %1435 = vmatprep.subr.bf16.mxu0 %v1750_v0  ;;  %v1463_v17 = vpack.c.bf16 %v625_v16, %v624_v15  ;;  %v836_v15 = vld [vmem:[#allocation6 + $0x90] sm:$0xff]  ;;  %v839_v16 = vld [vmem:[#allocation6 + $0xa8] sm:$0xff] }
 0x14e   : > { %1464 = vmatpush3.bf16.msra.mxu1 %v1463_v17  ;;  %v841_v17 = vld [vmem:[#allocation6 + $0xb8] sm:$0xff] }
 0x14f   : > { %1437 = vmatpush3.bf16.msra.mxu0 %v1436_v19  ;;  %v643_v19 = vld [vmem:[#allocation4 + $0x268] sm:$0xff] }
 0x150   : > { %1438 = vmatprep.subr.bf16.mxu0 %v1750_v0  ;;  %v1465_v21 = vpack.c.bf16 %v643_v19, %v642_v18  ;;  %v1517_v19 = vpack.c.bf16 %v841_v17, %v839_v16  ;;  %v879_v16 = vld [vmem:[#allocation6 + $0x1e8] sm:$0xff]  ;;  %v881_v17 = vld [vmem:[#allocation6 + $0x1f8] sm:$0xff] }
 0x152   : > { %1466 = vmatprep.subr.bf16.mxu1 %v1465_v21  ;;  %v840_v21 = vld [vmem:[#allocation6 + $0xb0] sm:$0xff] }
 0x153   : > { %1440 = vmatpush3.bf16.msra.mxu0 %v1439_v22  ;;  %v659_v22 = vld [vmem:[#allocation4 + $0x2e8] sm:$0xff] }
 0x154   : > { %1473 = vmatprep.subr.bf16.mxu0 %v1750_v0  ;;  %v1492_v25 = vpack.c.bf16 %v659_v22, %v658_v20  ;;  %v838_v20 = vld [vmem:[#allocation6 + $0xa0] sm:$0xff]  ;;  %v843_v22 = vld [vmem:[#allocation6 + $0xc8] sm:$0xff] }
 0x156   : > { %1345 = vmatmul.mubr.msk.f32.vlgmr.msra.gmra.mrb[4].mxu0 %vm1197_vm3, %v407_v23  ;;  %v626_v23 = vld [vmem:[#allocation4 + $0x1e0] sm:$0xff] }
 0x157   : > { %1379 = vmatprep.mubr.msk.f32.mxu0 %vm1751_vm0, %v1752_v1  ;;  %1475 = vmatpush3.bf16.msra.mxu0 %v1474_v31  ;;  %v1467_v26 = vpack.c.bf16 %v627_v24, %v626_v23  ;;  %v661_v31 = vld [vmem:[#allocation4 + $0x2f8] sm:$0xff]  ;;  %v1519_v24 = vpack.c.bf16 %v840_v21, %v838_v20  ;;  %v880_v20 = vld [vmem:[#allocation6 + $0x1f0] sm:$0xff] }
 0x158   : > { %1476 = vmatprep.subr.bf16.mxu0 %v1750_v0  ;;  %v1495_v34 = vpack.c.bf16 %v661_v31, %v660_v29  ;;  %v845_v23 = vld [vmem:[#allocation6 + $0xd8] sm:$0xff] }
 0x159   : > { %1468 = vmatpush3.bf16.msra.mxu1 %v1467_v26  ;;  %v842_v26 = vld [vmem:[#allocation6 + $0xc0] sm:$0xff]  ;;  %v849_v29 = vld [vmem:[#allocation6 + $0xf8] sm:$0xff] }
 0x15a   : > { %1470 = vmatprep.subr.bf16.mxu1 %v1469_v30  ;;  %v1523_v30 = vpack.c.bf16 %v844_v27, %v842_v26  ;;  %v1525_v31 = vpack.c.bf16 %v849_v29, %v847_v28  ;;  %v1184_v28 = vld [vmem:[%s2001_s4 + $0x1] ss:$0 sm:$0xff] }
 0x15b   : > { %1478 = vmatpush3.bf16.msra.mxu0 %v1477_v40 }
 0x15c   : > { %1479 = vmatprep.subr.bf16.mxu0 %v1750_v0 }
 0x15d   : > { %1472 = vmatpush3.bf16.msra.mxu1 %v1471_v35  ;;  %v853_v35 = vld [vmem:[#allocation6 + $0x118] sm:$0xff] }
 0x15e   : > { %1498 = vmatprep.subr.bf16.mxu1 %v1497_v38  ;;  %v850_v38 = vld [vmem:[#allocation6 + $0x100] sm:$0xff] }
 0x15f   : > { %1481 = vmatpush3.bf16.msra.mxu0 %v1480_v51  ;;  %v825_v51 = vld [vmem:[#allocation6 + $0x38] sm:$0xff] }
 0x160   : > { %1482 = vmatprep.subr.bf16.mxu0 %v1750_v0  ;;  %v1501_v57 = vpack.c.bf16 %v825_v51, %v823_v50  ;;  %v860_v50 = vld [vmem:[#allocation6 + $0x150] sm:$0xff]  ;;  %v863_v51 = vld [vmem:[#allocation6 + $0x168] sm:$0xff] }
 0x163   : > { %1484 = vmatpush3.bf16.msra.mxu0 %v1483_v62  ;;  %v1503_v62 = vpack.c.bf16 %v824_v59, %v822_v58  ;;  %v864_v58 = vld [vmem:[#allocation6 + $0x170] sm:$0xff] }
 0x164   : > { %1485 = vmatprep.subr.bf16.mxu0 %v1750_v0 }
 0x167   : > { %1487 = vmatpush3.bf16.msra.mxu0 %v1486_v9  ;;  %v832_v9 = vld [vmem:[#allocation6 + $0x70] sm:$0xff] }
 0x168   : > { %1488 = vmatprep.subr.bf16.mxu0 %v1750_v0  ;;  %v1511_v12 = vpack.c.bf16 %v832_v9, %v830_v8  ;;  %v872_v8 = vld [vmem:[#allocation6 + $0x1b0] sm:$0xff] }
 0x16b   : > { %1490 = vmatpush3.bf16.msra.mxu0 %v1489_v14  ;;  %v834_v14 = vld [vmem:[#allocation6 + $0x80] sm:$0xff] }
 0x16c   : > { %1491 = vmatprep.subr.bf16.mxu0 %v1750_v0  ;;  %v1515_v18 = vpack.c.bf16 %v836_v15, %v834_v14  ;;  %v876_v14 = vld [vmem:[#allocation6 + $0x1d0] sm:$0xff] }
 0x16f   : > { %1493 = vmatpush3.bf16.msra.mxu0 %v1492_v25  ;;  %v1521_v25 = vpack.c.bf16 %v845_v23, %v843_v22  ;;  %v883_v22 = vld [vmem:[#allocation6 + $0x208] sm:$0xff]  ;;  %v885_v23 = vld [vmem:[#allocation6 + $0x218] sm:$0xff] }
 0x170   : > { %1494 = vmatprep.subr.bf16.mxu0 %v1750_v0  ;;  %v1178_v0 = vld [vmem:[%s2001_s4] ss:$0 sm:$0xff] }
 0x173   : > { %1496 = vmatpush3.bf16.msra.mxu0 %v1495_v34  ;;  %v851_v34 = vld [vmem:[#allocation6 + $0x108] sm:$0xff] }
 0x174   : > { %v1529_v37 = vpack.c.bf16 %v853_v35, %v851_v34  ;;  %v882_v35 = vld [vmem:[#allocation6 + $0x200] sm:$0xff] }
 0x209   : > { %v1233_v39 = vpop.f32.mrb[2].mxu0 }
 0x20a   : > { %v1234_v40 = vpop.f32.mrb[3].mxu0 }
 0x20b   : > { %v1235_v41 = vadd.f32 %v1234_v40, %v1233_v39  ;;  %v852_v39 = vld [vmem:[#allocation6 + $0x110] sm:$0xff]  ;;  %v855_v40 = vld [vmem:[#allocation6 + $0x128] sm:$0xff] }
 0x20d   : > { %v532_v42 = vadd.f32 %v1235_v41, %v1178_v0  ;;  %v857_v41 = vld [vmem:[#allocation6 + $0x138] sm:$0xff]  ;;  %v1531_v0 = vpack.c.bf16 %v852_v39, %v850_v38 }
 0x20e   : > { %v889_v38 = vld [vmem:[#allocation6 + $0x238] sm:$0xff] }
 0x229   : > { %v601_v43 = vpop.f32.mrb[4].mxu0 }
 0x22a   : > { %v602_v44 = vadd.f32 %v601_v43, %v532_v42  ;;  %v1346_v45 = vpop.f32.mrb[5].mxu0  ;;  %v1533_v42 = vpack.c.bf16 %v857_v41, %v855_v40  ;;  %v854_v43 = vld [vmem:[#allocation6 + $0x120] sm:$0xff] }
 0x22b   : > { %v859_v45 = vld [vmem:[#allocation6 + $0x148] sm:$0xff] }
 0x22c   : > { %v605_v46 = vadd.f32 %v602_v44, %v1928_v60  ;;  %v827_v60 = vld [vmem:[#allocation6 + $0x48] sm:$0xff]  ;;  %v856_v44 = vld [vmem:[#allocation6 + $0x130] sm:$0xff] }
 0x22d   : > { %v1505_v63 = vpack.c.bf16 %v829_v61, %v827_v60  ;;  %v867_v60 = vld [vmem:[#allocation6 + $0x188] sm:$0xff]  ;;  %v869_v61 = vld [vmem:[#allocation6 + $0x198] sm:$0xff] }
 0x22e   : > { %vm606_vm4 = vcmp.ge.f32.partialorder %v605_v46, 0.0  ;;  %v607_v47 = vmul.f32 0.2, %v605_v46 }
 0x230   : > { %v1962_v52 = vsel %vm606_vm4, %v605_v46, %v607_v47  ;;  %v861_v46 = vld [vmem:[#allocation6 + $0x158] sm:$0xff]  ;;  %v1535_v47 = vpack.c.bf16 %v856_v44, %v854_v43  ;;  %v888_v43 = vld [vmem:[#allocation6 + $0x230] sm:$0xff]  ;;  %v891_v44 = vld [vmem:[#allocation6 + $0x248] sm:$0xff] }
 0x231   : > { %v609_v53 = vrot.slane %v1962_v52, 7  ;;  %v611_v54 = vrot.slane %v1962_v52, 1  ;;  %v1537_v48 = vpack.c.bf16 %v861_v46, %v859_v45  ;;  %v893_v45 = vld [vmem:[#allocation6 + $0x258] sm:$0xff] }
 0x232   : > { %v1569_v46 = vpack.c.bf16 %v893_v45, %v891_v44 }
 0x233   : > { %1186 = vmatprep.mubr.msk.f32.mxu1 %vm1196_vm2, %v609_v53  ;;  %1380 = vmatmul.mubr.msk.f32.vlgmr.msra.gmra.mrb[6].mxu0 %vm1197_vm3, %v611_v54  ;;  %v865_v53 = vld [vmem:[#allocation6 + $0x178] sm:$0xff]  ;;  %v1539_v54 = vpack.c.bf16 %v860_v50, %v858_v49  ;;  %v895_v49 = vld [vmem:[#allocation6 + $0x268] sm:$0xff] }
 0x234   : > { %735 = vmatmul.mubr.f32.vlgmr.msra.gmra.mrb[0].mxu1 %v1962_v52  ;;  %v897_v50 = vld [vmem:[#allocation6 + $0x278] sm:$0xff] }
 0x235   : > { %1500 = vmatpush1.bf16.msra.mxu1 %v1499_v55  ;;  %v1541_v55 = vpack.c.bf16 %v865_v53, %v863_v51  ;;  %v1573_v53 = vpack.c.bf16 %v897_v50, %v895_v49 }
 0x236   : > { %1502 = vmatprep.subr.bf16.mxu1 %v1501_v57  ;;  %v862_v57 = vld [vmem:[#allocation6 + $0x160] sm:$0xff] }
 0x237   : > { %v1543_v59 = vpack.c.bf16 %v864_v58, %v862_v57  ;;  %v899_v57 = vld [vmem:[#allocation6 + $0x288] sm:$0xff]  ;;  %v901_v58 = vld [vmem:[#allocation6 + $0x298] sm:$0xff] }
 0x239   : > { %1504 = vmatpush1.bf16.msra.mxu1 %v1503_v62  ;;  %v1545_v62 = vpack.c.bf16 %v869_v61, %v867_v60  ;;  %v1577_v60 = vpack.c.bf16 %v901_v58, %v899_v57  ;;  %v898_v61 = vld [vmem:[#allocation6 + $0x280] sm:$0xff] }
 0x23a   : > { %1506 = vmatprep.subr.bf16.mxu1 %v1505_v63  ;;  %v866_v63 = vld [vmem:[#allocation6 + $0x180] sm:$0xff] }
 0x23b   : > { %v1547_v3 = vpack.c.bf16 %v868_v2, %v866_v63  ;;  %v905_v63 = vld [vmem:[#allocation6 + $0x2b8] sm:$0xff] }
 0x23d   : > { %1508 = vmatpush1.bf16.msra.mxu1 %v1507_v6  ;;  %v1549_v6 = vpack.c.bf16 %v873_v5, %v871_v4  ;;  %v902_v4 = vld [vmem:[#allocation6 + $0x2a0] sm:$0xff]  ;;  %v904_v5 = vld [vmem:[#allocation6 + $0x2b0] sm:$0xff] }
 0x23e   : > { %1510 = vmatprep.subr.bf16.mxu1 %v1509_v7  ;;  %v870_v7 = vld [vmem:[#allocation6 + $0x1a0] sm:$0xff] }
 0x23f   : > { %v1551_v9 = vpack.c.bf16 %v872_v8, %v870_v7  ;;  %v909_v7 = vld [vmem:[#allocation6 + $0x2d8] sm:$0xff]  ;;  %v1583_v8 = vpack.c.bf16 %v904_v5, %v902_v4 }
 0x241   : > { %1512 = vmatpush1.bf16.msra.mxu1 %v1511_v12  ;;  %v1553_v12 = vpack.c.bf16 %v877_v11, %v875_v10  ;;  %v906_v10 = vld [vmem:[#allocation6 + $0x2c0] sm:$0xff]  ;;  %v908_v11 = vld [vmem:[#allocation6 + $0x2d0] sm:$0xff] }
 0x242   : > { %1514 = vmatprep.subr.bf16.mxu1 %v1513_v13  ;;  %v874_v13 = vld [vmem:[#allocation6 + $0x1c0] sm:$0xff] }
 0x243   : > { %v1555_v15 = vpack.c.bf16 %v876_v14, %v874_v13  ;;  %v913_v13 = vld [vmem:[#allocation6 + $0x2f8] sm:$0xff]  ;;  %v1587_v14 = vpack.c.bf16 %v908_v11, %v906_v10 }
 0x245   : > { %1516 = vmatpush1.bf16.msra.mxu1 %v1515_v18  ;;  %v1557_v18 = vpack.c.bf16 %v881_v17, %v879_v16  ;;  %v910_v16 = vld [vmem:[#allocation6 + $0x2e0] sm:$0xff]  ;;  %v912_v17 = vld [vmem:[#allocation6 + $0x2f0] sm:$0xff] }
 0x246   : > { %1518 = vmatprep.subr.bf16.mxu1 %v1517_v19  ;;  %v878_v19 = vld [vmem:[#allocation6 + $0x1e0] sm:$0xff] }
 0x247   : > { %v1559_v21 = vpack.c.bf16 %v880_v20, %v878_v19  ;;  %v918_v20 = vsub.s32 0, %v1926_v56 }
 0x249   : > { %1520 = vmatpush1.bf16.msra.mxu1 %v1519_v24  ;;  %v1561_v24 = vpack.c.bf16 %v885_v23, %v883_v22  ;;  %v922_v22 = vsub.s32 1, %v1926_v56 }
 0x24a   : > { %1522 = vmatprep.subr.bf16.mxu1 %v1521_v25 }
 0x24d   : > { %1524 = vmatpush1.bf16.msra.mxu1 %v1523_v30 }
 0x24e   : > { %1526 = vmatprep.subr.bf16.mxu1 %v1525_v31 }
 0x251   : > { %1528 = vmatpush1.bf16.msra.mxu1 %v1527_v36  ;;  %v884_v36 = vld [vmem:[#allocation6 + $0x210] sm:$0xff] }
 0x252   : > { %1530 = vmatprep.subr.bf16.mxu1 %v1529_v37  ;;  %v887_v37 = vld [vmem:[#allocation6 + $0x228] sm:$0xff]  ;;  %v1563_v41 = vpack.c.bf16 %v884_v36, %v882_v35 }
 0x255   : > { %1532 = vmatpush1.bf16.msra.mxu1 %v1531_v0  ;;  %v1565_v0 = vpack.c.bf16 %v889_v38, %v887_v37 }
 0x256   : > { %1534 = vmatprep.subr.bf16.mxu1 %v1533_v42  ;;  %v886_v42 = vld [vmem:[#allocation6 + $0x220] sm:$0xff] }
 0x259   : > { %1536 = vmatpush1.bf16.msra.mxu1 %v1535_v47  ;;  %v890_v47 = vld [vmem:[#allocation6 + $0x240] sm:$0xff] }
 0x25a   : > { %1538 = vmatprep.subr.bf16.mxu1 %v1537_v48  ;;  %v892_v48 = vld [vmem:[#allocation6 + $0x250] sm:$0xff] }
 0x25b   : > { %v1571_v51 = vpack.c.bf16 %v892_v48, %v890_v47 }
 0x25d   : > { %1540 = vmatpush1.bf16.msra.mxu1 %v1539_v54  ;;  %v894_v54 = vld [vmem:[#allocation6 + $0x260] sm:$0xff] }
 0x25e   : > { %1542 = vmatprep.subr.bf16.mxu1 %v1541_v55  ;;  %v896_v55 = vld [vmem:[#allocation6 + $0x270] sm:$0xff] }
 0x261   : > { %1544 = vmatpush1.bf16.msra.mxu1 %v1543_v59  ;;  %v1575_v59 = vpack.c.bf16 %v896_v55, %v894_v54 }
 0x262   : > { %1546 = vmatprep.subr.bf16.mxu1 %v1545_v62  ;;  %v903_v62 = vld [vmem:[#allocation6 + $0x2a8] sm:$0xff] }
 0x265   : > { %1548 = vmatpush1.bf16.msra.mxu1 %v1547_v3  ;;  %v1581_v3 = vpack.c.bf16 %v905_v63, %v903_v62 }
 0x266   : > { %1550 = vmatprep.subr.bf16.mxu1 %v1549_v6  ;;  %v907_v6 = vld [vmem:[#allocation6 + $0x2c8] sm:$0xff] }
 0x269   : > { %1552 = vmatpush1.bf16.msra.mxu1 %v1551_v9  ;;  %v1585_v9 = vpack.c.bf16 %v909_v7, %v907_v6 }
 0x26a   : > { %1554 = vmatprep.subr.bf16.mxu1 %v1553_v12  ;;  %v911_v12 = vld [vmem:[#allocation6 + $0x2e8] sm:$0xff] }
 0x26d   : > { %1556 = vmatpush1.bf16.msra.mxu1 %v1555_v15  ;;  %v1589_v15 = vpack.c.bf16 %v913_v13, %v911_v12 }
 0x26e   : > { %1558 = vmatprep.subr.bf16.mxu1 %v1557_v18  ;;  %v1591_v18 = vpack.c.bf16 %v912_v17, %v910_v16 }
 0x271   : > { %1560 = vmatpush1.bf16.msra.mxu1 %v1559_v21  ;;  %v914_v21 = vld [vmem:[%s2003_s6] sm:$0x3] }
 0x272   : > { %1562 = vmatprep.subr.bf16.mxu1 %v1561_v24  ;;  %v919_v23 = vrot.slane %v914_v21, %v918_v20  ;;  %v923_v24 = vrot.slane %v914_v21, %v922_v22 }
 0x306   : > { %v806_v25 = vpop.f32.mrb[6].mxu0 }
 0x307   : > { %v1285_v26 = vpop.f32.mrb[0].mxu1  ;;  %v1381_v27 = vpop.f32.mrb[7].mxu0 }
 0x308   : > { %v1286_v29 = vpop.f32.mrb[1].mxu1 }
 0x309   : > { %v1287_v30 = vadd.f32 %v1286_v29, %v1285_v26 }
 0x30b   : > { %v737_v31 = vadd.f32 %v1287_v30, %v1184_v28 }
 0x30d   : > { %v807_v32 = vadd.f32 %v806_v25, %v737_v31 }
 0x30f   : > { %v810_v33 = vadd.f32 %v807_v32, %v1962_v52  ;;  %v1567_v52 = vpack.c.bf16 %v888_v43, %v886_v42 }
 0x311   : > { %vm811_vm5 = vcmp.ge.f32.partialorder %v810_v33, 0.0  ;;  %v812_v34 = vmul.f32 0.2, %v810_v33 }
 0x313   : > { %v1975_v39 = vsel %vm811_vm5, %v810_v33, %v812_v34 }
 0x314   : > { %v814_v40 = vrot.slane %v1975_v39, 7  ;;  %v816_v19 = vrot.slane %v1975_v39, 1 }
 0x316   : > { %1190 = vmatprep.mubr.msk.f32.mxu1 %vm1196_vm2, %v814_v40 }
 0x317   : > { %991 = vmatmul.mubr.f32.vlgmr.msra.gmra.mrb[2].mxu1 %v1975_v39 }
 0x318   : > { %1564 = vmatpush1.bf16.msra.mxu1 %v1563_v41  ;;  %1061 = vmatprep.mubr.f32.mxu1 %v1752_v1  ;;  %v900_v1 = vld [vmem:[#allocation6 + $0x290] sm:$0xff] }
 0x319   : > { %1566 = vmatprep.subr.bf16.mxu1 %v1565_v0  ;;  %v1579_v2 = vpack.c.bf16 %v900_v1, %v898_v61 }
 0x31c   : > { %1568 = vmatpush1.bf16.msra.mxu1 %v1567_v52 }
 0x31d   : > { %1570 = vmatprep.subr.bf16.mxu1 %v1569_v46 }
 0x320   : > { %1572 = vmatpush1.bf16.msra.mxu1 %v1571_v51 }
 0x321   : > { %1574 = vmatprep.subr.bf16.mxu1 %v1573_v53 }
 0x324   : > { %1576 = vmatpush1.bf16.msra.mxu1 %v1575_v59 }
 0x325   : > { %1578 = vmatprep.subr.bf16.mxu1 %v1577_v60 }
 0x328   : > { %1580 = vmatpush1.bf16.msra.mxu1 %v1579_v2 }
 0x329   : > { %1582 = vmatprep.subr.bf16.mxu1 %v1581_v3 }
 0x32c   : > { %1584 = vmatpush1.bf16.msra.mxu1 %v1583_v8 }
 0x32d   : > { %1586 = vmatprep.subr.bf16.mxu1 %v1585_v9 }
 0x330   : > { %1588 = vmatpush1.bf16.msra.mxu1 %v1587_v14 }
 0x331   : > { %1590 = vmatprep.subr.bf16.mxu1 %v1589_v15 }
 0x334   : > { %1592 = vmatpush1.bf16.msra.mxu1 %v1591_v18 }
 0x337   : > { %1192 = vmatmul.mubr.msk.f32.vlgmr.msra.gmra.mrb[2].mxu1 %vm1197_vm3, %v816_v19 }
 0x40a   : > { %v1063_v25 = vpop.f32.mrb[2].mxu1 }
 0x40b   : > { %v1593_v26 = vadd.f32 %v1063_v25, %v919_v23  ;;  %v1065_v27 = vpop.f32.mrb[3].mxu1 }
 0x40c   : > { %v1594_v28 = vadd.f32 %v1065_v27, %v923_v24 }
 0x40d   : > { %vm1068_vm6 = vcmp.ge.f32.partialorder %v1593_v26, 0.0  ;;  %v1070_v29 = vmul.f32 0.2, %v1593_v26 }
 0x40e   : > { %vm1069_vm7 = vcmp.ge.f32.partialorder %v1594_v28, 0.0  ;;  %v1071_v30 = vmul.f32 0.2, %v1594_v28 }
 0x40f   : > { %v1072_v31 = vsel %vm1068_vm6, %v1593_v26, %v1070_v29 }
 0x410   : > { %1074 = vst [vmem:[%s317_s9] sm:$0xff] %v1072_v31  ;;  %v1073_v32 = vsel %vm1069_vm7, %v1594_v28, %v1071_v30 }
 0x411   : > { %1075 = vst [vmem:[%s317_s9 + $0x8] sm:$0xff] %v1073_v32 }
 0x412 PF: > { %s19_s24 = sadd.s32 1, %s1741_s24  }
 0x413   : > { %p16_p2 = scmp.ge.s32.totalorder %s19_s24, 4  }
 0x415   :  { %18 = sbr.rel (!%p16_p2) target bundleno = 2 (0x2), region = 93 }
 0x41c   :  { %1097 = vsyncpa [#allocation3], 1 }
 0x41d   :  { %1099 = vsyncpa [#allocation3 + $0x1], 1 }
 0x41e   :  { %1100 = vsyncpa [#allocation5], 1 }

// kernel: decoder_forward.5
= control target key start
LH: loop header
LB: loop body
LE: loop exit
PB: predicated region body
PF: predicated region fallthrough
CT: control target
= control target key end

     0   :  { %s1573_s18 = smov 0   ;;  %s2254_s0 = inlined_call_operand.vmem [shape: f32[2,16,128], index: 0, kind: input, shape index: {}]   ;;  %s2255_s1 = inlined_call_operand.vmem [shape: f32[2,384,128], index: 1, kind: input, shape index: {}]   ;;  %s2256_s2 = inlined_call_operand.vmem [shape: f32[2,1,128], index: 2, kind: input, shape index: {}]   ;;  %s2257_s3 = inlined_call_operand.vmem [shape: f32[384,256], index: 3, kind: input, shape index: {}]   ;;  %s2258_s4 = inlined_call_operand.vmem [shape: f32[1,256], index: 4, kind: input, shape index: {}]   ;;  %s2259_s5 = inlined_call_operand.vmem [shape: f32[2,16,256], index: 5, kind: output, shape index: {}]  }
   0x1 LB: > { %s1033_s19 = sadd.s32 4294967295, %s1540_s18   ;;  %p1037_p0 = scmp.ge.s32.totalorder %s1540_s18, 1  ;;  %s1540_s18 = sphi %s1573_s18, %s15_s18  }
   0x2   : > { %p187_p1 = scmp.lt.s32.totalorder %s1540_s18, 3 }
   0x4   : > { %p188_p2 = pnand %p1037_p0, %p187_p1 }
   0x5   : > { %v264_v0 = vld [vmem:[%s2255_s1 + $0x80] sm:$0xff] (!%p188_p2)  ;;  %v265_v1 = vld [vmem:[%s2255_s1 + $0x88] sm:$0xff] (!%p188_p2)  ;;  %p215_p3 = scmp.lt.s32.totalorder (!%p188_p2), %s1033_s19, 1  ;;  %v266_v5 = vld [vmem:[%s2255_s1 + $0x90] sm:$0xff] (!%p188_p2)  ;;  %v229_v13 = vlaneseq (!%p188_p2) }
   0x6   : > { %191 = sbr.rel (%p188_p2) target bundleno = 807 (0x327), region = 40  ;;  %v248_v2 = vld [vmem:[%s2255_s1] sm:$0xff] (!%p188_p2)  ;;  %v1293_v3 = vpack.c.bf16 (!%p188_p2), %v265_v1, %v264_v0  ;;  %v249_v4 = vld [vmem:[%s2255_s1 + $0x8] sm:$0xff] (!%p188_p2)  ;;  %v267_v6 = vld [vmem:[%s2255_s1 + $0x98] sm:$0xff] (!%p188_p2) }
   0x7   : > { %v1295_v7 = vpack.c.bf16 (!%p188_p2), %v249_v4, %v248_v2  ;;  %v1297_v8 = vpack.c.bf16 (!%p188_p2), %v267_v6, %v266_v5  ;;  %v250_v9 = vld [vmem:[%s2255_s1 + $0x10] sm:$0xff] (!%p188_p2)  ;;  %v251_v10 = vld [vmem:[%s2255_s1 + $0x18] sm:$0xff] (!%p188_p2)  ;;  %v268_v11 = vld [vmem:[%s2255_s1 + $0xa0] sm:$0xff] (!%p188_p2)  ;;  %v1629_v20 = vshrl.u32 (!%p188_p2), %v229_v13, 7 }
   0x8   : > { %1294 = vmatprep.subr.bf16.mxu1 (!%p188_p2), %v1293_v3  ;;  %v269_v12 = vld [vmem:[%s2255_s1 + $0xa8] sm:$0xff] (!%p188_p2)  ;;  %v1299_v14 = vpack.c.bf16 (!%p188_p2), %v251_v10, %v250_v9  ;;  %v252_v16 = vld [vmem:[%s2255_s1 + $0x20] sm:$0xff] (!%p188_p2)  ;;  %v270_v18 = vld [vmem:[%s2255_s1 + $0xb0] sm:$0xff] (!%p188_p2) }
   0x9   : > { %1296 = vmatpush3.bf16.msra.mxu1 (!%p188_p2), %v1295_v7  ;;  %v1301_v15 = vpack.c.bf16 (!%p188_p2), %v269_v12, %v268_v11  ;;  %v253_v17 = vld [vmem:[%s2255_s1 + $0x28] sm:$0xff] (!%p188_p2)  ;;  %v271_v19 = vld [vmem:[%s2255_s1 + $0xb8] sm:$0xff] (!%p188_p2)  ;;  %v254_v23 = vld [vmem:[%s2255_s1 + $0x30] sm:$0xff] (!%p188_p2)  ;;  %vm231_vm0 = vcmp.lt.s32.totalorder (!%p188_p2), %v1629_v20, 1  ;;  %vm1109_vm1 = vcmp.ne.s32.totalorder (!%p188_p2), %v1629_v20, 0  ;;  %vm241_vm2 = vcmp.lt.s32.totalorder (!%p188_p2), %v1629_v20, 7 }
   0xa   : > { %1298 = vmatprep.subr.bf16.mxu1 (!%p188_p2), %v1297_v8  ;;  %v1303_v21 = vpack.c.bf16 (!%p188_p2), %v253_v17, %v252_v16  ;;  %v1305_v22 = vpack.c.bf16 (!%p188_p2), %v271_v19, %v270_v18  ;;  %v255_v24 = vld [vmem:[%s2255_s1 + $0x38] sm:$0xff] (!%p188_p2)  ;;  %v272_v25 = vld [vmem:[%s2255_s1 + $0xc0] sm:$0xff] (!%p188_p2)  ;;  %v273_v26 = vld [vmem:[%s2255_s1 + $0xc8] sm:$0xff] (!%p188_p2)  ;;  %v1755_v19 = vadd.s32 (!%p188_p2), 8, %v1629_v20 }
   0xb   : > { %v1307_v30 = vpack.c.bf16 (!%p188_p2), %v255_v24, %v254_v23  ;;  %v1309_v32 = vpack.c.bf16 (!%p188_p2), %v273_v26, %v272_v25  ;;  %v256_v33 = vld [vmem:[%s2255_s1 + $0x40] sm:$0xff] (!%p188_p2)  ;;  %v257_v34 = vld [vmem:[%s2255_s1 + $0x48] sm:$0xff] (!%p188_p2)  ;;  %v274_v35 = vld [vmem:[%s2255_s1 + $0xd0] sm:$0xff] (!%p188_p2) }
   0xc   : > { %v275_v36 = vld [vmem:[%s2255_s1 + $0xd8] sm:$0xff] (!%p188_p2)  ;;  %v1311_v38 = vpack.c.bf16 (!%p188_p2), %v257_v34, %v256_v33  ;;  %v258_v40 = vld [vmem:[%s2255_s1 + $0x50] sm:$0xff] (!%p188_p2)  ;;  %v276_v42 = vld [vmem:[%s2255_s1 + $0xe0] sm:$0xff] (!%p188_p2)  ;;  %vm1110_vm3 = vcmp.ne.s32.totalorder (!%p188_p2), %v1755_v19, 15 }
   0xd   : > { %s2261_s19 = smov (!%p215_p3, %s1033_s19), 1  ;;  %1300 = vmatpush3.bf16.msra.mxu1 %v1299_v14  ;;  %v1313_v39 = vpack.c.bf16 %v275_v36, %v274_v35  ;;  %v259_v41 = vld [vmem:[%s2255_s1 + $0x58] sm:$0xff]  ;;  %v277_v43 = vld [vmem:[%s2255_s1 + $0xe8] sm:$0xff]  ;;  %v260_v46 = vld [vmem:[%s2255_s1 + $0x60] sm:$0xff] }
   0xe   : > { %s1107_s15 = sshll.u32 %s2261_s19, 4  ;;  %1302 = vmatprep.subr.bf16.mxu1 %v1301_v15  ;;  %v1315_v44 = vpack.c.bf16 %v259_v41, %v258_v40  ;;  %v1317_v45 = vpack.c.bf16 %v277_v43, %v276_v42  ;;  %v261_v47 = vld [vmem:[%s2255_s1 + $0x68] sm:$0xff]  ;;  %v278_v48 = vld [vmem:[%s2255_s1 + $0xf0] sm:$0xff]  ;;  %v279_v49 = vld [vmem:[%s2255_s1 + $0xf8] sm:$0xff]  ;;  %s1108_s23 = sshll.u32 %s2261_s19, 5 }
   0xf   : > { %s219_s28 = scalar_lea.vmem %s2254_s0, %s1107_s15  ;;  %v1319_v50 = vpack.c.bf16 %v261_v47, %v260_v46  ;;  %v1321_v51 = vpack.c.bf16 %v279_v49, %v278_v48  ;;  %v262_v52 = vld [vmem:[%s2255_s1 + $0x70] sm:$0xff]  ;;  %v263_v53 = vld [vmem:[%s2255_s1 + $0x78] sm:$0xff]  ;;  %v280_v54 = vld [vmem:[%s2255_s1 + $0x100] sm:$0xff]  ;;  %s224_s26 = scalar_lea.vmem %s2259_s5, %s1108_s23 }
  0x10   : > { %v1643_v27 = vld [vmem:[%s219_s28] sm:$0xff]  ;;  %v1645_v28 = vld [vmem:[%s219_s28 + $0x8] sm:$0xff]  ;;  %v1323_v56 = vpack.c.bf16 %v263_v53, %v262_v52  ;;  %v282_v58 = vld [vmem:[%s2255_s1 + $0x110] sm:$0xff] }
  0x11   : > { %v227_v29 = vrot.slane %v1643_v27, 7  ;;  %1304 = vmatpush3.bf16.msra.mxu1 %v1303_v21  ;;  %v228_v31 = vrot.slane %v1645_v28, 7  ;;  %v281_v55 = vld [vmem:[%s2255_s1 + $0x108] sm:$0xff]  ;;  %v283_v59 = vld [vmem:[%s2255_s1 + $0x118] sm:$0xff]  ;;  %v239_v62 = vrot.slane %v1643_v27, 1  ;;  %v240_v63 = vrot.slane %v1645_v28, 1 }
  0x12   : > { %1306 = vmatprep.subr.bf16.mxu1 %v1305_v22  ;;  %v1325_v57 = vpack.c.bf16 %v281_v55, %v280_v54  ;;  %v1329_v60 = vpack.c.bf16 %v283_v59, %v282_v58  ;;  %v284_v0 = vld [vmem:[%s2255_s1 + $0x120] sm:$0xff]  ;;  %v285_v1 = vld [vmem:[%s2255_s1 + $0x128] sm:$0xff]  ;;  %v286_v4 = vld [vmem:[%s2255_s1 + $0x130] sm:$0xff] }
  0x13   : > { %v233_v37 = vsel %vm231_vm0, %v228_v31, %v227_v29  ;;  %v232_v61 = vsel %vm231_vm0, %v227_v29, %v228_v31  ;;  %v1333_v2 = vpack.c.bf16 %v285_v1, %v284_v0  ;;  %v242_v3 = vsel %vm241_vm2, %v239_v62, %v240_v63  ;;  %v287_v5 = vld [vmem:[%s2255_s1 + $0x138] sm:$0xff]  ;;  %v288_v7 = vld [vmem:[%s2255_s1 + $0x140] sm:$0xff]  ;;  %v289_v8 = vld [vmem:[%s2255_s1 + $0x148] sm:$0xff] }
  0x14   : > { %1044 = vmatprep.mubr.msk.f32.mxu1 %vm1109_vm1, %v233_v37  ;;  %v1337_v6 = vpack.c.bf16 %v287_v5, %v286_v4  ;;  %v1341_v9 = vpack.c.bf16 %v289_v8, %v288_v7  ;;  %v290_v10 = vld [vmem:[%s2255_s1 + $0x150] sm:$0xff]  ;;  %v291_v11 = vld [vmem:[%s2255_s1 + $0x158] sm:$0xff]  ;;  %v292_v13 = vld [vmem:[%s2255_s1 + $0x160] sm:$0xff]  ;;  %v243_v21 = vsel %vm241_vm2, %v240_v63, %v239_v62 }
  0x15   : > { %1308 = vmatpush3.bf16.msra.mxu1 %v1307_v30  ;;  %v1345_v12 = vpack.c.bf16 %v291_v11, %v290_v10  ;;  %v293_v14 = vld [vmem:[%s2255_s1 + $0x168] sm:$0xff]  ;;  %v294_v16 = vld [vmem:[%s2255_s1 + $0x170] sm:$0xff]  ;;  %v295_v17 = vld [vmem:[%s2255_s1 + $0x178] sm:$0xff] }
  0x16   : > { %1310 = vmatprep.subr.bf16.mxu1 %v1309_v32  ;;  %v1349_v15 = vpack.c.bf16 %v293_v14, %v292_v13  ;;  %v1353_v18 = vpack.c.bf16 %v295_v17, %v294_v16  ;;  %v1063_v22 = vld [vmem:[%s2255_s1 + $0x200] sm:$0xff]  ;;  %v1064_v23 = vld [vmem:[%s2255_s1 + $0x208] sm:$0xff]  ;;  %v1065_v29 = vld [vmem:[%s2255_s1 + $0x210] sm:$0xff] }
  0x17   : > { %v1047_v24 = vld [vmem:[%s2255_s1 + $0x180] sm:$0xff]  ;;  %v1357_v25 = vpack.c.bf16 %v1064_v23, %v1063_v22  ;;  %v1048_v26 = vld [vmem:[%s2255_s1 + $0x188] sm:$0xff]  ;;  %v1066_v30 = vld [vmem:[%s2255_s1 + $0x218] sm:$0xff] }
  0x18   : > { %v1359_v31 = vpack.c.bf16 %v1048_v26, %v1047_v24  ;;  %v1361_v32 = vpack.c.bf16 %v1066_v30, %v1065_v29  ;;  %v1049_v33 = vld [vmem:[%s2255_s1 + $0x190] sm:$0xff]  ;;  %v1050_v34 = vld [vmem:[%s2255_s1 + $0x198] sm:$0xff]  ;;  %v1067_v35 = vld [vmem:[%s2255_s1 + $0x220] sm:$0xff] }
  0x19   : > { %1312 = vmatpush3.bf16.msra.mxu1 %v1311_v38  ;;  %v1068_v36 = vld [vmem:[%s2255_s1 + $0x228] sm:$0xff]  ;;  %v1363_v37 = vpack.c.bf16 %v1050_v34, %v1049_v33  ;;  %v1069_v41 = vld [vmem:[%s2255_s1 + $0x230] sm:$0xff]  ;;  %v1070_v42 = vld [vmem:[%s2255_s1 + $0x238] sm:$0xff] }
  0x1a   : > { %1314 = vmatprep.subr.bf16.mxu1 %v1313_v39  ;;  %v1365_v38 = vpack.c.bf16 %v1068_v36, %v1067_v35  ;;  %v1051_v39 = vld [vmem:[%s2255_s1 + $0x1a0] sm:$0xff]  ;;  %v1052_v40 = vld [vmem:[%s2255_s1 + $0x1a8] sm:$0xff]  ;;  %v1054_v46 = vld [vmem:[%s2255_s1 + $0x1b8] sm:$0xff] }
  0x1b   : > { %v1367_v43 = vpack.c.bf16 %v1052_v40, %v1051_v39  ;;  %v1071_v47 = vld [vmem:[%s2255_s1 + $0x240] sm:$0xff]  ;;  %v1072_v48 = vld [vmem:[%s2255_s1 + $0x248] sm:$0xff]  ;;  %v1073_v54 = vld [vmem:[%s2255_s1 + $0x250] sm:$0xff] }
  0x1c   : > { %v1056_v52 = vld [vmem:[%s2255_s1 + $0x1c8] sm:$0xff]  ;;  %v1074_v55 = vld [vmem:[%s2255_s1 + $0x258] sm:$0xff]  ;;  %v1059_v63 = vld [vmem:[%s2255_s1 + $0x1e0] sm:$0xff] }
  0x1d   : > { %1316 = vmatpush3.bf16.msra.mxu1 %v1315_v44  ;;  %v1369_v44 = vpack.c.bf16 %v1070_v42, %v1069_v41  ;;  %v1058_v58 = vld [vmem:[%s2255_s1 + $0x1d8] sm:$0xff]  ;;  %v1060_v0 = vld [vmem:[%s2255_s1 + $0x1e8] sm:$0xff]  ;;  %v1061_v5 = vld [vmem:[%s2255_s1 + $0x1f0] sm:$0xff] }
  0x1e   : > { %1318 = vmatprep.subr.bf16.mxu1 %v1317_v45  ;;  %v1053_v45 = vld [vmem:[%s2255_s1 + $0x1b0] sm:$0xff]  ;;  %v1383_v1 = vpack.c.bf16 %v1060_v0, %v1059_v63  ;;  %v1079_v8 = vld [vmem:[%s2255_s1 + $0x280] sm:$0xff]  ;;  %v701_v11 = vld [vmem:[%s2257_s3 + $0x8] sm:$0xff] }
  0x1f   : > { %v1371_v49 = vpack.c.bf16 %v1054_v46, %v1053_v45  ;;  %v700_v13 = vld [vmem:[%s2257_s3] sm:$0xff]  ;;  %v705_v16 = vld [vmem:[%s2257_s3 + $0x28] sm:$0xff]  ;;  %v707_v17 = vld [vmem:[%s2257_s3 + $0x38] sm:$0xff] }
  0x20   : > { %v704_v22 = vld [vmem:[%s2257_s3 + $0x20] sm:$0xff]  ;;  %v706_v23 = vld [vmem:[%s2257_s3 + $0x30] sm:$0xff]  ;;  %v709_v24 = vld [vmem:[%s2257_s3 + $0x48] sm:$0xff] }
  0x21   : > { %1320 = vmatpush3.bf16.msra.mxu1 %v1319_v50  ;;  %v1373_v50 = vpack.c.bf16 %v1072_v48, %v1071_v47  ;;  %v1427_v26 = vpack.c.bf16 %v706_v23, %v704_v22  ;;  %v708_v30 = vld [vmem:[%s2257_s3 + $0x40] sm:$0xff]  ;;  %v715_v33 = vld [vmem:[%s2257_s3 + $0x78] sm:$0xff]  ;;  %v1089_v22 = vld [vmem:[%s2255_s1 + $0x2d0] sm:$0xff] }
  0x22   : > { %1322 = vmatprep.subr.bf16.mxu1 %v1321_v51  ;;  %v1055_v51 = vld [vmem:[%s2255_s1 + $0x1c0] sm:$0xff]  ;;  %v719_v39 = vld [vmem:[%s2257_s3 + $0x98] sm:$0xff] }
  0x23   : > { %v1375_v53 = vpack.c.bf16 %v1056_v52, %v1055_v51  ;;  %v712_v36 = vld [vmem:[%s2257_s3 + $0x60] sm:$0xff]  ;;  %v723_v45 = vld [vmem:[%s2257_s3 + $0xb8] sm:$0xff] }
  0x24   : > { %v716_v42 = vld [vmem:[%s2257_s3 + $0x80] sm:$0xff]  ;;  %v1090_v23 = vld [vmem:[%s2255_s1 + $0x2d8] sm:$0xff] }
  0x25   : > { %1324 = vmatpush3.bf16.msra.mxu1 %v1323_v56  ;;  %v1377_v56 = vpack.c.bf16 %v1074_v55, %v1073_v54  ;;  %v1042_v54 = vld [vmem:[%s2256_s2] ss:$0 sm:$0xff] }
  0x26   : > { %1326 = vmatprep.subr.bf16.mxu1 %v1325_v57 }
  0x28   : > { %368 = vmatmul.mubr.f32.vlgmr.msra.gmra.mrb[0].mxu1 %v1643_v27 }
  0x29   : > { %1328 = vmatpush3.bf16.msra.mxu1 %v1325_v57  ;;  %372 = vmatprep.mubr.f32.mxu1 %v232_v61  ;;  %v1057_v57 = vld [vmem:[%s2255_s1 + $0x1d0] sm:$0xff]  ;;  %v1076_v61 = vld [vmem:[%s2255_s1 + $0x268] sm:$0xff] }
  0x2a   : > { %1330 = vmatprep.subr.bf16.mxu1 %v1329_v60  ;;  %v1379_v59 = vpack.c.bf16 %v1058_v58, %v1057_v57 }
  0x2c   : > { %373 = vmatmul.mubr.f32.gmra.mrb[2].mxu1 %v1645_v28 }
  0x2d   : > { %1332 = vmatpush3.bf16.msra.mxu1 %v1329_v60  ;;  %1255 = vmatprep.mubr.f32.mxu1 %v242_v3  ;;  %v1075_v60 = vld [vmem:[%s2255_s1 + $0x260] sm:$0xff]  ;;  %v1078_v3 = vld [vmem:[%s2255_s1 + $0x278] sm:$0xff] }
  0x2e   : > { %1334 = vmatprep.subr.bf16.mxu1 %v1333_v2  ;;  %v1381_v62 = vpack.c.bf16 %v1076_v61, %v1075_v60 }
  0x31   : > { %1336 = vmatpush3.bf16.msra.mxu1 %v1333_v2  ;;  %v1077_v2 = vld [vmem:[%s2255_s1 + $0x270] sm:$0xff] }
  0x32   : > { %1338 = vmatprep.subr.bf16.mxu1 %v1337_v6  ;;  %v1385_v4 = vpack.c.bf16 %v1078_v3, %v1077_v2 }
  0x35   : > { %1340 = vmatpush3.bf16.msra.mxu1 %v1337_v6  ;;  %v1062_v6 = vld [vmem:[%s2255_s1 + $0x1f8] sm:$0xff] }
  0x36   : > { %1342 = vmatprep.subr.bf16.mxu1 %v1341_v9  ;;  %v1387_v7 = vpack.c.bf16 %v1062_v6, %v1061_v5 }
  0x39   : > { %1344 = vmatpush3.bf16.msra.mxu1 %v1341_v9  ;;  %v1080_v9 = vld [vmem:[%s2255_s1 + $0x288] sm:$0xff] }
  0x3a   : > { %1346 = vmatprep.subr.bf16.mxu1 %v1345_v12  ;;  %v1864_v10 = vpack.c.bf16 %v1080_v9, %v1079_v8  ;;  %v1084_v8 = vld [vmem:[%s2255_s1 + $0x2a8] sm:$0xff] }
  0x3d   : > { %1348 = vmatpush3.bf16.msra.mxu1 %v1345_v12  ;;  %v703_v12 = vld [vmem:[%s2257_s3 + $0x18] sm:$0xff] }
  0x3e   : > { %1350 = vmatprep.subr.bf16.mxu1 %v1349_v15  ;;  %v1421_v14 = vpack.c.bf16 %v703_v12, %v701_v11 }
  0x40   : > { %1422 = vmatprep.subr.bf16.mxu0 %v1421_v14  ;;  %v1085_v14 = vld [vmem:[%s2255_s1 + $0x2b0] sm:$0xff] }
  0x41   : > { %1352 = vmatpush3.bf16.msra.mxu1 %v1349_v15  ;;  %v702_v15 = vld [vmem:[%s2257_s3 + $0x10] sm:$0xff] }
  0x42   : > { %1354 = vmatprep.subr.bf16.mxu1 %v1353_v18 }
  0x45   : > { %1356 = vmatpush3.bf16.msra.mxu1 %v1353_v18  ;;  %v1423_v18 = vpack.c.bf16 %v702_v15, %v700_v13  ;;  %v1086_v15 = vld [vmem:[%s2255_s1 + $0x2b8] sm:$0xff] }
  0x46   : > { %1358 = vmatprep.subr.bf16.mxu1 %v1357_v25  ;;  %v711_v25 = vld [vmem:[%s2257_s3 + $0x58] sm:$0xff] }
  0x47   : > { %1424 = vmatpush1.bf16.msra.mxu0 %v1423_v18  ;;  %v1429_v29 = vpack.c.bf16 %v711_v25, %v709_v24  ;;  %v1088_v18 = vld [vmem:[%s2255_s1 + $0x2c8] sm:$0xff]  ;;  %v1409_v24 = vpack.c.bf16 %v1090_v23, %v1089_v22  ;;  %v1091_v25 = vld [vmem:[%s2255_s1 + $0x2e0] sm:$0xff] }
  0x48   : > { %1256 = vmatmul.mubr.msk.f32.vlgmr.msra.gmra.mrb[4].mxu1 %vm1110_vm3, %v243_v21  ;;  %v1425_v21 = vpack.c.bf16 %v707_v17, %v705_v16  ;;  %v1087_v17 = vld [vmem:[%s2255_s1 + $0x2c0] sm:$0xff]  ;;  %v757_v23 = vld [vmem:[%s2257_s3 + $0x1c8] sm:$0xff] }
  0x49   : > { %1360 = vmatpush3.bf16.msra.mxu1 %v1359_v31  ;;  %v710_v31 = vld [vmem:[%s2257_s3 + $0x50] sm:$0xff] }
  0x4a   : > { %1362 = vmatprep.subr.bf16.mxu1 %v1361_v32  ;;  %1426 = vmatprep.subr.bf16.mxu0 %v1425_v21  ;;  %v713_v32 = vld [vmem:[%s2257_s3 + $0x68] sm:$0xff]  ;;  %v1431_v34 = vpack.c.bf16 %v710_v31, %v708_v30  ;;  %v1405_v21 = vpack.c.bf16 %v1088_v18, %v1087_v17  ;;  %v1093_v30 = vld [vmem:[%s2255_s1 + $0x2f0] sm:$0xff]  ;;  %v1094_v31 = vld [vmem:[%s2255_s1 + $0x2f8] sm:$0xff] }
  0x4b   : > { %1428 = vmatpush1.bf16.msra.mxu0 %v1427_v26  ;;  %v1433_v35 = vpack.c.bf16 %v715_v33, %v713_v32  ;;  %v1092_v26 = vld [vmem:[%s2255_s1 + $0x2e8] sm:$0xff]  ;;  %v1417_v32 = vpack.c.bf16 %v1094_v31, %v1093_v30  ;;  %v752_v18 = vld [vmem:[%s2257_s3 + $0x1a0] sm:$0xff] }
  0x4c   : > { %1430 = vmatprep.subr.bf16.mxu0 %v1429_v29  ;;  %v1413_v29 = vpack.c.bf16 %v1092_v26, %v1091_v25  ;;  %v756_v26 = vld [vmem:[%s2257_s3 + $0x1c0] sm:$0xff]  ;;  %v761_v31 = vld [vmem:[%s2257_s3 + $0x1e8] sm:$0xff] }
  0x4d   : > { %1364 = vmatpush3.bf16.msra.mxu1 %v1363_v37  ;;  %v714_v37 = vld [vmem:[%s2257_s3 + $0x70] sm:$0xff] }
  0x4e   : > { %1366 = vmatprep.subr.bf16.mxu1 %v1365_v38  ;;  %v717_v38 = vld [vmem:[%s2257_s3 + $0x88] sm:$0xff]  ;;  %v1435_v40 = vpack.c.bf16 %v714_v37, %v712_v36 }
  0x4f   : > { %1432 = vmatpush1.bf16.msra.mxu0 %v1431_v34  ;;  %v1437_v41 = vpack.c.bf16 %v719_v39, %v717_v38  ;;  %v720_v34 = vld [vmem:[%s2257_s3 + $0xa0] sm:$0xff]  ;;  %v725_v37 = vld [vmem:[%s2257_s3 + $0xc8] sm:$0xff]  ;;  %v727_v38 = vld [vmem:[%s2257_s3 + $0xd8] sm:$0xff] }
  0x50   : > { %1434 = vmatprep.subr.bf16.mxu0 %v1433_v35  ;;  %v722_v35 = vld [vmem:[%s2257_s3 + $0xb0] sm:$0xff]  ;;  %v1445_v39 = vpack.c.bf16 %v727_v38, %v725_v37  ;;  %v765_v37 = vld [vmem:[%s2257_s3 + $0x208] sm:$0xff]  ;;  %v767_v38 = vld [vmem:[%s2257_s3 + $0x218] sm:$0xff] }
  0x51   : > { %1368 = vmatpush3.bf16.msra.mxu1 %v1367_v43  ;;  %v718_v43 = vld [vmem:[%s2257_s3 + $0x90] sm:$0xff]  ;;  %v1443_v36 = vpack.c.bf16 %v722_v35, %v720_v34  ;;  %v760_v34 = vld [vmem:[%s2257_s3 + $0x1e0] sm:$0xff] }
  0x52   : > { %1370 = vmatprep.subr.bf16.mxu1 %v1369_v44  ;;  %v721_v44 = vld [vmem:[%s2257_s3 + $0xa8] sm:$0xff]  ;;  %v1439_v46 = vpack.c.bf16 %v718_v43, %v716_v42  ;;  %v762_v35 = vld [vmem:[%s2257_s3 + $0x1f0] sm:$0xff] }
  0x53   : > { %1436 = vmatpush1.bf16.msra.mxu0 %v1435_v40  ;;  %v1441_v47 = vpack.c.bf16 %v723_v45, %v721_v44  ;;  %v724_v40 = vld [vmem:[%s2257_s3 + $0xc0] sm:$0xff]  ;;  %v729_v43 = vld [vmem:[%s2257_s3 + $0xe8] sm:$0xff]  ;;  %v731_v44 = vld [vmem:[%s2257_s3 + $0xf8] sm:$0xff] }
  0x54   : > { %1438 = vmatprep.subr.bf16.mxu0 %v1437_v41  ;;  %v726_v41 = vld [vmem:[%s2257_s3 + $0xd0] sm:$0xff]  ;;  %v1449_v45 = vpack.c.bf16 %v731_v44, %v729_v43 }
  0x55   : > { %1372 = vmatpush3.bf16.msra.mxu1 %v1371_v49  ;;  %v1447_v42 = vpack.c.bf16 %v726_v41, %v724_v40 }
  0x56   : > { %1374 = vmatprep.subr.bf16.mxu1 %v1373_v50 }
  0x57   : > { %1440 = vmatpush1.bf16.msra.mxu0 %v1439_v46  ;;  %v728_v46 = vld [vmem:[%s2257_s3 + $0xe0] sm:$0xff] }
  0x58   : > { %1442 = vmatprep.subr.bf16.mxu0 %v1441_v47  ;;  %v730_v47 = vld [vmem:[%s2257_s3 + $0xf0] sm:$0xff] }
  0x59   : > { %1376 = vmatpush3.bf16.msra.mxu1 %v1375_v53 }
  0x5a   : > { %1378 = vmatprep.subr.bf16.mxu1 %v1377_v56 }
  0x5b   : > { %1444 = vmatpush1.bf16.msra.mxu0 %v1443_v36  ;;  %v1483_v36 = vpack.c.bf16 %v762_v35, %v760_v34 }
  0x5c   : > { %1446 = vmatprep.subr.bf16.mxu0 %v1445_v39  ;;  %v1485_v39 = vpack.c.bf16 %v767_v38, %v765_v37  ;;  %v786_v37 = vld [vmem:[%s2257_s3 + $0x2b0] sm:$0xff]  ;;  %v789_v38 = vld [vmem:[%s2257_s3 + $0x2c8] sm:$0xff] }
  0x5d   : > { %1380 = vmatpush3.bf16.msra.mxu1 %v1379_v59 }
  0x5e   : > { %1382 = vmatprep.subr.bf16.mxu1 %v1381_v62 }
  0x5f   : > { %1448 = vmatpush1.bf16.msra.mxu0 %v1447_v42 }
  0x60   : > { %1450 = vmatprep.subr.bf16.mxu0 %v1449_v45 }
  0x61   : > { %1384 = vmatpush3.bf16.msra.mxu1 %v1383_v1 }
  0x62   : > { %1386 = vmatprep.subr.bf16.mxu1 %v1385_v4  ;;  %v1081_v4 = vld [vmem:[%s2255_s1 + $0x290] sm:$0xff] }
  0x65   : > { %1388 = vmatpush3.bf16.msra.mxu1 %v1387_v7  ;;  %v1083_v7 = vld [vmem:[%s2255_s1 + $0x2a0] sm:$0xff] }
  0x66   : > { %1390 = vmatprep.subr.bf16.mxu1 %v1864_v10  ;;  %v1397_v13 = vpack.c.bf16 %v1084_v8, %v1083_v7  ;;  %v746_v7 = vld [vmem:[%s2257_s3 + $0x170] sm:$0xff]  ;;  %v749_v8 = vld [vmem:[%s2257_s3 + $0x188] sm:$0xff] }
  0xfb   : > { %v1143_v48 = vpop.f32.mrb[0].mxu1 }
  0xfc   : > { %v1144_v49 = vpop.f32.mrb[1].mxu1 }
  0xfd   : > { %v1145_v50 = vadd.f32 %v1144_v49, %v1143_v48  ;;  %v733_v48 = vld [vmem:[%s2257_s3 + $0x108] sm:$0xff]  ;;  %v1451_v49 = vpack.c.bf16 %v730_v47, %v728_v46  ;;  %v1096_v46 = vld [vmem:[%s2256_s2 + $0x1] ss:$0 sm:$0xff] }
  0xff   : > { %v1146_v51 = vpop.f32.mrb[2].mxu1  ;;  %v370_v57 = vadd.f32 %v1145_v50, %v1042_v54  ;;  %v735_v50 = vld [vmem:[%s2257_s3 + $0x118] sm:$0xff]  ;;  %1452 = vmatpush1.bf16.msra.mxu0 %v1451_v49 }
 0x100   : > { %v1147_v52 = vpop.f32.mrb[3].mxu1 }
 0x101   : > { %v1148_v53 = vadd.f32 %v1147_v52, %v1146_v51  ;;  %v732_v51 = vld [vmem:[%s2257_s3 + $0x100] sm:$0xff]  ;;  %v734_v52 = vld [vmem:[%s2257_s3 + $0x110] sm:$0xff] }
 0x103   : > { %v375_v55 = vadd.f32 %v1148_v53, %v1042_v54  ;;  %v1453_v53 = vpack.c.bf16 %v735_v50, %v733_v48  ;;  %v737_v54 = vld [vmem:[%s2257_s3 + $0x128] sm:$0xff] }
 0x105   : > { %1454 = vmatprep.subr.bf16.mxu0 %v1453_v53 }
 0x11b   : > { %v1257_v56 = vpop.f32.mrb[4].mxu1 }
 0x11c   : > { %v450_v58 = vadd.f32 %v1257_v56, %v375_v55  ;;  %v444_v59 = vpop.f32.mrb[5].mxu1  ;;  %v739_v55 = vld [vmem:[%s2257_s3 + $0x138] sm:$0xff]  ;;  %v1455_v56 = vpack.c.bf16 %v734_v52, %v732_v51 }
 0x11d   : > { %v445_v60 = vadd.f32 %v444_v59, %v370_v57  ;;  %v1457_v57 = vpack.c.bf16 %v739_v55, %v737_v54  ;;  %v738_v59 = vld [vmem:[%s2257_s3 + $0x130] sm:$0xff] }
 0x11e   : > { %v454_v61 = vadd.f32 %v450_v58, %v1645_v28  ;;  %v1082_v28 = vld [vmem:[%s2255_s1 + $0x298] sm:$0xff]  ;;  %v736_v58 = vld [vmem:[%s2257_s3 + $0x120] sm:$0xff]  ;;  %1456 = vmatpush1.bf16.msra.mxu0 %v1455_v56 }
 0x11f   : > { %v453_v62 = vadd.f32 %v445_v60, %v1643_v27  ;;  %v1393_v6 = vpack.c.bf16 %v1082_v28, %v1081_v4  ;;  %v741_v60 = vld [vmem:[%s2257_s3 + $0x148] sm:$0xff]  ;;  %1458 = vmatprep.subr.bf16.mxu0 %v1457_v57  ;;  %v747_v28 = vld [vmem:[%s2257_s3 + $0x178] sm:$0xff]  ;;  %v764_v57 = vld [vmem:[%s2257_s3 + $0x200] sm:$0xff] }
 0x120   : > { %vm456_vm4 = vcmp.ge.f32.partialorder %v454_v61, 0.0  ;;  %v458_v63 = vmul.f32 0.2, %v454_v61  ;;  %v745_v4 = vld [vmem:[%s2257_s3 + $0x168] sm:$0xff] }
 0x121   : > { %vm455_vm5 = vcmp.ge.f32.partialorder %v453_v62, 0.0  ;;  %v457_v0 = vmul.f32 0.2, %v453_v62 }
 0x122   : > { %v1938_v1 = vsel %vm456_vm4, %v454_v61, %v458_v63  ;;  %v743_v61 = vld [vmem:[%s2257_s3 + $0x158] sm:$0xff] }
 0x123   : > { %v1940_v2 = vsel %vm455_vm5, %v453_v62, %v457_v0  ;;  %v462_v3 = vrot.slane %v1938_v1, 7  ;;  %v468_v12 = vrot.slane %v1938_v1, 1  ;;  %v1459_v62 = vpack.c.bf16 %v738_v59, %v736_v58  ;;  %v740_v0 = vld [vmem:[%s2257_s3 + $0x140] sm:$0xff]  ;;  %v766_v59 = vld [vmem:[%s2257_s3 + $0x210] sm:$0xff] }
 0x124   : > { %v461_v27 = vrot.slane %v1940_v2, 7  ;;  %v467_v11 = vrot.slane %v1940_v2, 1  ;;  %v1461_v63 = vpack.c.bf16 %v743_v61, %v741_v60  ;;  %v769_v60 = vld [vmem:[%s2257_s3 + $0x228] sm:$0xff] }
 0x125   : > { %1460 = vmatpush1.bf16.msra.mxu0 %v1459_v62 }
 0x126   : > { %v464_v5 = vsel %vm231_vm0, %v462_v3, %v461_v27  ;;  %v463_v9 = vsel %vm231_vm0, %v461_v27, %v462_v3  ;;  %v469_v16 = vsel %vm241_vm2, %v467_v11, %v468_v12  ;;  %v470_v33 = vsel %vm241_vm2, %v468_v12, %v467_v11  ;;  %v742_v3 = vld [vmem:[%s2257_s3 + $0x150] sm:$0xff]  ;;  %1462 = vmatprep.subr.bf16.mxu0 %v1461_v63 }
 0x127   : > { %1098 = vmatprep.mubr.msk.f32.mxu1 %vm1109_vm1, %v464_v5  ;;  %v1463_v27 = vpack.c.bf16 %v742_v3, %v740_v0  ;;  %v1465_v5 = vpack.c.bf16 %v747_v28, %v745_v4  ;;  %v1487_v3 = vpack.c.bf16 %v766_v59, %v764_v57 }
 0x128   : > { %595 = vmatmul.mubr.f32.vlgmr.msra.gmra.mrb[6].mxu1 %v1940_v2 }
 0x129   : > { %1392 = vmatpush3.bf16.msra.mxu1 %v1864_v10  ;;  %599 = vmatprep.mubr.f32.mxu1 %v463_v9  ;;  %v1401_v10 = vpack.c.bf16 %v1086_v15, %v1085_v14  ;;  %v751_v9 = vld [vmem:[%s2257_s3 + $0x198] sm:$0xff]  ;;  %v750_v14 = vld [vmem:[%s2257_s3 + $0x190] sm:$0xff] }
 0x12a   : > { %1394 = vmatprep.subr.bf16.mxu1 %v1393_v6  ;;  %1464 = vmatpush1.bf16.msra.mxu0 %v1463_v27  ;;  %v1469_v12 = vpack.c.bf16 %v751_v9, %v749_v8  ;;  %v773_v9 = vld [vmem:[%s2257_s3 + $0x248] sm:$0xff] }
 0x12b   : > { %1466 = vmatprep.subr.bf16.mxu0 %v1465_v5  ;;  %v768_v5 = vld [vmem:[%s2257_s3 + $0x220] sm:$0xff] }
 0x12c   : > { %600 = vmatmul.mubr.f32.gmra.mrb[8].mxu1 %v1938_v1 }
 0x12d   : > { %1396 = vmatpush3.bf16.msra.mxu1 %v1393_v6  ;;  %1290 = vmatprep.mubr.f32.mxu1 %v469_v16  ;;  %v744_v6 = vld [vmem:[%s2257_s3 + $0x160] sm:$0xff]  ;;  %v753_v16 = vld [vmem:[%s2257_s3 + $0x1a8] sm:$0xff] }
 0x12e   : > { %1398 = vmatprep.subr.bf16.mxu1 %v1397_v13  ;;  %v1467_v11 = vpack.c.bf16 %v746_v7, %v744_v6  ;;  %v770_v6 = vld [vmem:[%s2257_s3 + $0x230] sm:$0xff] }
 0x130   : > { %1468 = vmatpush1.bf16.msra.mxu0 %v1467_v11  ;;  %v775_v11 = vld [vmem:[%s2257_s3 + $0x258] sm:$0xff] }
 0x131   : > { %1400 = vmatpush3.bf16.msra.mxu1 %v1397_v13  ;;  %v748_v13 = vld [vmem:[%s2257_s3 + $0x180] sm:$0xff]  ;;  %1470 = vmatprep.subr.bf16.mxu0 %v1469_v12  ;;  %v1491_v12 = vpack.c.bf16 %v770_v6, %v768_v5 }
 0x132   : > { %1402 = vmatprep.subr.bf16.mxu1 %v1401_v10  ;;  %v1471_v15 = vpack.c.bf16 %v750_v14, %v748_v13  ;;  %v1493_v13 = vpack.c.bf16 %v775_v11, %v773_v9  ;;  %v772_v14 = vld [vmem:[%s2257_s3 + $0x240] sm:$0xff] }
 0x134   : > { %1472 = vmatpush1.bf16.msra.mxu0 %v1471_v15  ;;  %v774_v15 = vld [vmem:[%s2257_s3 + $0x250] sm:$0xff] }
 0x135   : > { %1404 = vmatpush3.bf16.msra.mxu1 %v1401_v10  ;;  %v755_v10 = vld [vmem:[%s2257_s3 + $0x1b8] sm:$0xff] }
 0x136   : > { %1406 = vmatprep.subr.bf16.mxu1 %v1405_v21  ;;  %v1473_v17 = vpack.c.bf16 %v755_v10, %v753_v16  ;;  %v777_v16 = vld [vmem:[%s2257_s3 + $0x268] sm:$0xff]  ;;  %v779_v10 = vld [vmem:[%s2257_s3 + $0x278] sm:$0xff] }
 0x138   : > { %1474 = vmatprep.subr.bf16.mxu0 %v1473_v17  ;;  %v1495_v17 = vpack.c.bf16 %v774_v15, %v772_v14 }
 0x139   : > { %1408 = vmatpush3.bf16.msra.mxu1 %v1405_v21  ;;  %v754_v21 = vld [vmem:[%s2257_s3 + $0x1b0] sm:$0xff] }
 0x13a   : > { %1410 = vmatprep.subr.bf16.mxu1 %v1409_v24  ;;  %v1475_v22 = vpack.c.bf16 %v754_v21, %v752_v18  ;;  %v1542_v18 = vmov 0.0   ;;  %v1497_v21 = vpack.c.bf16 %v779_v10, %v777_v16 }
 0x13c   : > { %1476 = vmatpush1.bf16.msra.mxu0 %v1475_v22  ;;  %v776_v22 = vld [vmem:[%s2257_s3 + $0x260] sm:$0xff] }
 0x13d   : > { %1412 = vmatpush3.bf16.msra.mxu1 %v1409_v24  ;;  %v759_v24 = vld [vmem:[%s2257_s3 + $0x1d8] sm:$0xff] }
 0x13e   : > { %1414 = vmatprep.subr.bf16.mxu1 %v1413_v29  ;;  %v1477_v25 = vpack.c.bf16 %v759_v24, %v757_v23  ;;  %v778_v23 = vld [vmem:[%s2257_s3 + $0x270] sm:$0xff]  ;;  %v781_v24 = vld [vmem:[%s2257_s3 + $0x288] sm:$0xff] }
 0x140   : > { %1478 = vmatprep.subr.bf16.mxu0 %v1477_v25  ;;  %v783_v25 = vld [vmem:[%s2257_s3 + $0x298] sm:$0xff] }
 0x141   : > { %1416 = vmatpush3.bf16.msra.mxu1 %v1413_v29  ;;  %v758_v29 = vld [vmem:[%s2257_s3 + $0x1d0] sm:$0xff] }
 0x142   : > { %1418 = vmatprep.subr.bf16.mxu1 %v1417_v32  ;;  %v1479_v30 = vpack.c.bf16 %v758_v29, %v756_v26  ;;  %v1499_v26 = vpack.c.bf16 %v778_v23, %v776_v22  ;;  %v1501_v29 = vpack.c.bf16 %v783_v25, %v781_v24 }
 0x144   : > { %1480 = vmatpush1.bf16.msra.mxu0 %v1479_v30  ;;  %v780_v30 = vld [vmem:[%s2257_s3 + $0x280] sm:$0xff] }
 0x145   : > { %1420 = vmatpush3.bf16.msra.mxu1 %v1417_v32  ;;  %v763_v32 = vld [vmem:[%s2257_s3 + $0x1f8] sm:$0xff] }
 0x148   : > { %1291 = vmatmul.mubr.msk.f32.vlgmr.msra.gmra.mrb[10].mxu1 %vm1110_vm3, %v470_v33  ;;  %v1481_v33 = vpack.c.bf16 %v763_v32, %v761_v31  ;;  %v782_v31 = vld [vmem:[%s2257_s3 + $0x290] sm:$0xff]  ;;  %v785_v32 = vld [vmem:[%s2257_s3 + $0x2a8] sm:$0xff] }
 0x149   : > { %v1503_v34 = vpack.c.bf16 %v782_v31, %v780_v30 }
 0x14a   : > { %1482 = vmatprep.subr.bf16.mxu0 %v1481_v33  ;;  %v787_v33 = vld [vmem:[%s2257_s3 + $0x2b8] sm:$0xff] }
 0x14b   : > { %1484 = vmatpush1.bf16.msra.mxu0 %v1483_v36  ;;  %v1505_v35 = vpack.c.bf16 %v787_v33, %v785_v32  ;;  %v784_v36 = vld [vmem:[%s2257_s3 + $0x2a0] sm:$0xff] }
 0x14c   : > { %1486 = vmatprep.subr.bf16.mxu0 %v1485_v39  ;;  %v791_v39 = vld [vmem:[%s2257_s3 + $0x2d8] sm:$0xff] }
 0x1fb   : > { %v1199_v40 = vpop.f32.mrb[6].mxu1 }
 0x1fc   : > { %v1200_v41 = vpop.f32.mrb[7].mxu1 }
 0x1fd   : > { %v1201_v42 = vadd.f32 %v1200_v41, %v1199_v40  ;;  %v1507_v40 = vpack.c.bf16 %v786_v37, %v784_v36  ;;  %v1509_v41 = vpack.c.bf16 %v791_v39, %v789_v38 }
 0x1ff   : > { %v1202_v43 = vpop.f32.mrb[8].mxu1  ;;  %v597_v49 = vadd.f32 %v1201_v42, %v1096_v46  ;;  %v788_v42 = vld [vmem:[%s2257_s3 + $0x2c0] sm:$0xff] }
 0x200   : > { %v1203_v44 = vpop.f32.mrb[9].mxu1 }
 0x201   : > { %v1204_v45 = vadd.f32 %v1203_v44, %v1202_v43  ;;  %v790_v43 = vld [vmem:[%s2257_s3 + $0x2d0] sm:$0xff]  ;;  %v793_v44 = vld [vmem:[%s2257_s3 + $0x2e8] sm:$0xff] }
 0x203   : > { %v602_v47 = vadd.f32 %v1204_v45, %v1096_v46  ;;  %v795_v45 = vld [vmem:[%s2257_s3 + $0x2f8] sm:$0xff]  ;;  %v1511_v46 = vpack.c.bf16 %v790_v43, %v788_v42 }
 0x21b   : > { %v1292_v48 = vpop.f32.mrb[10].mxu1 }
 0x21c   : > { %v677_v50 = vadd.f32 %v1292_v48, %v602_v47  ;;  %v671_v51 = vpop.f32.mrb[11].mxu1  ;;  %v1513_v47 = vpack.c.bf16 %v795_v45, %v793_v44  ;;  %v792_v48 = vld [vmem:[%s2257_s3 + $0x2e0] sm:$0xff] }
 0x21d   : > { %v672_v52 = vadd.f32 %v671_v51, %v597_v49  ;;  %v794_v49 = vld [vmem:[%s2257_s3 + $0x2f0] sm:$0xff]  ;;  %v800_v51 = vsub.s32 0, %v1629_v20 }
 0x21e   : > { %v681_v53 = vadd.f32 %v677_v50, %v1938_v1  ;;  %v771_v1 = vld [vmem:[%s2257_s3 + $0x238] sm:$0xff]  ;;  %v1515_v50 = vpack.c.bf16 %v794_v49, %v792_v48 }
 0x21f   : > { %v680_v54 = vadd.f32 %v672_v52, %v1940_v2  ;;  %v1489_v4 = vpack.c.bf16 %v771_v1, %v769_v60  ;;  %v796_v52 = vld [vmem:[%s2258_s4] sm:$0x3] }
 0x220   : > { %vm683_vm6 = vcmp.ge.f32.partialorder %v681_v53, 0.0  ;;  %v685_v55 = vmul.f32 0.2, %v681_v53 }
 0x221   : > { %vm682_vm7 = vcmp.ge.f32.partialorder %v680_v54, 0.0  ;;  %v684_v56 = vmul.f32 0.2, %v680_v54 }
 0x222   : > { %v687_v58 = vsel %vm683_vm6, %v681_v53, %v685_v55  ;;  %v804_v53 = vsub.s32 1, %v1629_v20 }
 0x223   : > { %v695_v2 = vrot.slane %v687_v58, 1  ;;  %v686_v61 = vsel %vm682_vm7, %v680_v54, %v684_v56  ;;  %v689_v62 = vrot.slane %v687_v58, 7  ;;  %v801_v54 = vrot.slane %v796_v52, %v800_v51 }
 0x224   : > { %v694_v63 = vrot.slane %v686_v61, 1  ;;  %v688_v0 = vrot.slane %v686_v61, 7  ;;  %v805_v55 = vrot.slane %v796_v52, %v804_v53 }
 0x226   : > { %v691_v28 = vsel %vm231_vm0, %v689_v62, %v688_v0  ;;  %v690_v27 = vsel %vm231_vm0, %v688_v0, %v689_v62  ;;  %v696_v7 = vsel %vm241_vm2, %v694_v63, %v695_v2  ;;  %v697_v8 = vsel %vm241_vm2, %v695_v2, %v694_v63 }
 0x227   : > { %1102 = vmatprep.mubr.msk.f32.mxu0 %vm1109_vm1, %v691_v28 }
 0x228   : > { %873 = vmatmul.mubr.f32.vlgmr.msra.gmra.mrb[0].mxu0 %v686_v61 }
 0x229   : > { %1488 = vmatpush1.bf16.msra.mxu0 %v1487_v3  ;;  %878 = vmatprep.mubr.f32.mxu0 %v690_v27 }
 0x22a   : > { %1490 = vmatprep.subr.bf16.mxu0 %v1489_v4 }
 0x22c   : > { %879 = vmatmul.mubr.f32.gmra.mrb[2].mxu0 %v687_v58 }
 0x22d   : > { %1492 = vmatpush1.bf16.msra.mxu0 %v1491_v12  ;;  %949 = vmatprep.mubr.f32.mxu0 %v1542_v18 }
 0x22e   : > { %1494 = vmatprep.subr.bf16.mxu0 %v1493_v13 }
 0x231   : > { %1496 = vmatpush1.bf16.msra.mxu0 %v1495_v17 }
 0x232   : > { %1498 = vmatprep.subr.bf16.mxu0 %v1497_v21 }
 0x235   : > { %1500 = vmatpush1.bf16.msra.mxu0 %v1499_v26 }
 0x236   : > { %1502 = vmatprep.subr.bf16.mxu0 %v1501_v29 }
 0x239   : > { %1504 = vmatpush1.bf16.msra.mxu0 %v1503_v34 }
 0x23a   : > { %1506 = vmatprep.subr.bf16.mxu0 %v1505_v35 }
 0x23d   : > { %1508 = vmatpush1.bf16.msra.mxu0 %v1507_v40 }
 0x23e   : > { %1510 = vmatprep.subr.bf16.mxu0 %v1509_v41 }
 0x241   : > { %1512 = vmatpush1.bf16.msra.mxu0 %v1511_v46 }
 0x242   : > { %1514 = vmatprep.subr.bf16.mxu0 %v1513_v47 }
 0x245   : > { %1516 = vmatpush1.bf16.msra.mxu0 %v1515_v50 }
 0x248   : > { %950 = vmatmul.mubr.f32.vlgmr.msra.gmra.mrb[0].mxu0 %v696_v7 }
 0x249   : > { %955 = vmatprep.mubr.f32.mxu0 %v1542_v18 }
 0x24c   : > { %1104 = vmatmul.mubr.msk.f32.gmra.mrb[2].mxu0 %vm1110_vm3, %v697_v8 }
 0x31b   : > { %v951_v56 = vpop.f32.mrb[0].mxu0 }
 0x31c   : > { %v1517_v57 = vadd.f32 %v951_v56, %v801_v54  ;;  %v953_v58 = vpop.f32.mrb[1].mxu0 }
 0x31d   : > { %v1518_v59 = vadd.f32 %v953_v58, %v805_v55 }
 0x31e   : > { %vm962_vm8 = vcmp.ge.f32.partialorder %v1517_v57, 0.0  ;;  %v966_v19 = vmul.f32 0.2, %v1517_v57 }
 0x31f   : > { %vm963_vm9 = vcmp.ge.f32.partialorder %v1518_v59, 0.0  ;;  %v967_v60 = vmul.f32 0.2, %v1518_v59  ;;  %v957_v1 = vpop.f32.mrb[2].mxu0 }
 0x320   : > { %v970_v2 = vsel %vm962_vm8, %v1517_v57, %v966_v19  ;;  %v1519_v61 = vadd.f32 %v957_v1, %v801_v54  ;;  %v959_v62 = vpop.f32.mrb[3].mxu0 }
 0x321   : > { %974 = vst [vmem:[%s224_s26] sm:$0xff] %v970_v2  ;;  %v971_v20 = vsel %vm963_vm9, %v1518_v59, %v967_v60  ;;  %v1520_v63 = vadd.f32 %v959_v62, %v805_v55 }
 0x322   : > { %975 = vst [vmem:[%s224_s26 + $0x8] sm:$0xff] %v971_v20  ;;  %vm964_vm10 = vcmp.ge.f32.partialorder %v1519_v61, 0.0  ;;  %v968_v0 = vmul.f32 0.2, %v1519_v61 }
 0x323   : > { %vm965_vm11 = vcmp.ge.f32.partialorder %v1520_v63, 0.0  ;;  %v969_v3 = vmul.f32 0.2, %v1520_v63 }
 0x324   : > { %v972_v4 = vsel %vm964_vm10, %v1519_v61, %v968_v0 }
 0x325   : > { %976 = vst [vmem:[%s224_s26 + $0x10] sm:$0xff] %v972_v4  ;;  %v973_v28 = vsel %vm965_vm11, %v1520_v63, %v969_v3 }
 0x326   : > { %977 = vst [vmem:[%s224_s26 + $0x18] sm:$0xff] %v973_v28 }
 0x327 PF: > { %s15_s18 = sadd.s32 1, %s1540_s18  }
 0x328   : > { %p12_p4 = scmp.ge.s32.totalorder %s15_s18, 4  }
 0x32a   :  { %14 = sbr.rel (!%p12_p4) target bundleno = 1 (0x1), region = 72 }

// kernel: decoder_forward.7
= control target key start
LH: loop header
LB: loop body
LE: loop exit
PB: predicated region body
PF: predicated region fallthrough
CT: control target
= control target key end

     0   :  { %s1756_s18 = smov 0   ;;  %s2357_s0 = inlined_call_operand.vmem [shape: f32[2,64,128], index: 0, kind: input, shape index: {}]   ;;  %s2358_s1 = inlined_call_operand.vmem [shape: f32[2,384,128], index: 1, kind: input, shape index: {}]   ;;  %s2359_s2 = inlined_call_operand.vmem [shape: f32[2,1,128], index: 2, kind: input, shape index: {}]   ;;  %s2360_s3 = inlined_call_operand.vmem [shape: f32[128,128], index: 3, kind: input, shape index: {}]   ;;  %s2361_s4 = inlined_call_operand.vmem [shape: f32[1,128], index: 4, kind: input, shape index: {}]   ;;  %s2362_s5 = inlined_call_operand.vmem [shape: f32[2,64,128], index: 5, kind: output, shape index: {}]  }
   0x1 LB: > { %s1143_s19 = sadd.s32 4294967295, %s1724_s18   ;;  %p1147_p0 = scmp.ge.s32.totalorder %s1724_s18, 1  ;;  %s1724_s18 = sphi %s1756_s18, %s15_s18  }
   0x2   : > { %p187_p1 = scmp.lt.s32.totalorder %s1724_s18, 3 }
   0x4   : > { %p188_p2 = pnand %p1147_p0, %p187_p1 }
   0x5   : > { %v324_v0 = vld [vmem:[%s2358_s1 + $0x80] sm:$0xff] (!%p188_p2)  ;;  %v325_v1 = vld [vmem:[%s2358_s1 + $0x88] sm:$0xff] (!%p188_p2)  ;;  %v326_v5 = vld [vmem:[%s2358_s1 + $0x90] sm:$0xff] (!%p188_p2)  ;;  %p1784_p3 = scmp.lt.s32.totalorder (!%p188_p2), %s1143_s19, 1  ;;  %v241_v28 = vlaneseq (!%p188_p2) }
   0x6   : > { %191 = sbr.rel (%p188_p2) target bundleno = 764 (0x2fc), region = 40  ;;  %v308_v2 = vld [vmem:[%s2358_s1] sm:$0xff] (!%p188_p2)  ;;  %v1534_v3 = vpack.c.bf16 (!%p188_p2), %v325_v1, %v324_v0  ;;  %v309_v4 = vld [vmem:[%s2358_s1 + $0x8] sm:$0xff] (!%p188_p2)  ;;  %v327_v6 = vld [vmem:[%s2358_s1 + $0x98] sm:$0xff] (!%p188_p2) }
   0x7   : > { %v1536_v7 = vpack.c.bf16 (!%p188_p2), %v309_v4, %v308_v2  ;;  %v1538_v8 = vpack.c.bf16 (!%p188_p2), %v327_v6, %v326_v5  ;;  %v340_v9 = vld [vmem:[%s2358_s1 + $0x100] sm:$0xff] (!%p188_p2)  ;;  %v341_v10 = vld [vmem:[%s2358_s1 + $0x108] sm:$0xff] (!%p188_p2)  ;;  %v310_v11 = vld [vmem:[%s2358_s1 + $0x10] sm:$0xff] (!%p188_p2)  ;;  %v1855_v38 = vshrl.u32 (!%p188_p2), %v241_v28, 7 }
   0x8   : > { %1535 = vmatprep.subr.bf16.mxu0 (!%p188_p2), %v1534_v3  ;;  %v1566_v12 = vpack.c.bf16 (!%p188_p2), %v341_v10, %v340_v9  ;;  %v311_v13 = vld [vmem:[%s2358_s1 + $0x18] sm:$0xff] (!%p188_p2)  ;;  %v328_v14 = vld [vmem:[%s2358_s1 + $0xa0] sm:$0xff] (!%p188_p2)  ;;  %v329_v15 = vld [vmem:[%s2358_s1 + $0xa8] sm:$0xff] (!%p188_p2) }
   0x9   : > { %1537 = vmatpush3.bf16.msra.mxu0 (!%p188_p2), %v1536_v7  ;;  %v1540_v16 = vpack.c.bf16 (!%p188_p2), %v311_v13, %v310_v11  ;;  %v342_v17 = vld [vmem:[%s2358_s1 + $0x110] sm:$0xff] (!%p188_p2)  ;;  %v343_v18 = vld [vmem:[%s2358_s1 + $0x118] sm:$0xff] (!%p188_p2)  ;;  %v1542_v19 = vpack.c.bf16 (!%p188_p2), %v329_v15, %v328_v14  ;;  %v312_v21 = vld [vmem:[%s2358_s1 + $0x20] sm:$0xff] (!%p188_p2)  ;;  %vm243_vm0 = vcmp.lt.s32.totalorder (!%p188_p2), %v1855_v38, 1  ;;  %vm283_vm1 = vcmp.lt.s32.totalorder (!%p188_p2), %v1855_v38, 7 }
   0xa   : > { %1539 = vmatprep.subr.bf16.mxu0 (!%p188_p2), %v1538_v8  ;;  %1567 = vmatprep.subr.bf16.mxu1 (!%p188_p2), %v1566_v12  ;;  %v1570_v20 = vpack.c.bf16 (!%p188_p2), %v343_v18, %v342_v17  ;;  %v313_v22 = vld [vmem:[%s2358_s1 + $0x28] sm:$0xff] (!%p188_p2)  ;;  %v330_v23 = vld [vmem:[%s2358_s1 + $0xb0] sm:$0xff] (!%p188_p2)  ;;  %v331_v24 = vld [vmem:[%s2358_s1 + $0xb8] sm:$0xff] (!%p188_p2)  ;;  %vm1216_vm2 = vcmp.ne.s32.totalorder (!%p188_p2), %v1855_v38, 0 }
   0xb   : > { %1569 = vmatpush3.bf16.msra.mxu1 (!%p188_p2), %v1566_v12  ;;  %v344_v25 = vld [vmem:[%s2358_s1 + $0x120] sm:$0xff] (!%p188_p2)  ;;  %v345_v26 = vld [vmem:[%s2358_s1 + $0x128] sm:$0xff] (!%p188_p2)  ;;  %v1544_v29 = vpack.c.bf16 (!%p188_p2), %v313_v22, %v312_v21  ;;  %v346_v30 = vld [vmem:[%s2358_s1 + $0x130] sm:$0xff] (!%p188_p2)  ;;  %v1546_v32 = vpack.c.bf16 (!%p188_p2), %v331_v24, %v330_v23 }
   0xc   : > { %1571 = vmatprep.subr.bf16.mxu1 (!%p188_p2), %v1570_v20  ;;  %v1574_v27 = vpack.c.bf16 (!%p188_p2), %v345_v26, %v344_v25  ;;  %v347_v31 = vld [vmem:[%s2358_s1 + $0x138] sm:$0xff] (!%p188_p2)  ;;  %v314_v33 = vld [vmem:[%s2358_s1 + $0x30] sm:$0xff] (!%p188_p2)  ;;  %v332_v35 = vld [vmem:[%s2358_s1 + $0xc0] sm:$0xff] (!%p188_p2) }
   0xd   : > { %s2365_s19 = smov (!%p1784_p3, %s1143_s19), 1  ;;  %1541 = vmatpush3.bf16.msra.mxu0 %v1540_v16  ;;  %v315_v34 = vld [vmem:[%s2358_s1 + $0x38] sm:$0xff]  ;;  %v333_v36 = vld [vmem:[%s2358_s1 + $0xc8] sm:$0xff]  ;;  %v1578_v37 = vpack.c.bf16 %v347_v31, %v346_v30  ;;  %v348_v40 = vld [vmem:[%s2358_s1 + $0x140] sm:$0xff] }
   0xe   : > { %1543 = vmatprep.subr.bf16.mxu0 %v1542_v19  ;;  %s1214_s23 = sshll.u32 %s2365_s19, 6  ;;  %v1548_v39 = vpack.c.bf16 %v315_v34, %v314_v33  ;;  %v349_v41 = vld [vmem:[%s2358_s1 + $0x148] sm:$0xff]  ;;  %v1550_v42 = vpack.c.bf16 %v333_v36, %v332_v35  ;;  %v316_v43 = vld [vmem:[%s2358_s1 + $0x40] sm:$0xff]  ;;  %v334_v45 = vld [vmem:[%s2358_s1 + $0xd0] sm:$0xff] }
   0xf   : > { %1573 = vmatpush3.bf16.msra.mxu1 %v1570_v20  ;;  %s1868_s10 = scalar_lea.vmem %s2357_s0, %s1214_s23  ;;  %v317_v44 = vld [vmem:[%s2358_s1 + $0x48] sm:$0xff]  ;;  %v335_v46 = vld [vmem:[%s2358_s1 + $0xd8] sm:$0xff]  ;;  %v1582_v47 = vpack.c.bf16 %v349_v41, %v348_v40  ;;  %v350_v51 = vld [vmem:[%s2358_s1 + $0x150] sm:$0xff]  ;;  %s224_s13 = scalar_lea.vmem %s2362_s5, %s1214_s23 }
  0x10   : > { %1575 = vmatprep.subr.bf16.mxu1 %v1574_v27  ;;  %v1883_v48 = vld [vmem:[%s1868_s10] sm:$0xff]  ;;  %v1886_v49 = vld [vmem:[%s1868_s10 + $0x38] sm:$0xff]  ;;  %v1552_v50 = vpack.c.bf16 %v317_v44, %v316_v43  ;;  %v1900_v55 = vld [vmem:[%s1868_s10 + $0x8] sm:$0xff]  ;;  %v1554_v57 = vpack.c.bf16 %v335_v46, %v334_v45 }
  0x11   : > { %1545 = vmatpush3.bf16.msra.mxu0 %v1544_v29  ;;  %v351_v52 = vld [vmem:[%s2358_s1 + $0x158] sm:$0xff]  ;;  %v233_v53 = vrot.slane %v1883_v48, 7  ;;  %v240_v54 = vrot.slane %v1886_v49, 7  ;;  %v275_v56 = vrot.slane %v1883_v48, 1  ;;  %v318_v58 = vld [vmem:[%s2358_s1 + $0x50] sm:$0xff]  ;;  %v276_v60 = vrot.slane %v1900_v55, 1 }
  0x12   : > { %1547 = vmatprep.subr.bf16.mxu0 %v1546_v32  ;;  %v319_v59 = vld [vmem:[%s2358_s1 + $0x58] sm:$0xff]  ;;  %v336_v61 = vld [vmem:[%s2358_s1 + $0xe0] sm:$0xff]  ;;  %v337_v62 = vld [vmem:[%s2358_s1 + $0xe8] sm:$0xff]  ;;  %v1586_v0 = vpack.c.bf16 %v351_v52, %v350_v51  ;;  %v234_v23 = vrot.slane %v1900_v55, 7  ;;  %v282_v45 = vrot.slane %v1886_v49, 1  ;;  %v2012_v51 = vadd.s32 56, %v1855_v38 }
  0x13   : > { %1577 = vmatpush3.bf16.msra.mxu1 %v1574_v27  ;;  %v251_v63 = vsel %vm243_vm0, %v240_v54, %v233_v53  ;;  %v290_v1 = vsel %vm283_vm1, %v275_v56, %v276_v60  ;;  %v1556_v2 = vpack.c.bf16 %v319_v59, %v318_v58  ;;  %v352_v3 = vld [vmem:[%s2358_s1 + $0x160] sm:$0xff]  ;;  %v353_v4 = vld [vmem:[%s2358_s1 + $0x168] sm:$0xff]  ;;  %v1558_v5 = vpack.c.bf16 %v337_v62, %v336_v61  ;;  %v338_v8 = vld [vmem:[%s2358_s1 + $0xf0] sm:$0xff] }
  0x14   : > { %1579 = vmatprep.subr.bf16.mxu1 %v1578_v37  ;;  %1154 = vmatprep.mubr.msk.f32.mxu0 %vm1216_vm2, %v251_v63  ;;  %v320_v6 = vld [vmem:[%s2358_s1 + $0x60] sm:$0xff]  ;;  %v321_v7 = vld [vmem:[%s2358_s1 + $0x68] sm:$0xff]  ;;  %v339_v9 = vld [vmem:[%s2358_s1 + $0xf8] sm:$0xff]  ;;  %v1590_v10 = vpack.c.bf16 %v353_v4, %v352_v3  ;;  %v250_v31 = vsel %vm243_vm0, %v233_v53, %v234_v23  ;;  %v291_v58 = vsel %vm283_vm1, %v282_v45, %v275_v56  ;;  %vm1217_vm3 = vcmp.ne.s32.totalorder %v2012_v51, 63 }
  0x15   : > { %1549 = vmatpush3.bf16.msra.mxu0 %v1548_v39  ;;  %1434 = vmatprep.mubr.f32.mxu1 %v290_v1  ;;  %v1560_v11 = vpack.c.bf16 %v321_v7, %v320_v6  ;;  %v354_v12 = vld [vmem:[%s2358_s1 + $0x170] sm:$0xff]  ;;  %v355_v13 = vld [vmem:[%s2358_s1 + $0x178] sm:$0xff]  ;;  %v1562_v14 = vpack.c.bf16 %v339_v9, %v338_v8  ;;  %v1189_v21 = vld [vmem:[%s2358_s1 + $0x280] sm:$0xff] }
  0x16   : > { %1551 = vmatprep.subr.bf16.mxu0 %v1550_v42  ;;  %v322_v15 = vld [vmem:[%s2358_s1 + $0x70] sm:$0xff]  ;;  %v323_v16 = vld [vmem:[%s2358_s1 + $0x78] sm:$0xff]  ;;  %v1594_v17 = vpack.c.bf16 %v355_v13, %v354_v12  ;;  %v1190_v22 = vld [vmem:[%s2358_s1 + $0x288] sm:$0xff] }
  0x17   : > { %1581 = vmatpush3.bf16.msra.mxu1 %v1578_v37  ;;  %v1957_v18 = vld [vmem:[%s1868_s10 + $0x10] sm:$0xff]  ;;  %v1564_v19 = vpack.c.bf16 %v323_v16, %v322_v15  ;;  %v1960_v20 = vld [vmem:[%s1868_s10 + $0x18] sm:$0xff]  ;;  %v1972_v26 = vld [vmem:[%s1868_s10 + $0x20] sm:$0xff]  ;;  %v1630_v27 = vpack.c.bf16 %v1190_v22, %v1189_v21 }
  0x18   : > { %1583 = vmatprep.subr.bf16.mxu1 %v1582_v47  ;;  %v277_v24 = vrot.slane %v1957_v18, 1  ;;  %v278_v25 = vrot.slane %v1960_v20, 1  ;;  %v1975_v28 = vld [vmem:[%s1868_s10 + $0x28] sm:$0xff]  ;;  %v1191_v29 = vld [vmem:[%s2358_s1 + $0x290] sm:$0xff]  ;;  %v1192_v30 = vld [vmem:[%s2358_s1 + $0x298] sm:$0xff]  ;;  %v235_v32 = vrot.slane %v1957_v18, 7 }
  0x19   : > { %1553 = vmatpush3.bf16.msra.mxu0 %v1552_v50  ;;  %v279_v34 = vrot.slane %v1972_v26, 1  ;;  %v280_v36 = vrot.slane %v1975_v28, 1  ;;  %v1994_v37 = vld [vmem:[%s1868_s10 + $0x30] sm:$0xff]  ;;  %v1634_v39 = vpack.c.bf16 %v1192_v30, %v1191_v29  ;;  %v236_v41 = vrot.slane %v1960_v20, 7  ;;  %v1193_v62 = vld [vmem:[%s2358_s1 + $0x2a0] sm:$0xff]  ;;  %v1194_v63 = vld [vmem:[%s2358_s1 + $0x2a8] sm:$0xff] }
  0x1a   : > { %1555 = vmatprep.subr.bf16.mxu0 %v1554_v57  ;;  %v289_v33 = vsel %vm283_vm1, %v276_v60, %v277_v24  ;;  %v288_v35 = vsel %vm283_vm1, %v277_v24, %v278_v25  ;;  %v249_v40 = vsel %vm243_vm0, %v234_v23, %v235_v32  ;;  %v281_v43 = vrot.slane %v1994_v37, 1  ;;  %v1196_v1 = vld [vmem:[%s2358_s1 + $0x2b8] sm:$0xff]  ;;  %v1197_v3 = vld [vmem:[%s2358_s1 + $0x2c0] sm:$0xff]  ;;  %v1198_v4 = vld [vmem:[%s2358_s1 + $0x2c8] sm:$0xff] }
  0x1b   : > { %1585 = vmatpush3.bf16.msra.mxu1 %v1582_v47  ;;  %v287_v42 = vsel %vm283_vm1, %v278_v25, %v279_v34  ;;  %v286_v44 = vsel %vm283_vm1, %v279_v34, %v280_v36  ;;  %v248_v46 = vsel %vm243_vm0, %v235_v32, %v236_v41  ;;  %v237_v47 = vrot.slane %v1972_v26, 7  ;;  %v1199_v6 = vld [vmem:[%s2358_s1 + $0x2d0] sm:$0xff]  ;;  %v1200_v7 = vld [vmem:[%s2358_s1 + $0x2d8] sm:$0xff]  ;;  %v1173_v8 = vld [vmem:[%s2358_s1 + $0x200] sm:$0xff] }
  0x1c   : > { %1587 = vmatprep.subr.bf16.mxu1 %v1586_v0  ;;  %v285_v50 = vsel %vm283_vm1, %v280_v36, %v281_v43  ;;  %v284_v52 = vsel %vm283_vm1, %v281_v43, %v282_v45  ;;  %v238_v57 = vrot.slane %v1975_v28, 7  ;;  %v239_v60 = vrot.slane %v1994_v37, 7  ;;  %v1174_v9 = vld [vmem:[%s2358_s1 + $0x208] sm:$0xff]  ;;  %v1157_v12 = vld [vmem:[%s2358_s1 + $0x180] sm:$0xff]  ;;  %v1159_v23 = vld [vmem:[%s2358_s1 + $0x190] sm:$0xff] }
  0x1d   : > { %1557 = vmatpush3.bf16.msra.mxu0 %v1556_v2  ;;  %v247_v53 = vsel %vm243_vm0, %v236_v41, %v237_v47  ;;  %v1158_v13 = vld [vmem:[%s2358_s1 + $0x188] sm:$0xff]  ;;  %v1201_v15 = vld [vmem:[%s2358_s1 + $0x2e0] sm:$0xff]  ;;  %v1160_v24 = vld [vmem:[%s2358_s1 + $0x198] sm:$0xff] }
  0x1e   : > { %1559 = vmatprep.subr.bf16.mxu0 %v1558_v5  ;;  %v246_v59 = vsel %vm243_vm0, %v237_v47, %v238_v57  ;;  %v245_v61 = vsel %vm243_vm0, %v238_v57, %v239_v60  ;;  %v244_v56 = vsel %vm243_vm0, %v239_v60, %v240_v54  ;;  %v1195_v54 = vld [vmem:[%s2358_s1 + $0x2b0] sm:$0xff]  ;;  %v1646_v5 = vpack.c.bf16 %v1198_v4, %v1197_v3  ;;  %v1202_v16 = vld [vmem:[%s2358_s1 + $0x2e8] sm:$0xff]  ;;  %v1204_v29 = vld [vmem:[%s2358_s1 + $0x2f8] sm:$0xff] }
  0x1f   : > { %1589 = vmatpush3.bf16.msra.mxu1 %v1586_v0  ;;  %v1638_v0 = vpack.c.bf16 %v1194_v63, %v1193_v62  ;;  %v1642_v2 = vpack.c.bf16 %v1196_v1, %v1195_v54  ;;  %v1654_v21 = vpack.c.bf16 %v1202_v16, %v1201_v15  ;;  %v1604_v25 = vpack.c.bf16 %v1160_v24, %v1159_v23  ;;  %v1177_v30 = vld [vmem:[%s2358_s1 + $0x220] sm:$0xff]  ;;  %v1164_v43 = vld [vmem:[%s2358_s1 + $0x1b8] sm:$0xff]  ;;  %v1183_v57 = vld [vmem:[%s2358_s1 + $0x250] sm:$0xff] }
  0x20   : > { %1591 = vmatprep.subr.bf16.mxu1 %v1590_v10  ;;  %v1161_v34 = vld [vmem:[%s2358_s1 + $0x1a0] sm:$0xff]  ;;  %v1167_v60 = vld [vmem:[%s2358_s1 + $0x1d0] sm:$0xff]  ;;  %v1186_v63 = vld [vmem:[%s2358_s1 + $0x268] sm:$0xff] }
  0x21   : > { %1561 = vmatpush3.bf16.msra.mxu0 %v1560_v11  ;;  %v1598_v11 = vpack.c.bf16 %v1174_v9, %v1173_v8  ;;  %v1181_v45 = vld [vmem:[%s2358_s1 + $0x240] sm:$0xff]  ;;  %v1170_v1 = vld [vmem:[%s2358_s1 + $0x1e8] sm:$0xff]  ;;  %v1187_v3 = vld [vmem:[%s2358_s1 + $0x270] sm:$0xff] }
  0x22   : > { %1563 = vmatprep.subr.bf16.mxu0 %v1562_v14  ;;  %v1600_v14 = vpack.c.bf16 %v1158_v13, %v1157_v12  ;;  %v1185_v62 = vld [vmem:[%s2358_s1 + $0x260] sm:$0xff]  ;;  %v1188_v4 = vld [vmem:[%s2358_s1 + $0x278] sm:$0xff]  ;;  %v954_v38 = vld [vmem:[%s2360_s3 + $0x10] sm:$0xff] }
  0x23   : > { %1593 = vmatpush3.bf16.msra.mxu1 %v1590_v10  ;;  %v1650_v10 = vpack.c.bf16 %v1200_v7, %v1199_v6  ;;  %v1169_v54 = vld [vmem:[%s2358_s1 + $0x1e0] sm:$0xff]  ;;  %v1171_v6 = vld [vmem:[%s2358_s1 + $0x1f0] sm:$0xff]  ;;  %v1172_v7 = vld [vmem:[%s2358_s1 + $0x1f8] sm:$0xff] }
  0x24   : > { %1595 = vmatprep.subr.bf16.mxu1 %v1594_v17  ;;  %v1628_v8 = vpack.c.bf16 %v1172_v7, %v1171_v6 }
  0x25   : > { %1565 = vmatpush3.bf16.msra.mxu0 %v1564_v19  ;;  %v1176_v19 = vld [vmem:[%s2358_s1 + $0x218] sm:$0xff] }
  0x26   : > { %1599 = vmatprep.subr.bf16.mxu0 %v1598_v11  ;;  %v2176_v11 = vld [vmem:[%s2359_s2] ss:$0 sm:$0xff] }
  0x27   : > { %1597 = vmatpush3.bf16.msra.mxu1 %v1594_v17  ;;  %v1175_v17 = vld [vmem:[%s2358_s1 + $0x210] sm:$0xff] }
  0x28   : > { %428 = vmatmul.mubr.f32.vlgmr.msra.gmra.mrb[0].mxu0 %v1883_v48  ;;  %1631 = vmatprep.subr.bf16.mxu1 %v1630_v27  ;;  %v1602_v22 = vpack.c.bf16 %v1176_v19, %v1175_v17 }
  0x29   : > { %432 = vmatprep.mubr.f32.mxu0 %v250_v31  ;;  %1601 = vmatpush3.bf16.msra.mxu0 %v1600_v14  ;;  %v1178_v31 = vld [vmem:[%s2358_s1 + $0x228] sm:$0xff] }
  0x2a   : > { %1435 = vmatmul.mubr.f32.vlgmr.msra.gmra.mrb[0].mxu1 %v289_v33  ;;  %1603 = vmatprep.subr.bf16.mxu0 %v1602_v22  ;;  %v1606_v33 = vpack.c.bf16 %v1178_v31, %v1177_v30 }
  0x2b   : > { %1437 = vmatprep.mubr.f32.mxu1 %v288_v35  ;;  %1633 = vmatpush3.bf16.msra.mxu1 %v1630_v27  ;;  %v1203_v27 = vld [vmem:[%s2358_s1 + $0x2f0] sm:$0xff]  ;;  %v1162_v35 = vld [vmem:[%s2358_s1 + $0x1a8] sm:$0xff] }
  0x2c   : > { %433 = vmatmul.mubr.f32.gmra.mrb[2].mxu0 %v1900_v55  ;;  %1635 = vmatprep.subr.bf16.mxu1 %v1634_v39  ;;  %v1658_v32 = vpack.c.bf16 %v1204_v29, %v1203_v27  ;;  %v1608_v36 = vpack.c.bf16 %v1162_v35, %v1161_v34 }
  0x2d   : > { %437 = vmatprep.mubr.f32.mxu0 %v249_v40  ;;  %1605 = vmatpush3.bf16.msra.mxu0 %v1604_v25  ;;  %v1180_v40 = vld [vmem:[%s2358_s1 + $0x238] sm:$0xff] }
  0x2e   : > { %1438 = vmatmul.mubr.f32.gmra.mrb[2].mxu1 %v287_v42  ;;  %1607 = vmatprep.subr.bf16.mxu0 %v1606_v33  ;;  %v1163_v42 = vld [vmem:[%s2358_s1 + $0x1b0] sm:$0xff] }
  0x2f   : > { %1440 = vmatprep.mubr.f32.mxu1 %v286_v44  ;;  %1637 = vmatpush3.bf16.msra.mxu1 %v1634_v39  ;;  %v1179_v39 = vld [vmem:[%s2358_s1 + $0x230] sm:$0xff]  ;;  %v1612_v44 = vpack.c.bf16 %v1164_v43, %v1163_v42 }
  0x30   : > { %438 = vmatmul.mubr.f32.gmra.mrb[4].mxu0 %v1957_v18  ;;  %1639 = vmatprep.subr.bf16.mxu1 %v1638_v0  ;;  %v1610_v41 = vpack.c.bf16 %v1180_v40, %v1179_v39 }
  0x31   : > { %442 = vmatprep.mubr.f32.mxu0 %v248_v46  ;;  %1609 = vmatpush3.bf16.msra.mxu0 %v1608_v36  ;;  %v1182_v46 = vld [vmem:[%s2358_s1 + $0x248] sm:$0xff] }
  0x32   : > { %1441 = vmatmul.mubr.f32.gmra.mrb[4].mxu1 %v285_v50  ;;  %1611 = vmatprep.subr.bf16.mxu0 %v1610_v41  ;;  %v1614_v47 = vpack.c.bf16 %v1182_v46, %v1181_v45  ;;  %v1165_v50 = vld [vmem:[%s2358_s1 + $0x1c0] sm:$0xff] }
  0x33   : > { %1443 = vmatprep.mubr.f32.mxu1 %v284_v52  ;;  %1641 = vmatpush3.bf16.msra.mxu1 %v1638_v0  ;;  %v1166_v52 = vld [vmem:[%s2358_s1 + $0x1c8] sm:$0xff]  ;;  %v1622_v0 = vpack.c.bf16 %v1186_v63, %v1185_v62 }
  0x34   : > { %443 = vmatmul.mubr.f32.gmra.mrb[6].mxu0 %v1960_v20  ;;  %1643 = vmatprep.subr.bf16.mxu1 %v1642_v2 }
  0x35   : > { %447 = vmatprep.mubr.f32.mxu0 %v247_v53  ;;  %1613 = vmatpush3.bf16.msra.mxu0 %v1612_v44  ;;  %v1616_v53 = vpack.c.bf16 %v1166_v52, %v1165_v50 }
  0x36   : > { %1444 = vmatmul.mubr.msk.f32.gmra.mrb[6].mxu1 %vm1217_vm3, %v291_v58  ;;  %1615 = vmatprep.subr.bf16.mxu0 %v1614_v47  ;;  %v1184_v58 = vld [vmem:[%s2358_s1 + $0x258] sm:$0xff] }
  0x37   : > { %1645 = vmatpush3.bf16.msra.mxu1 %v1642_v2  ;;  %v1624_v2 = vpack.c.bf16 %v1170_v1, %v1169_v54 }
  0x38   : > { %448 = vmatmul.mubr.f32.gmra.mrb[8].mxu0 %v1972_v26  ;;  %1647 = vmatprep.subr.bf16.mxu1 %v1646_v5 }
  0x39   : > { %452 = vmatprep.mubr.f32.mxu0 %v246_v59  ;;  %1617 = vmatpush3.bf16.msra.mxu0 %v1616_v53  ;;  %v1618_v59 = vpack.c.bf16 %v1184_v58, %v1183_v57 }
  0x3b   : > { %1649 = vmatpush3.bf16.msra.mxu1 %v1646_v5  ;;  %1619 = vmatprep.subr.bf16.mxu0 %v1618_v59  ;;  %v1626_v5 = vpack.c.bf16 %v1188_v4, %v1187_v3 }
  0x3c   : > { %453 = vmatmul.mubr.f32.gmra.mrb[10].mxu0 %v1975_v28  ;;  %1651 = vmatprep.subr.bf16.mxu1 %v1650_v10 }
  0x3d   : > { %457 = vmatprep.mubr.f32.mxu0 %v245_v61  ;;  %v1168_v61 = vld [vmem:[%s2358_s1 + $0x1d8] sm:$0xff] }
  0x3f   : > { %1653 = vmatpush3.bf16.msra.mxu1 %v1650_v10 }
  0x40   : > { %458 = vmatmul.mubr.f32.gmra.mrb[12].mxu0 %v1994_v37  ;;  %1655 = vmatprep.subr.bf16.mxu1 %v1654_v21 }
  0x41   : > { %462 = vmatprep.mubr.f32.mxu0 %v244_v56  ;;  %v1620_v56 = vpack.c.bf16 %v1168_v61, %v1167_v60 }
  0x43   : > { %1657 = vmatpush3.bf16.msra.mxu1 %v1654_v21  ;;  %1621 = vmatpush3.bf16.msra.mxu0 %v1620_v56 }
  0x44   : > { %463 = vmatmul.mubr.f32.gmra.mrb[14].mxu0 %v1886_v49  ;;  %1659 = vmatprep.subr.bf16.mxu1 %v1658_v32 }
  0x45   : > { %1623 = vmatprep.subr.bf16.mxu0 %v1622_v0 }
  0x47   : > { %1661 = vmatpush3.bf16.msra.mxu1 %v1658_v32  ;;  %1625 = vmatpush3.bf16.msra.mxu0 %v1624_v2 }
  0x48   : > { %1627 = vmatprep.subr.bf16.mxu0 %v1626_v5 }
  0x4b   : > { %1629 = vmatpush3.bf16.msra.mxu0 %v1628_v8 }
  0xfb   : > { %v1250_v9 = vpop.f32.mrb[0].mxu0 }
  0xfc   : > { %v1251_v10 = vpop.f32.mrb[1].mxu0 }
  0xfd   : > { %v1252_v12 = vadd.f32 %v1251_v10, %v1250_v9  ;;  %v1436_v13 = vpop.f32.mrb[0].mxu1 }
  0xfe   : > { %v534_v14 = vpop.f32.mrb[1].mxu1 }
  0xff   : > { %v1253_v15 = vpop.f32.mrb[2].mxu0  ;;  %v430_v16 = vadd.f32 %v1252_v12, %v2176_v11 }
 0x100   : > { %v1254_v17 = vpop.f32.mrb[3].mxu0 }
 0x101   : > { %v1255_v19 = vadd.f32 %v1254_v17, %v1253_v15  ;;  %v535_v21 = vadd.f32 %v534_v14, %v430_v16  ;;  %v1439_v22 = vpop.f32.mrb[2].mxu1 }
 0x102   : > { %v544_v23 = vpop.f32.mrb[3].mxu1 }
 0x103   : > { %v435_v24 = vadd.f32 %v1255_v19, %v2176_v11  ;;  %v573_v25 = vadd.f32 %v535_v21, %v1883_v48  ;;  %v1256_v27 = vpop.f32.mrb[4].mxu0 }
 0x104   : > { %v1257_v29 = vpop.f32.mrb[5].mxu0 }
 0x105   : > { %v540_v30 = vadd.f32 %v1436_v13, %v435_v24  ;;  %vm581_vm4 = vcmp.ge.f32.partialorder %v573_v25, 0.0  ;;  %v589_v31 = vmul.f32 0.2, %v573_v25  ;;  %v1258_v32 = vadd.f32 %v1257_v29, %v1256_v27  ;;  %v1442_v33 = vpop.f32.mrb[4].mxu1 }
 0x106   : > { %v554_v34 = vpop.f32.mrb[5].mxu1 }
 0x107   : > { %v574_v35 = vadd.f32 %v540_v30, %v1900_v55  ;;  %v1259_v36 = vpop.f32.mrb[6].mxu0  ;;  %v440_v39 = vadd.f32 %v1258_v32, %v2176_v11  ;;  %v2183_v40 = vsel %vm581_vm4, %v573_v25, %v589_v31 }
 0x108   : > { %v1260_v41 = vpop.f32.mrb[7].mxu0  ;;  %v629_v53 = vrot.slane %v2183_v40, 1 }
 0x109   : > { %vm582_vm5 = vcmp.ge.f32.partialorder %v574_v35, 0.0  ;;  %v590_v42 = vmul.f32 0.2, %v574_v35  ;;  %v1261_v43 = vadd.f32 %v1260_v41, %v1259_v36  ;;  %v545_v48 = vadd.f32 %v544_v23, %v440_v39  ;;  %v1445_v44 = vpop.f32.mrb[6].mxu1 }
 0x10a   : > { %v564_v45 = vpop.f32.mrb[7].mxu1  ;;  %v605_v41 = vrot.slane %v2183_v40, 7 }
 0x10b   : > { %v445_v46 = vadd.f32 %v1261_v43, %v2176_v11  ;;  %v575_v47 = vadd.f32 %v545_v48, %v1957_v18  ;;  %v1262_v50 = vpop.f32.mrb[8].mxu0  ;;  %v2187_v52 = vsel %vm582_vm5, %v574_v35, %v590_v42 }
 0x10c   : > { %v1263_v55 = vpop.f32.mrb[9].mxu0  ;;  %v630_v57 = vrot.slane %v2187_v52, 1 }
 0x10d   : > { %v550_v58 = vadd.f32 %v1439_v22, %v445_v46  ;;  %vm583_vm6 = vcmp.ge.f32.partialorder %v575_v47, 0.0  ;;  %v591_v59 = vmul.f32 0.2, %v575_v47  ;;  %v1264_v60 = vadd.f32 %v1263_v55, %v1262_v50 }
 0x10e   : > { %v643_v61 = vsel %vm283_vm1, %v629_v53, %v630_v57 }
 0x10f   : > { %v576_v56 = vadd.f32 %v550_v58, %v1960_v20  ;;  %v2196_v18 = vsel %vm583_vm6, %v575_v47, %v591_v59  ;;  %v1265_v62 = vpop.f32.mrb[10].mxu0  ;;  %1478 = vmatprep.mubr.f32.mxu1 %v643_v61  ;;  %v450_v63 = vadd.f32 %v1264_v60, %v2176_v11 }
 0x110   : > { %v1266_v0 = vpop.f32.mrb[11].mxu0  ;;  %v631_v54 = vrot.slane %v2196_v18, 1  ;;  %v607_v47 = vrot.slane %v2196_v18, 7 }
 0x111   : > { %vm584_vm7 = vcmp.ge.f32.partialorder %v576_v56, 0.0  ;;  %v592_v1 = vmul.f32 0.2, %v576_v56  ;;  %v1267_v2 = vadd.f32 %v1266_v0, %v1265_v62  ;;  %v555_v3 = vadd.f32 %v554_v34, %v450_v63  ;;  %v952_v62 = vld [vmem:[%s2360_s3] sm:$0xff]  ;;  %v953_v63 = vld [vmem:[%s2360_s3 + $0x8] sm:$0xff] }
 0x112   : > { %v642_v4 = vsel %vm283_vm1, %v630_v57, %v631_v54  ;;  %v1662_v0 = vpack.c.bf16 %v953_v63, %v952_v62 }
 0x113   : > { %v455_v5 = vadd.f32 %v1267_v2, %v2176_v11  ;;  %v577_v20 = vadd.f32 %v555_v3, %v1972_v26  ;;  %v1268_v6 = vpop.f32.mrb[12].mxu0  ;;  %1479 = vmatmul.mubr.f32.vlgmr.msra.gmra.mrb[8].mxu1 %v642_v4  ;;  %v2204_v7 = vsel %vm584_vm7, %v576_v56, %v592_v1  ;;  %v956_v2 = vld [vmem:[%s2360_s3 + $0x20] sm:$0xff]  ;;  %v957_v3 = vld [vmem:[%s2360_s3 + $0x28] sm:$0xff] }
 0x114   : > { %v1269_v8 = vpop.f32.mrb[13].mxu0  ;;  %v632_v9 = vrot.slane %v2204_v7, 1  ;;  %v608_v55 = vrot.slane %v2204_v7, 7  ;;  %1663 = vmatprep.subr.bf16.mxu0 %v1662_v0  ;;  %1694 = vmatprep.subr.bf16.mxu1 %v1662_v0  ;;  %v1670_v4 = vpack.c.bf16 %v957_v3, %v956_v2 }
 0x115   : > { %v560_v10 = vadd.f32 %v1442_v33, %v455_v5  ;;  %vm585_vm8 = vcmp.ge.f32.partialorder %v577_v20, 0.0  ;;  %v593_v12 = vmul.f32 0.2, %v577_v20  ;;  %v1270_v13 = vadd.f32 %v1269_v8, %v1268_v6  ;;  %1702 = vmatpush3.bf16.msra.mxu1 %v1662_v0  ;;  %v958_v5 = vld [vmem:[%s2360_s3 + $0x30] sm:$0xff]  ;;  %v960_v8 = vld [vmem:[%s2360_s3 + $0x40] sm:$0xff] }
 0x116   : > { %v641_v14 = vsel %vm283_vm1, %v631_v54, %v632_v9  ;;  %v617_v51 = vsel %vm243_vm0, %v607_v47, %v608_v55  ;;  %v955_v54 = vld [vmem:[%s2360_s3 + $0x18] sm:$0xff] }
 0x117   : > { %v578_v15 = vadd.f32 %v560_v10, %v1975_v28  ;;  %v2210_v16 = vsel %vm585_vm8, %v577_v20, %v593_v12  ;;  %v1271_v17 = vpop.f32.mrb[14].mxu0  ;;  %1481 = vmatprep.mubr.f32.mxu1 %v641_v14  ;;  %v460_v26 = vadd.f32 %v1270_v13, %v2176_v11  ;;  %v1666_v1 = vpack.c.bf16 %v955_v54, %v954_v38  ;;  %v959_v20 = vld [vmem:[%s2360_s3 + $0x38] sm:$0xff]  ;;  %v962_v12 = vld [vmem:[%s2360_s3 + $0x50] sm:$0xff] }
 0x118   : > { %v1272_v19 = vpop.f32.mrb[15].mxu0  ;;  %v633_v21 = vrot.slane %v2210_v16, 1  ;;  %v1674_v6 = vpack.c.bf16 %v959_v20, %v958_v5  ;;  %v963_v13 = vld [vmem:[%s2360_s3 + $0x58] sm:$0xff] }
 0x119   : > { %vm586_vm9 = vcmp.ge.f32.partialorder %v578_v15, 0.0  ;;  %v594_v22 = vmul.f32 0.2, %v578_v15  ;;  %v1273_v23 = vadd.f32 %v1272_v19, %v1271_v17  ;;  %v565_v24 = vadd.f32 %v564_v45, %v460_v26  ;;  %1695 = vmatprep.subr.bf16.mxu1 %v1666_v1  ;;  %v965_v17 = vld [vmem:[%s2360_s3 + $0x68] sm:$0xff]  ;;  %v966_v19 = vld [vmem:[%s2360_s3 + $0x70] sm:$0xff] }
 0x11a   : > { %v640_v25 = vsel %vm283_vm1, %v632_v9, %v633_v21  ;;  %1703 = vmatpush3.bf16.msra.mxu1 %v1666_v1  ;;  %v961_v9 = vld [vmem:[%s2360_s3 + $0x48] sm:$0xff]  ;;  %v1682_v14 = vpack.c.bf16 %v963_v13, %v962_v12 }
 0x11b   : > { %v465_v27 = vadd.f32 %v1273_v23, %v2176_v11  ;;  %v579_v28 = vadd.f32 %v565_v24, %v1994_v37  ;;  %1482 = vmatmul.mubr.f32.gmra.mrb[10].mxu1 %v640_v25  ;;  %v2218_v29 = vsel %vm586_vm9, %v578_v15, %v594_v22  ;;  %1696 = vmatprep.subr.bf16.mxu1 %v1670_v4  ;;  %v964_v15 = vld [vmem:[%s2360_s3 + $0x60] sm:$0xff] }
 0x11c   : > { %v634_v30 = vrot.slane %v2218_v29, 1  ;;  %v610_v58 = vrot.slane %v2218_v29, 7  ;;  %v1678_v10 = vpack.c.bf16 %v961_v9, %v960_v8  ;;  %v1686_v26 = vpack.c.bf16 %v965_v17, %v964_v15 }
 0x11d   : > { %v570_v31 = vadd.f32 %v1445_v44, %v465_v27  ;;  %vm587_vm10 = vcmp.ge.f32.partialorder %v579_v28, 0.0  ;;  %v595_v32 = vmul.f32 0.2, %v579_v28 }
 0x11e   : > { %v639_v33 = vsel %vm283_vm1, %v633_v21, %v634_v30  ;;  %1704 = vmatpush3.bf16.msra.mxu1 %v1670_v4  ;;  %v967_v21 = vld [vmem:[%s2360_s3 + $0x78] sm:$0xff] }
 0x11f   : > { %v580_v34 = vadd.f32 %v570_v31, %v1886_v49  ;;  %v2224_v35 = vsel %vm587_vm10, %v579_v28, %v595_v32  ;;  %1484 = vmatprep.mubr.f32.mxu1 %v639_v33  ;;  %v606_v49 = vrot.slane %v2187_v52, 7  ;;  %1697 = vmatprep.subr.bf16.mxu1 %v1674_v6  ;;  %v1690_v22 = vpack.c.bf16 %v967_v21, %v966_v19  ;;  %v2327_v33 = vld [vmem:[%s2359_s2 + $0x1] ss:$0 sm:$0xff] }
 0x120   : > { %v635_v11 = vrot.slane %v2224_v35, 1  ;;  %v611_v60 = vrot.slane %v2224_v35, 7 }
 0x121   : > { %vm588_vm11 = vcmp.ge.f32.partialorder %v580_v34, 0.0  ;;  %v596_v37 = vmul.f32 0.2, %v580_v34  ;;  %v619_v46 = vsel %vm243_vm0, %v605_v41, %v606_v49  ;;  %v618_v50 = vsel %vm243_vm0, %v606_v49, %v607_v47 }
 0x122   : > { %v638_v36 = vsel %vm283_vm1, %v634_v30, %v635_v11  ;;  %v614_v61 = vsel %vm243_vm0, %v610_v58, %v611_v60  ;;  %1705 = vmatpush3.bf16.msra.mxu1 %v1674_v6 }
 0x123   : > { %v2229_v39 = vsel %vm588_vm11, %v580_v34, %v596_v37  ;;  %1485 = vmatmul.mubr.f32.gmra.mrb[12].mxu1 %v638_v36  ;;  %1698 = vmatprep.subr.bf16.mxu1 %v1678_v10 }
 0x124   : > { %v612_v42 = vrot.slane %v2229_v39, 7  ;;  %v636_v43 = vrot.slane %v2229_v39, 1 }
 0x126   : > { %v620_v48 = vsel %vm243_vm0, %v612_v42, %v605_v41  ;;  %v637_v44 = vsel %vm283_vm1, %v635_v11, %v636_v43  ;;  %v644_v45 = vsel %vm283_vm1, %v636_v43, %v629_v53  ;;  %v609_v53 = vrot.slane %v2210_v16, 7  ;;  %1706 = vmatpush3.bf16.msra.mxu1 %v1678_v10 }
 0x127   : > { %1208 = vmatprep.mubr.msk.f32.mxu0 %vm1216_vm2, %v620_v48  ;;  %1487 = vmatprep.mubr.f32.mxu1 %v637_v44  ;;  %v613_v56 = vsel %vm243_vm0, %v611_v60, %v612_v42 }
 0x128   : > { %775 = vmatmul.mubr.f32.vlgmr.msra.gmra.mrb[16].mxu0 %v2183_v40  ;;  %1488 = vmatmul.mubr.msk.f32.gmra.mrb[14].mxu1 %vm1217_vm3, %v644_v45  ;;  %v616_v57 = vsel %vm243_vm0, %v608_v55, %v609_v53  ;;  %v615_v59 = vsel %vm243_vm0, %v609_v53, %v610_v58 }
 0x129   : > { %779 = vmatprep.mubr.f32.mxu0 %v619_v46  ;;  %1665 = vmatpush3.bf16.msra.mxu0 %v1662_v0 }
 0x12a   : > { %1667 = vmatprep.subr.bf16.mxu0 %v1666_v1  ;;  %1699 = vmatprep.subr.bf16.mxu1 %v1682_v14 }
 0x12b   : > { %1707 = vmatpush3.bf16.msra.mxu1 %v1682_v14 }
 0x12c   : > { %780 = vmatmul.mubr.f32.gmra.mrb[18].mxu0 %v2187_v52  ;;  %1700 = vmatprep.subr.bf16.mxu1 %v1686_v26 }
 0x12d   : > { %784 = vmatprep.mubr.f32.mxu0 %v618_v50  ;;  %1669 = vmatpush3.bf16.msra.mxu0 %v1666_v1 }
 0x12e   : > { %1671 = vmatprep.subr.bf16.mxu0 %v1670_v4 }
 0x12f   : > { %1708 = vmatpush3.bf16.msra.mxu1 %v1686_v26 }
 0x130   : > { %785 = vmatmul.mubr.f32.gmra.mrb[20].mxu0 %v2196_v18  ;;  %1701 = vmatprep.subr.bf16.mxu1 %v1690_v22 }
 0x131   : > { %789 = vmatprep.mubr.f32.mxu0 %v617_v51  ;;  %1673 = vmatpush3.bf16.msra.mxu0 %v1670_v4 }
 0x132   : > { %1675 = vmatprep.subr.bf16.mxu0 %v1674_v6 }
 0x133   : > { %1709 = vmatpush3.bf16.msra.mxu1 %v1690_v22 }
 0x134   : > { %790 = vmatmul.mubr.f32.gmra.mrb[22].mxu0 %v2204_v7 }
 0x135   : > { %794 = vmatprep.mubr.f32.mxu0 %v616_v57  ;;  %1677 = vmatpush3.bf16.msra.mxu0 %v1674_v6 }
 0x136   : > { %1679 = vmatprep.subr.bf16.mxu0 %v1678_v10 }
 0x138   : > { %795 = vmatmul.mubr.f32.gmra.mrb[24].mxu0 %v2210_v16 }
 0x139   : > { %799 = vmatprep.mubr.f32.mxu0 %v615_v59  ;;  %1681 = vmatpush3.bf16.msra.mxu0 %v1678_v10 }
 0x13a   : > { %1683 = vmatprep.subr.bf16.mxu0 %v1682_v14 }
 0x13c   : > { %800 = vmatmul.mubr.f32.gmra.mrb[26].mxu0 %v2218_v29 }
 0x13d   : > { %804 = vmatprep.mubr.f32.mxu0 %v614_v61  ;;  %1685 = vmatpush3.bf16.msra.mxu0 %v1682_v14 }
 0x13e   : > { %1687 = vmatprep.subr.bf16.mxu0 %v1686_v26 }
 0x140   : > { %805 = vmatmul.mubr.f32.gmra.mrb[28].mxu0 %v2224_v35 }
 0x141   : > { %809 = vmatprep.mubr.f32.mxu0 %v613_v56  ;;  %1689 = vmatpush3.bf16.msra.mxu0 %v1686_v26 }
 0x142   : > { %1691 = vmatprep.subr.bf16.mxu0 %v1690_v22 }
 0x144   : > { %810 = vmatmul.mubr.f32.gmra.mrb[30].mxu0 %v2229_v39 }
 0x145   : > { %1693 = vmatpush3.bf16.msra.mxu0 %v1690_v22 }
 0x1e6   : > { %v1480_v23 = vpop.f32.mrb[8].mxu1 }
 0x1e7   : > { %v881_v24 = vpop.f32.mrb[9].mxu1 }
 0x1ee   : > { %v1483_v25 = vpop.f32.mrb[10].mxu1 }
 0x1ef   : > { %v891_v27 = vpop.f32.mrb[11].mxu1 }
 0x1f6   : > { %v1486_v28 = vpop.f32.mrb[12].mxu1 }
 0x1f7   : > { %v901_v30 = vpop.f32.mrb[13].mxu1 }
 0x1fb   : > { %v1330_v31 = vpop.f32.mrb[16].mxu0  ;;  %v2322_v32 = vpop.f32.mrb[14].mxu1 }
 0x1fc   : > { %v1331_v34 = vpop.f32.mrb[17].mxu0  ;;  %v911_v11 = vpop.f32.mrb[15].mxu1 }
 0x1fd   : > { %v1332_v37 = vadd.f32 %v1331_v34, %v1330_v31 }
 0x1ff   : > { %v777_v36 = vadd.f32 %v1332_v37, %v2327_v33  ;;  %v1333_v41 = vpop.f32.mrb[18].mxu0 }
 0x200   : > { %v1334_v42 = vpop.f32.mrb[19].mxu0 }
 0x201   : > { %v882_v43 = vadd.f32 %v881_v24, %v777_v36  ;;  %v1335_v49 = vadd.f32 %v1334_v42, %v1333_v41 }
 0x203   : > { %v782_v48 = vadd.f32 %v1335_v49, %v2327_v33  ;;  %v1336_v44 = vpop.f32.mrb[20].mxu0  ;;  %v920_v45 = vadd.f32 %v882_v43, %v2183_v40 }
 0x204   : > { %v1337_v46 = vpop.f32.mrb[21].mxu0 }
 0x205   : > { %v887_v47 = vadd.f32 %v1480_v23, %v782_v48  ;;  %v1338_v50 = vadd.f32 %v1337_v46, %v1336_v44  ;;  %vm928_vm12 = vcmp.ge.f32.partialorder %v920_v45, 0.0  ;;  %v936_v55 = vmul.f32 0.2, %v920_v45 }
 0x207   : > { %v921_v51 = vadd.f32 %v887_v47, %v2187_v52  ;;  %v787_v53 = vadd.f32 %v1338_v50, %v2327_v33  ;;  %v1339_v57 = vpop.f32.mrb[22].mxu0  ;;  %v944_v58 = vsel %vm928_vm12, %v920_v45, %v936_v55 }
 0x208   : > { %v1340_v59 = vpop.f32.mrb[23].mxu0  ;;  %1522 = vmatprep.mubr.f32.mxu0 %v944_v58 }
 0x209   : > { %v892_v60 = vadd.f32 %v891_v27, %v787_v53  ;;  %v1341_v61 = vadd.f32 %v1340_v59, %v1339_v57  ;;  %vm929_vm13 = vcmp.ge.f32.partialorder %v921_v51, 0.0  ;;  %v937_v56 = vmul.f32 0.2, %v921_v51 }
 0x20b   : > { %v792_v62 = vadd.f32 %v1341_v61, %v2327_v33  ;;  %v1342_v40 = vpop.f32.mrb[24].mxu0  ;;  %v945_v63 = vsel %vm929_vm13, %v921_v51, %v937_v56  ;;  %v922_v0 = vadd.f32 %v892_v60, %v2196_v18 }
 0x20c   : > { %v1343_v38 = vpop.f32.mrb[25].mxu0  ;;  %1523 = vmatmul.mubr.f32.vlgmr.msra.gmra.mrb[32].mxu0 %v945_v63 }
 0x20d   : > { %v897_v54 = vadd.f32 %v1483_v25, %v792_v62  ;;  %v1344_v52 = vadd.f32 %v1343_v38, %v1342_v40  ;;  %vm930_vm14 = vcmp.ge.f32.partialorder %v922_v0, 0.0  ;;  %v938_v1 = vmul.f32 0.2, %v922_v0 }
 0x20f   : > { %v797_v2 = vadd.f32 %v1344_v52, %v2327_v33  ;;  %v1345_v3 = vpop.f32.mrb[26].mxu0  ;;  %v946_v4 = vsel %vm930_vm14, %v922_v0, %v938_v1  ;;  %v923_v5 = vadd.f32 %v897_v54, %v2204_v7 }
 0x210   : > { %v1346_v20 = vpop.f32.mrb[27].mxu0  ;;  %1525 = vmatprep.mubr.f32.mxu0 %v946_v4 }
 0x211   : > { %v902_v6 = vadd.f32 %v901_v30, %v797_v2  ;;  %v1347_v8 = vadd.f32 %v1346_v20, %v1345_v3  ;;  %vm931_vm15 = vcmp.ge.f32.partialorder %v923_v5, 0.0  ;;  %v939_v9 = vmul.f32 0.2, %v923_v5 }
 0x213   : > { %v802_v18 = vadd.f32 %v1347_v8, %v2327_v33  ;;  %v1348_v10 = vpop.f32.mrb[28].mxu0  ;;  %v947_v12 = vsel %vm931_vm15, %v923_v5, %v939_v9  ;;  %v924_v13 = vadd.f32 %v902_v6, %v2210_v16 }
 0x214   : > { %v1349_v14 = vpop.f32.mrb[29].mxu0  ;;  %1526 = vmatmul.mubr.f32.gmra.mrb[34].mxu0 %v947_v12 }
 0x215   : > { %v907_v15 = vadd.f32 %v1486_v28, %v802_v18  ;;  %v1350_v17 = vadd.f32 %v1349_v14, %v1348_v10  ;;  %vm932_vm0 = vcmp.ge.f32.partialorder %v924_v13, 0.0  ;;  %v940_v26 = vmul.f32 0.2, %v924_v13 }
 0x217   : > { %v925_v7 = vadd.f32 %v907_v15, %v2218_v29  ;;  %v807_v19 = vadd.f32 %v1350_v17, %v2327_v33  ;;  %v1351_v21 = vpop.f32.mrb[30].mxu0  ;;  %v948_v22 = vsel %vm932_vm0, %v924_v13, %v940_v26 }
 0x218   : > { %v1352_v23 = vpop.f32.mrb[31].mxu0  ;;  %1528 = vmatprep.mubr.f32.mxu1 %v948_v22 }
 0x219   : > { %v912_v24 = vadd.f32 %v911_v11, %v807_v19  ;;  %v1353_v25 = vadd.f32 %v1352_v23, %v1351_v21  ;;  %vm933_vm1 = vcmp.ge.f32.partialorder %v925_v7, 0.0  ;;  %v941_v27 = vmul.f32 0.2, %v925_v7 }
 0x21b   : > { %v812_v16 = vadd.f32 %v1353_v25, %v2327_v33  ;;  %v949_v30 = vsel %vm933_vm1, %v925_v7, %v941_v27  ;;  %v926_v28 = vadd.f32 %v912_v24, %v2224_v35  ;;  %v1211_v33 = vld [vmem:[%s2361_s4] ss:$0 sm:$0xff] }
 0x21c   : > { %1529 = vmatmul.mubr.f32.vlgmr.msra.gmra.mrb[16].mxu1 %v949_v30 }
 0x21d   : > { %v917_v31 = vadd.f32 %v2322_v32, %v812_v16  ;;  %vm934_vm2 = vcmp.ge.f32.partialorder %v926_v28, 0.0  ;;  %v942_v29 = vmul.f32 0.2, %v926_v28 }
 0x21f   : > { %v950_v34 = vsel %vm934_vm2, %v926_v28, %v942_v29  ;;  %v927_v37 = vadd.f32 %v917_v31, %v2229_v39 }
 0x220   : > { %1531 = vmatprep.mubr.f32.mxu1 %v950_v34 }
 0x221   : > { %vm935_vm3 = vcmp.ge.f32.partialorder %v927_v37, 0.0  ;;  %v943_v11 = vmul.f32 0.2, %v927_v37 }
 0x223   : > { %v951_v36 = vsel %vm935_vm3, %v927_v37, %v943_v11 }
 0x224   : > { %1532 = vmatmul.mubr.f32.gmra.mrb[18].mxu1 %v951_v36 }
 0x2df   : > { %v1524_v35 = vpop.f32.mrb[32].mxu0 }
 0x2e0   : > { %v1047_v32 = vadd.f32 %v1524_v35, %v1211_v33  ;;  %v1041_v41 = vpop.f32.mrb[33].mxu0 }
 0x2e1   : > { %v1042_v42 = vadd.f32 %v1211_v33, %v1041_v41 }
 0x2e2   : > { %1081 = vst [vmem:[%s224_s13 + $0x8] sm:$0xff] %v1047_v32 }
 0x2e3   : > { %1080 = vst [vmem:[%s224_s13] sm:$0xff] %v1042_v42 }
 0x2e7   : > { %v1527_v39 = vpop.f32.mrb[34].mxu0 }
 0x2e8   : > { %v1057_v43 = vadd.f32 %v1527_v39, %v1211_v33  ;;  %v1051_v49 = vpop.f32.mrb[35].mxu0 }
 0x2e9   : > { %v1052_v48 = vadd.f32 %v1211_v33, %v1051_v49 }
 0x2ea   : > { %1083 = vst [vmem:[%s224_s13 + $0x18] sm:$0xff] %v1057_v43 }
 0x2eb   : > { %1082 = vst [vmem:[%s224_s13 + $0x10] sm:$0xff] %v1052_v48 }
 0x2ef   : > { %v1530_v44 = vpop.f32.mrb[16].mxu1 }
 0x2f0   : > { %v1067_v45 = vadd.f32 %v1530_v44, %v1211_v33  ;;  %v1061_v46 = vpop.f32.mrb[17].mxu1 }
 0x2f1   : > { %v1062_v47 = vadd.f32 %v1211_v33, %v1061_v46 }
 0x2f2   : > { %1085 = vst [vmem:[%s224_s13 + $0x28] sm:$0xff] %v1067_v45 }
 0x2f3   : > { %1084 = vst [vmem:[%s224_s13 + $0x20] sm:$0xff] %v1062_v47 }
 0x2f7   : > { %v1533_v50 = vpop.f32.mrb[18].mxu1 }
 0x2f8   : > { %v1077_v55 = vadd.f32 %v1533_v50, %v1211_v33  ;;  %v1071_v51 = vpop.f32.mrb[19].mxu1 }
 0x2f9   : > { %v1072_v53 = vadd.f32 %v1211_v33, %v1071_v51 }
 0x2fa   : > { %1087 = vst [vmem:[%s224_s13 + $0x38] sm:$0xff] %v1077_v55 }
 0x2fb   : > { %1086 = vst [vmem:[%s224_s13 + $0x30] sm:$0xff] %v1072_v53 }
 0x2fc PF: > { %s15_s18 = sadd.s32 1, %s1724_s18  }
 0x2fd   : > { %p12_p4 = scmp.ge.s32.totalorder %s15_s18, 4  }
 0x2ff   :  { %14 = sbr.rel (!%p12_p4) target bundleno = 1 (0x1), region = 72 }

// kernel: decoder_forward.6
= control target key start
LH: loop header
LB: loop body
LE: loop exit
PB: predicated region body
PF: predicated region fallthrough
CT: control target
= control target key end

     0   :  { %s1743_s18 = smov 0   ;;  %s2501_s0 = inlined_call_operand.vmem [shape: f32[2,32,128], index: 0, kind: input, shape index: {}]   ;;  %s2502_s1 = inlined_call_operand.vmem [shape: f32[2,384,128], index: 1, kind: input, shape index: {}]   ;;  %s2503_s2 = inlined_call_operand.vmem [shape: f32[2,1,128], index: 2, kind: input, shape index: {}]   ;;  %s2504_s3 = inlined_call_operand.vmem [shape: f32[384,256], index: 3, kind: input, shape index: {}]   ;;  %s2505_s4 = inlined_call_operand.vmem [shape: f32[1,256], index: 4, kind: input, shape index: {}]   ;;  %s2506_s5 = inlined_call_operand.vmem [shape: f32[2,32,256], index: 5, kind: output, shape index: {}]  }
   0x1 LB: > { %s1173_s19 = sadd.s32 4294967295, %s1710_s18   ;;  %p1177_p0 = scmp.ge.s32.totalorder %s1710_s18, 1  ;;  %s1710_s18 = sphi %s1743_s18, %s15_s18  }
   0x2   : > { %p187_p1 = scmp.lt.s32.totalorder %s1710_s18, 3 }
   0x4   : > { %p188_p2 = pnand %p1177_p0, %p187_p1 }
   0x5   : > { %v284_v0 = vld [vmem:[%s2502_s1 + $0x80] sm:$0xff] (!%p188_p2)  ;;  %v285_v1 = vld [vmem:[%s2502_s1 + $0x88] sm:$0xff] (!%p188_p2)  ;;  %p215_p3 = scmp.lt.s32.totalorder (!%p188_p2), %s1173_s19, 1  ;;  %v286_v5 = vld [vmem:[%s2502_s1 + $0x90] sm:$0xff] (!%p188_p2)  ;;  %v233_v13 = vlaneseq (!%p188_p2) }
   0x6   : > { %191 = sbr.rel (%p188_p2) target bundleno = 821 (0x335), region = 40  ;;  %v268_v2 = vld [vmem:[%s2502_s1] sm:$0xff] (!%p188_p2)  ;;  %v1455_v3 = vpack.c.bf16 (!%p188_p2), %v285_v1, %v284_v0  ;;  %v269_v4 = vld [vmem:[%s2502_s1 + $0x8] sm:$0xff] (!%p188_p2)  ;;  %v287_v6 = vld [vmem:[%s2502_s1 + $0x98] sm:$0xff] (!%p188_p2) }
   0x7   : > { %v1457_v7 = vpack.c.bf16 (!%p188_p2), %v269_v4, %v268_v2  ;;  %v1459_v8 = vpack.c.bf16 (!%p188_p2), %v287_v6, %v286_v5  ;;  %v270_v9 = vld [vmem:[%s2502_s1 + $0x10] sm:$0xff] (!%p188_p2)  ;;  %v271_v10 = vld [vmem:[%s2502_s1 + $0x18] sm:$0xff] (!%p188_p2)  ;;  %v288_v11 = vld [vmem:[%s2502_s1 + $0xa0] sm:$0xff] (!%p188_p2)  ;;  %v1801_v20 = vshrl.u32 (!%p188_p2), %v233_v13, 7 }
   0x8   : > { %1456 = vmatprep.subr.bf16.mxu1 (!%p188_p2), %v1455_v3  ;;  %v289_v12 = vld [vmem:[%s2502_s1 + $0xa8] sm:$0xff] (!%p188_p2)  ;;  %v1461_v14 = vpack.c.bf16 (!%p188_p2), %v271_v10, %v270_v9  ;;  %v272_v16 = vld [vmem:[%s2502_s1 + $0x20] sm:$0xff] (!%p188_p2)  ;;  %v290_v18 = vld [vmem:[%s2502_s1 + $0xb0] sm:$0xff] (!%p188_p2) }
   0x9   : > { %1458 = vmatpush3.bf16.msra.mxu1 (!%p188_p2), %v1457_v7  ;;  %v1463_v15 = vpack.c.bf16 (!%p188_p2), %v289_v12, %v288_v11  ;;  %v273_v17 = vld [vmem:[%s2502_s1 + $0x28] sm:$0xff] (!%p188_p2)  ;;  %v291_v19 = vld [vmem:[%s2502_s1 + $0xb8] sm:$0xff] (!%p188_p2)  ;;  %v274_v23 = vld [vmem:[%s2502_s1 + $0x30] sm:$0xff] (!%p188_p2)  ;;  %vm235_vm0 = vcmp.lt.s32.totalorder (!%p188_p2), %v1801_v20, 1  ;;  %vm1249_vm1 = vcmp.ne.s32.totalorder (!%p188_p2), %v1801_v20, 0  ;;  %vm255_vm2 = vcmp.lt.s32.totalorder (!%p188_p2), %v1801_v20, 7 }
   0xa   : > { %1460 = vmatprep.subr.bf16.mxu1 (!%p188_p2), %v1459_v8  ;;  %v1465_v21 = vpack.c.bf16 (!%p188_p2), %v273_v17, %v272_v16  ;;  %v1467_v22 = vpack.c.bf16 (!%p188_p2), %v291_v19, %v290_v18  ;;  %v275_v24 = vld [vmem:[%s2502_s1 + $0x38] sm:$0xff] (!%p188_p2)  ;;  %v292_v25 = vld [vmem:[%s2502_s1 + $0xc0] sm:$0xff] (!%p188_p2)  ;;  %v293_v26 = vld [vmem:[%s2502_s1 + $0xc8] sm:$0xff] (!%p188_p2) }
   0xb   : > { %v1469_v30 = vpack.c.bf16 (!%p188_p2), %v275_v24, %v274_v23  ;;  %v1471_v32 = vpack.c.bf16 (!%p188_p2), %v293_v26, %v292_v25  ;;  %v276_v33 = vld [vmem:[%s2502_s1 + $0x40] sm:$0xff] (!%p188_p2)  ;;  %v277_v34 = vld [vmem:[%s2502_s1 + $0x48] sm:$0xff] (!%p188_p2)  ;;  %v294_v35 = vld [vmem:[%s2502_s1 + $0xd0] sm:$0xff] (!%p188_p2) }
   0xc   : > { %v295_v36 = vld [vmem:[%s2502_s1 + $0xd8] sm:$0xff] (!%p188_p2)  ;;  %v1473_v38 = vpack.c.bf16 (!%p188_p2), %v277_v34, %v276_v33  ;;  %v278_v40 = vld [vmem:[%s2502_s1 + $0x50] sm:$0xff] (!%p188_p2)  ;;  %v296_v42 = vld [vmem:[%s2502_s1 + $0xe0] sm:$0xff] (!%p188_p2) }
   0xd   : > { %s2508_s19 = smov (!%p215_p3, %s1173_s19), 1  ;;  %1462 = vmatpush3.bf16.msra.mxu1 %v1461_v14  ;;  %v1475_v39 = vpack.c.bf16 %v295_v36, %v294_v35  ;;  %v279_v41 = vld [vmem:[%s2502_s1 + $0x58] sm:$0xff]  ;;  %v297_v43 = vld [vmem:[%s2502_s1 + $0xe8] sm:$0xff]  ;;  %v280_v46 = vld [vmem:[%s2502_s1 + $0x60] sm:$0xff] }
   0xe   : > { %s1247_s15 = sshll.u32 %s2508_s19, 5  ;;  %1464 = vmatprep.subr.bf16.mxu1 %v1463_v15  ;;  %v1477_v44 = vpack.c.bf16 %v279_v41, %v278_v40  ;;  %v1479_v45 = vpack.c.bf16 %v297_v43, %v296_v42  ;;  %v281_v47 = vld [vmem:[%s2502_s1 + $0x68] sm:$0xff]  ;;  %v298_v48 = vld [vmem:[%s2502_s1 + $0xf0] sm:$0xff]  ;;  %v299_v49 = vld [vmem:[%s2502_s1 + $0xf8] sm:$0xff]  ;;  %s1248_s24 = sshll.u32 %s2508_s19, 6 }
   0xf   : > { %s1799_s28 = scalar_lea.vmem %s2501_s0, %s1247_s15  ;;  %v1481_v50 = vpack.c.bf16 %v281_v47, %v280_v46  ;;  %v1483_v51 = vpack.c.bf16 %v299_v49, %v298_v48  ;;  %v282_v52 = vld [vmem:[%s2502_s1 + $0x70] sm:$0xff]  ;;  %v283_v53 = vld [vmem:[%s2502_s1 + $0x78] sm:$0xff]  ;;  %v300_v54 = vld [vmem:[%s2502_s1 + $0x100] sm:$0xff]  ;;  %s2488_s27 = scalar_lea.vmem %s2506_s5, %s1248_s24 }
  0x10   : > { %v1816_v27 = vld [vmem:[%s1799_s28] sm:$0xff]  ;;  %v1819_v28 = vld [vmem:[%s1799_s28 + $0x18] sm:$0xff]  ;;  %v301_v55 = vld [vmem:[%s2502_s1 + $0x108] sm:$0xff]  ;;  %v1485_v57 = vpack.c.bf16 %v283_v53, %v282_v52 }
  0x11   : > { %v229_v29 = vrot.slane %v1816_v27, 7  ;;  %1466 = vmatpush3.bf16.msra.mxu1 %v1465_v21  ;;  %v232_v31 = vrot.slane %v1819_v28, 7  ;;  %v1880_v56 = vld [vmem:[%s1799_s28 + $0x8] sm:$0xff]  ;;  %v1487_v58 = vpack.c.bf16 %v301_v55, %v300_v54  ;;  %v302_v60 = vld [vmem:[%s2502_s1 + $0x110] sm:$0xff]  ;;  %v303_v61 = vld [vmem:[%s2502_s1 + $0x118] sm:$0xff]  ;;  %v251_v10 = vrot.slane %v1816_v27, 1 }
  0x12   : > { %1468 = vmatprep.subr.bf16.mxu1 %v1467_v22  ;;  %v230_v59 = vrot.slane %v1880_v56, 7  ;;  %v1890_v62 = vld [vmem:[%s1799_s28 + $0x10] sm:$0xff]  ;;  %v1491_v63 = vpack.c.bf16 %v303_v61, %v302_v60  ;;  %v304_v2 = vld [vmem:[%s2502_s1 + $0x120] sm:$0xff]  ;;  %v305_v3 = vld [vmem:[%s2502_s1 + $0x128] sm:$0xff]  ;;  %v252_v11 = vrot.slane %v1880_v56, 1 }
  0x13   : > { %v239_v37 = vsel %vm235_vm0, %v232_v31, %v229_v29  ;;  %v231_v1 = vrot.slane %v1890_v62, 7  ;;  %v1495_v4 = vpack.c.bf16 %v305_v3, %v304_v2  ;;  %v306_v6 = vld [vmem:[%s2502_s1 + $0x130] sm:$0xff]  ;;  %v307_v7 = vld [vmem:[%s2502_s1 + $0x138] sm:$0xff]  ;;  %v308_v12 = vld [vmem:[%s2502_s1 + $0x140] sm:$0xff]  ;;  %v253_v26 = vrot.slane %v1890_v62, 1 }
  0x14   : > { %1184 = vmatprep.mubr.msk.f32.mxu1 %vm1249_vm1, %v239_v37  ;;  %v238_v0 = vsel %vm235_vm0, %v229_v29, %v230_v59  ;;  %v1499_v8 = vpack.c.bf16 %v307_v7, %v306_v6  ;;  %v309_v13 = vld [vmem:[%s2502_s1 + $0x148] sm:$0xff]  ;;  %v258_v15 = vsel %vm255_vm2, %v251_v10, %v252_v11  ;;  %v310_v16 = vld [vmem:[%s2502_s1 + $0x150] sm:$0xff]  ;;  %v311_v17 = vld [vmem:[%s2502_s1 + $0x158] sm:$0xff]  ;;  %v254_v29 = vrot.slane %v1819_v28, 1 }
  0x15   : > { %1470 = vmatpush3.bf16.msra.mxu1 %v1469_v30  ;;  %v237_v5 = vsel %vm235_vm0, %v230_v59, %v231_v1  ;;  %v236_v9 = vsel %vm235_vm0, %v231_v1, %v232_v31  ;;  %v1503_v14 = vpack.c.bf16 %v309_v13, %v308_v12  ;;  %v1507_v18 = vpack.c.bf16 %v311_v17, %v310_v16  ;;  %v312_v19 = vld [vmem:[%s2502_s1 + $0x160] sm:$0xff]  ;;  %v313_v21 = vld [vmem:[%s2502_s1 + $0x168] sm:$0xff]  ;;  %v314_v23 = vld [vmem:[%s2502_s1 + $0x170] sm:$0xff] }
  0x16   : > { %1472 = vmatprep.subr.bf16.mxu1 %v1471_v32  ;;  %v1511_v22 = vpack.c.bf16 %v313_v21, %v312_v19  ;;  %v315_v24 = vld [vmem:[%s2502_s1 + $0x178] sm:$0xff]  ;;  %v257_v30 = vsel %vm255_vm2, %v252_v11, %v253_v26  ;;  %v1951_v31 = vadd.s32 24, %v1801_v20  ;;  %v256_v32 = vsel %vm255_vm2, %v253_v26, %v254_v29  ;;  %v1203_v34 = vld [vmem:[%s2502_s1 + $0x200] sm:$0xff]  ;;  %v1204_v35 = vld [vmem:[%s2502_s1 + $0x208] sm:$0xff] }
  0x17   : > { %v1515_v25 = vpack.c.bf16 %v315_v24, %v314_v23  ;;  %v259_v33 = vsel %vm255_vm2, %v254_v29, %v251_v10  ;;  %v1187_v36 = vld [vmem:[%s2502_s1 + $0x180] sm:$0xff]  ;;  %v1519_v37 = vpack.c.bf16 %v1204_v35, %v1203_v34  ;;  %v1205_v40 = vld [vmem:[%s2502_s1 + $0x210] sm:$0xff]  ;;  %v1206_v41 = vld [vmem:[%s2502_s1 + $0x218] sm:$0xff] }
  0x18   : > { %vm1250_vm3 = vcmp.ne.s32.totalorder %v1951_v31, 31  ;;  %v1523_v42 = vpack.c.bf16 %v1206_v41, %v1205_v40  ;;  %v1189_v43 = vld [vmem:[%s2502_s1 + $0x190] sm:$0xff]  ;;  %v1207_v46 = vld [vmem:[%s2502_s1 + $0x220] sm:$0xff]  ;;  %v1208_v47 = vld [vmem:[%s2502_s1 + $0x228] sm:$0xff] }
  0x19   : > { %1474 = vmatpush3.bf16.msra.mxu1 %v1473_v38  ;;  %v1188_v38 = vld [vmem:[%s2502_s1 + $0x188] sm:$0xff]  ;;  %v1527_v48 = vpack.c.bf16 %v1208_v47, %v1207_v46  ;;  %v1191_v49 = vld [vmem:[%s2502_s1 + $0x1a0] sm:$0xff]  ;;  %v1209_v52 = vld [vmem:[%s2502_s1 + $0x230] sm:$0xff] }
  0x1a   : > { %1476 = vmatprep.subr.bf16.mxu1 %v1475_v39  ;;  %v1521_v39 = vpack.c.bf16 %v1188_v38, %v1187_v36  ;;  %v1210_v53 = vld [vmem:[%s2502_s1 + $0x238] sm:$0xff]  ;;  %v1193_v55 = vld [vmem:[%s2502_s1 + $0x1b0] sm:$0xff]  ;;  %v1212_v60 = vld [vmem:[%s2502_s1 + $0x248] sm:$0xff] }
  0x1b   : > { %v1531_v54 = vpack.c.bf16 %v1210_v53, %v1209_v52  ;;  %v1213_v2 = vld [vmem:[%s2502_s1 + $0x250] sm:$0xff]  ;;  %v1214_v3 = vld [vmem:[%s2502_s1 + $0x258] sm:$0xff]  ;;  %v1199_v11 = vld [vmem:[%s2502_s1 + $0x1e0] sm:$0xff] }
  0x1c   : > { %v1198_v6 = vld [vmem:[%s2502_s1 + $0x1d8] sm:$0xff]  ;;  %v1200_v12 = vld [vmem:[%s2502_s1 + $0x1e8] sm:$0xff]  ;;  %v1201_v17 = vld [vmem:[%s2502_s1 + $0x1f0] sm:$0xff] }
  0x1d   : > { %1478 = vmatpush3.bf16.msra.mxu1 %v1477_v44  ;;  %v1190_v44 = vld [vmem:[%s2502_s1 + $0x198] sm:$0xff]  ;;  %v1545_v13 = vpack.c.bf16 %v1200_v12, %v1199_v11  ;;  %v1219_v21 = vld [vmem:[%s2502_s1 + $0x280] sm:$0xff]  ;;  %v801_v24 = vld [vmem:[%s2504_s3 + $0x8] sm:$0xff] }
  0x1e   : > { %1480 = vmatprep.subr.bf16.mxu1 %v1479_v45  ;;  %v1525_v45 = vpack.c.bf16 %v1190_v44, %v1189_v43  ;;  %v800_v26 = vld [vmem:[%s2504_s3] sm:$0xff]  ;;  %v809_v38 = vld [vmem:[%s2504_s3 + $0x48] sm:$0xff]  ;;  %v810_v43 = vld [vmem:[%s2504_s3 + $0x50] sm:$0xff] }
  0x1f   : > { %v804_v36 = vld [vmem:[%s2504_s3 + $0x20] sm:$0xff]  ;;  %v813_v44 = vld [vmem:[%s2504_s3 + $0x68] sm:$0xff] }
  0x21   : > { %1482 = vmatpush3.bf16.msra.mxu1 %v1481_v50  ;;  %v1192_v50 = vld [vmem:[%s2502_s1 + $0x1a8] sm:$0xff] }
  0x22   : > { %1484 = vmatprep.subr.bf16.mxu1 %v1483_v51  ;;  %v1529_v51 = vpack.c.bf16 %v1192_v50, %v1191_v49  ;;  %v814_v49 = vld [vmem:[%s2504_s3 + $0x70] sm:$0xff]  ;;  %v817_v50 = vld [vmem:[%s2504_s3 + $0x88] sm:$0xff] }
  0x25   : > { %1486 = vmatpush3.bf16.msra.mxu1 %v1485_v57  ;;  %v1194_v57 = vld [vmem:[%s2502_s1 + $0x1b8] sm:$0xff] }
  0x26   : > { %1488 = vmatprep.subr.bf16.mxu1 %v1487_v58  ;;  %v1533_v59 = vpack.c.bf16 %v1194_v57, %v1193_v55  ;;  %v818_v55 = vld [vmem:[%s2504_s3 + $0x90] sm:$0xff] }
  0x28   : > { %388 = vmatmul.mubr.f32.vlgmr.msra.gmra.mrb[0].mxu1 %v1816_v27 }
  0x29   : > { %1490 = vmatpush3.bf16.msra.mxu1 %v1487_v58  ;;  %392 = vmatprep.mubr.f32.mxu1 %v238_v0  ;;  %v1211_v58 = vld [vmem:[%s2502_s1 + $0x240] sm:$0xff]  ;;  %v1196_v0 = vld [vmem:[%s2502_s1 + $0x1c8] sm:$0xff] }
  0x2a   : > { %1492 = vmatprep.subr.bf16.mxu1 %v1491_v63  ;;  %v1535_v61 = vpack.c.bf16 %v1212_v60, %v1211_v58 }
  0x2c   : > { %393 = vmatmul.mubr.f32.gmra.mrb[2].mxu1 %v1880_v56 }
  0x2d   : > { %1494 = vmatpush3.bf16.msra.mxu1 %v1491_v63  ;;  %397 = vmatprep.mubr.f32.mxu1 %v237_v5  ;;  %v1195_v63 = vld [vmem:[%s2502_s1 + $0x1c0] sm:$0xff]  ;;  %v1197_v5 = vld [vmem:[%s2502_s1 + $0x1d0] sm:$0xff] }
  0x2e   : > { %1496 = vmatprep.subr.bf16.mxu1 %v1495_v4  ;;  %v1537_v1 = vpack.c.bf16 %v1196_v0, %v1195_v63  ;;  %v1541_v7 = vpack.c.bf16 %v1198_v6, %v1197_v5 }
  0x30   : > { %398 = vmatmul.mubr.f32.gmra.mrb[4].mxu1 %v1890_v62 }
  0x31   : > { %1498 = vmatpush3.bf16.msra.mxu1 %v1495_v4  ;;  %402 = vmatprep.mubr.f32.mxu1 %v236_v9  ;;  %v1539_v4 = vpack.c.bf16 %v1214_v3, %v1213_v2  ;;  %v1216_v9 = vld [vmem:[%s2502_s1 + $0x268] sm:$0xff] }
  0x32   : > { %1500 = vmatprep.subr.bf16.mxu1 %v1499_v8 }
  0x34   : > { %403 = vmatmul.mubr.f32.gmra.mrb[6].mxu1 %v1819_v28 }
  0x35   : > { %1502 = vmatpush3.bf16.msra.mxu1 %v1499_v8  ;;  %1411 = vmatprep.mubr.f32.mxu1 %v258_v15  ;;  %v1215_v8 = vld [vmem:[%s2502_s1 + $0x260] sm:$0xff]  ;;  %v1218_v15 = vld [vmem:[%s2502_s1 + $0x278] sm:$0xff] }
  0x36   : > { %1504 = vmatprep.subr.bf16.mxu1 %v1503_v14  ;;  %v1543_v10 = vpack.c.bf16 %v1216_v9, %v1215_v8 }
  0x39   : > { %1506 = vmatpush3.bf16.msra.mxu1 %v1503_v14  ;;  %v1217_v14 = vld [vmem:[%s2502_s1 + $0x270] sm:$0xff] }
  0x3a   : > { %1508 = vmatprep.subr.bf16.mxu1 %v1507_v18  ;;  %v1547_v16 = vpack.c.bf16 %v1218_v15, %v1217_v14 }
  0x3d   : > { %1510 = vmatpush3.bf16.msra.mxu1 %v1507_v18  ;;  %v1202_v18 = vld [vmem:[%s2502_s1 + $0x1f8] sm:$0xff] }
  0x3e   : > { %1512 = vmatprep.subr.bf16.mxu1 %v1511_v22  ;;  %v1549_v19 = vpack.c.bf16 %v1202_v18, %v1201_v17 }
  0x41   : > { %1514 = vmatpush3.bf16.msra.mxu1 %v1511_v22  ;;  %v1220_v22 = vld [vmem:[%s2502_s1 + $0x288] sm:$0xff] }
  0x42   : > { %1516 = vmatprep.subr.bf16.mxu1 %v1515_v25  ;;  %v2062_v23 = vpack.c.bf16 %v1220_v22, %v1219_v21 }
  0x45   : > { %1518 = vmatpush3.bf16.msra.mxu1 %v1515_v25  ;;  %v803_v25 = vld [vmem:[%s2504_s3 + $0x18] sm:$0xff] }
  0x46   : > { %1520 = vmatprep.subr.bf16.mxu1 %v1519_v37  ;;  %v1583_v29 = vpack.c.bf16 %v803_v25, %v801_v24  ;;  %v806_v37 = vld [vmem:[%s2504_s3 + $0x30] sm:$0xff] }
  0x47   : > { %v1589_v40 = vpack.c.bf16 %v806_v37, %v804_v36 }
  0x48   : > { %1412 = vmatmul.mubr.f32.vlgmr.msra.gmra.mrb[8].mxu1 %v257_v30  ;;  %v802_v30 = vld [vmem:[%s2504_s3 + $0x10] sm:$0xff]  ;;  %1584 = vmatprep.subr.bf16.mxu0 %v1583_v29 }
  0x49   : > { %1414 = vmatprep.mubr.f32.mxu1 %v256_v32  ;;  %1522 = vmatpush3.bf16.msra.mxu1 %v1521_v39  ;;  %v805_v32 = vld [vmem:[%s2504_s3 + $0x28] sm:$0xff]  ;;  %v1585_v34 = vpack.c.bf16 %v802_v30, %v800_v26  ;;  %v811_v39 = vld [vmem:[%s2504_s3 + $0x58] sm:$0xff] }
  0x4a   : > { %1524 = vmatprep.subr.bf16.mxu1 %v1523_v42  ;;  %v1591_v41 = vpack.c.bf16 %v811_v39, %v809_v38  ;;  %v808_v42 = vld [vmem:[%s2504_s3 + $0x40] sm:$0xff] }
  0x4b   : > { %1586 = vmatpush1.bf16.msra.mxu0 %v1585_v34  ;;  %v1593_v46 = vpack.c.bf16 %v810_v43, %v808_v42  ;;  %v1221_v34 = vld [vmem:[%s2502_s1 + $0x290] sm:$0xff] }
  0x4c   : > { %1415 = vmatmul.mubr.msk.f32.gmra.mrb[10].mxu1 %vm1250_vm3, %v259_v33  ;;  %v807_v33 = vld [vmem:[%s2504_s3 + $0x38] sm:$0xff] }
  0x4d   : > { %1526 = vmatpush3.bf16.msra.mxu1 %v1525_v45  ;;  %v1587_v35 = vpack.c.bf16 %v807_v33, %v805_v32  ;;  %v815_v45 = vld [vmem:[%s2504_s3 + $0x78] sm:$0xff] }
  0x4e   : > { %1528 = vmatprep.subr.bf16.mxu1 %v1527_v48  ;;  %v1595_v47 = vpack.c.bf16 %v815_v45, %v813_v44  ;;  %v812_v48 = vld [vmem:[%s2504_s3 + $0x60] sm:$0xff]  ;;  %v1225_v45 = vld [vmem:[%s2502_s1 + $0x2b0] sm:$0xff] }
  0x4f   : > { %1588 = vmatprep.subr.bf16.mxu0 %v1587_v35  ;;  %v1597_v52 = vpack.c.bf16 %v814_v49, %v812_v48  ;;  %v1227_v48 = vld [vmem:[%s2502_s1 + $0x2c0] sm:$0xff]  ;;  %v1228_v49 = vld [vmem:[%s2502_s1 + $0x2c8] sm:$0xff] }
  0x50   : > { %1590 = vmatpush1.bf16.msra.mxu0 %v1589_v40  ;;  %v1223_v40 = vld [vmem:[%s2502_s1 + $0x2a0] sm:$0xff] }
  0x51   : > { %1530 = vmatpush3.bf16.msra.mxu1 %v1529_v51  ;;  %1592 = vmatprep.subr.bf16.mxu0 %v1591_v41  ;;  %v819_v51 = vld [vmem:[%s2504_s3 + $0x98] sm:$0xff]  ;;  %v1224_v41 = vld [vmem:[%s2502_s1 + $0x2a8] sm:$0xff] }
  0x52   : > { %1532 = vmatprep.subr.bf16.mxu1 %v1531_v54  ;;  %v1599_v53 = vpack.c.bf16 %v819_v51, %v817_v50  ;;  %v816_v54 = vld [vmem:[%s2504_s3 + $0x80] sm:$0xff]  ;;  %v1559_v44 = vpack.c.bf16 %v1224_v41, %v1223_v40  ;;  %v838_v40 = vld [vmem:[%s2504_s3 + $0x130] sm:$0xff]  ;;  %v841_v41 = vld [vmem:[%s2504_s3 + $0x148] sm:$0xff] }
  0x53   : > { %v1601_v57 = vpack.c.bf16 %v818_v55, %v816_v54  ;;  %v1229_v54 = vld [vmem:[%s2502_s1 + $0x2d0] sm:$0xff]  ;;  %v1230_v55 = vld [vmem:[%s2502_s1 + $0x2d8] sm:$0xff] }
  0x54   : > { %1594 = vmatpush1.bf16.msra.mxu0 %v1593_v46  ;;  %v1226_v46 = vld [vmem:[%s2502_s1 + $0x2b8] sm:$0xff] }
  0x55   : > { %1534 = vmatpush3.bf16.msra.mxu1 %v1533_v59  ;;  %1596 = vmatprep.subr.bf16.mxu0 %v1595_v47 }
  0x56   : > { %1536 = vmatprep.subr.bf16.mxu1 %v1535_v61 }
  0x58   : > { %1598 = vmatpush1.bf16.msra.mxu0 %v1597_v52 }
  0x59   : > { %1538 = vmatpush3.bf16.msra.mxu1 %v1537_v1  ;;  %1600 = vmatprep.subr.bf16.mxu0 %v1599_v53  ;;  %v1567_v53 = vpack.c.bf16 %v1228_v49, %v1227_v48 }
  0x5a   : > { %1540 = vmatprep.subr.bf16.mxu1 %v1539_v4 }
  0x5c   : > { %1602 = vmatpush1.bf16.msra.mxu0 %v1601_v57 }
  0x5d   : > { %1542 = vmatpush3.bf16.msra.mxu1 %v1541_v7  ;;  %v1182_v7 = vld [vmem:[%s2503_s2] ss:$0 sm:$0xff] }
  0x5e   : > { %1544 = vmatprep.subr.bf16.mxu1 %v1543_v10 }
  0x61   : > { %1546 = vmatpush3.bf16.msra.mxu1 %v1545_v13 }
  0x62   : > { %1548 = vmatprep.subr.bf16.mxu1 %v1547_v16 }
  0x65   : > { %1550 = vmatpush3.bf16.msra.mxu1 %v1549_v19 }
  0x66   : > { %1552 = vmatprep.subr.bf16.mxu1 %v2062_v23 }
  0xfb   : > { %v1283_v58 = vpop.f32.mrb[0].mxu1 }
  0xfc   : > { %v1284_v59 = vpop.f32.mrb[1].mxu1 }
  0xfd   : > { %v1285_v60 = vadd.f32 %v1284_v59, %v1283_v58  ;;  %v1571_v58 = vpack.c.bf16 %v1230_v55, %v1229_v54  ;;  %v1231_v59 = vld [vmem:[%s2502_s1 + $0x2e0] sm:$0xff] }
  0xff   : > { %v1286_v61 = vpop.f32.mrb[2].mxu1  ;;  %v390_v10 = vadd.f32 %v1285_v60, %v1182_v7  ;;  %v1232_v60 = vld [vmem:[%s2502_s1 + $0x2e8] sm:$0xff] }
 0x100   : > { %v1287_v63 = vpop.f32.mrb[3].mxu1 }
 0x101   : > { %v1288_v0 = vadd.f32 %v1287_v63, %v1286_v61  ;;  %v1575_v61 = vpack.c.bf16 %v1232_v60, %v1231_v59  ;;  %v1233_v63 = vld [vmem:[%s2502_s1 + $0x2f0] sm:$0xff]  ;;  %v853_v60 = vld [vmem:[%s2504_s3 + $0x1a8] sm:$0xff] }
 0x103   : > { %v1289_v1 = vpop.f32.mrb[4].mxu1  ;;  %v395_v8 = vadd.f32 %v1288_v0, %v1182_v7  ;;  %v1234_v0 = vld [vmem:[%s2502_s1 + $0x2f8] sm:$0xff] }
 0x104   : > { %v1290_v2 = vpop.f32.mrb[5].mxu1 }
 0x105   : > { %v1291_v3 = vadd.f32 %v1290_v2, %v1289_v1  ;;  %v1579_v1 = vpack.c.bf16 %v1234_v0, %v1233_v63  ;;  %v852_v0 = vld [vmem:[%s2504_s3 + $0x1a0] sm:$0xff] }
 0x107   : > { %v1292_v4 = vpop.f32.mrb[6].mxu1  ;;  %v400_v18 = vadd.f32 %v1291_v3, %v1182_v7 }
 0x108   : > { %v1293_v5 = vpop.f32.mrb[7].mxu1 }
 0x109   : > { %v1294_v6 = vadd.f32 %v1293_v5, %v1292_v4 }
 0x10b   : > { %v405_v15 = vadd.f32 %v1294_v6, %v1182_v7  ;;  %v821_v7 = vld [vmem:[%s2504_s3 + $0xa8] sm:$0xff] }
 0x11b   : > { %v1413_v9 = vpop.f32.mrb[8].mxu1 }
 0x11c   : > { %v480_v11 = vadd.f32 %v1413_v9, %v395_v8  ;;  %v474_v12 = vpop.f32.mrb[9].mxu1  ;;  %v823_v8 = vld [vmem:[%s2504_s3 + $0xb8] sm:$0xff] }
 0x11d   : > { %v475_v13 = vadd.f32 %v474_v12, %v390_v10  ;;  %v1603_v9 = vpack.c.bf16 %v823_v8, %v821_v7  ;;  %v820_v10 = vld [vmem:[%s2504_s3 + $0xa0] sm:$0xff]  ;;  %v858_v7 = vld [vmem:[%s2504_s3 + $0x1d0] sm:$0xff] }
 0x11e   : > { %v494_v14 = vadd.f32 %v480_v11, %v1880_v56  ;;  %v822_v11 = vld [vmem:[%s2504_s3 + $0xb0] sm:$0xff] }
 0x11f   : > { %v493_v16 = vadd.f32 %v475_v13, %v1816_v27  ;;  %v1416_v17 = vpop.f32.mrb[10].mxu1  ;;  %v1605_v12 = vpack.c.bf16 %v822_v11, %v820_v10  ;;  %1604 = vmatprep.subr.bf16.mxu0 %v1603_v9  ;;  %v825_v13 = vld [vmem:[%s2504_s3 + $0xc8] sm:$0xff]  ;;  %v863_v10 = vld [vmem:[%s2504_s3 + $0x1f8] sm:$0xff] }
 0x120   : > { %v502_v19 = vmul.f32 0.2, %v494_v14  ;;  %v490_v21 = vadd.f32 %v1416_v17, %v405_v15  ;;  %v484_v22 = vpop.f32.mrb[11].mxu1  ;;  %vm498_vm4 = vcmp.ge.f32.partialorder %v494_v14, 0.0  ;;  %v826_v17 = vld [vmem:[%s2504_s3 + $0xd0] sm:$0xff]  ;;  %v861_v9 = vld [vmem:[%s2504_s3 + $0x1e8] sm:$0xff] }
 0x121   : > { %vm497_vm5 = vcmp.ge.f32.partialorder %v493_v16, 0.0  ;;  %v501_v24 = vmul.f32 0.2, %v493_v16  ;;  %v485_v25 = vadd.f32 %v484_v22, %v400_v18  ;;  %1606 = vmatpush1.bf16.msra.mxu0 %v1605_v12  ;;  %v1643_v11 = vpack.c.bf16 %v863_v10, %v861_v9  ;;  %v860_v12 = vld [vmem:[%s2504_s3 + $0x1e0] sm:$0xff] }
 0x122   : > { %v496_v26 = vadd.f32 %v490_v21, %v1819_v28  ;;  %v2132_v30 = vsel %vm498_vm4, %v494_v14, %v502_v19  ;;  %v1222_v28 = vld [vmem:[%s2502_s1 + $0x298] sm:$0xff]  ;;  %v829_v19 = vld [vmem:[%s2504_s3 + $0xe8] sm:$0xff]  ;;  %v868_v10 = vld [vmem:[%s2504_s3 + $0x220] sm:$0xff] }
 0x123   : > { %v495_v29 = vadd.f32 %v485_v25, %v1890_v62  ;;  %v2134_v32 = vsel %vm497_vm5, %v493_v16, %v501_v24  ;;  %v510_v36 = vrot.slane %v2132_v30, 7  ;;  %v1555_v39 = vpack.c.bf16 %v1222_v28, %v1221_v34  ;;  %v827_v14 = vld [vmem:[%s2504_s3 + $0xd8] sm:$0xff]  ;;  %v824_v16 = vld [vmem:[%s2504_s3 + $0xc0] sm:$0xff]  ;;  %v830_v25 = vld [vmem:[%s2504_s3 + $0xf0] sm:$0xff] }
 0x124   : > { %vm500_vm6 = vcmp.ge.f32.partialorder %v496_v26, 0.0  ;;  %v504_v56 = vmul.f32 0.2, %v496_v26  ;;  %v509_v62 = vrot.slane %v2134_v32, 7  ;;  %v521_v51 = vrot.slane %v2134_v32, 1  ;;  %v831_v21 = vld [vmem:[%s2504_s3 + $0xf8] sm:$0xff] }
 0x125   : > { %vm499_vm7 = vcmp.ge.f32.partialorder %v495_v29, 0.0  ;;  %v503_v27 = vmul.f32 0.2, %v495_v29  ;;  %v522_v52 = vrot.slane %v2132_v30, 1  ;;  %v1607_v15 = vpack.c.bf16 %v827_v14, %v825_v13  ;;  %v828_v24 = vld [vmem:[%s2504_s3 + $0xe0] sm:$0xff]  ;;  %v834_v28 = vld [vmem:[%s2504_s3 + $0x110] sm:$0xff] }
 0x126   : > { %v2136_v33 = vsel %vm500_vm6, %v496_v26, %v504_v56  ;;  %v515_v42 = vsel %vm235_vm0, %v509_v62, %v510_v36  ;;  %v1609_v18 = vpack.c.bf16 %v826_v17, %v824_v16  ;;  %v1611_v22 = vpack.c.bf16 %v831_v21, %v829_v19  ;;  %v835_v56 = vld [vmem:[%s2504_s3 + $0x118] sm:$0xff]  ;;  %v832_v34 = vld [vmem:[%s2504_s3 + $0x100] sm:$0xff]  ;;  %v862_v13 = vld [vmem:[%s2504_s3 + $0x1f0] sm:$0xff] }
 0x127   : > { %v512_v35 = vrot.slane %v2136_v33, 7  ;;  %v2147_v37 = vsel %vm499_vm7, %v495_v29, %v503_v27  ;;  %v527_v57 = vsel %vm255_vm2, %v521_v51, %v522_v52  ;;  %v524_v3 = vrot.slane %v2136_v33, 1  ;;  %1608 = vmatprep.subr.bf16.mxu0 %v1607_v15  ;;  %v833_v29 = vld [vmem:[%s2504_s3 + $0x108] sm:$0xff]  ;;  %v867_v16 = vld [vmem:[%s2504_s3 + $0x218] sm:$0xff] }
 0x128   : > { %v511_v43 = vrot.slane %v2147_v37, 7  ;;  %v523_v2 = vrot.slane %v2147_v37, 1  ;;  %1610 = vmatpush1.bf16.msra.mxu0 %v1609_v18  ;;  %v1613_v26 = vpack.c.bf16 %v830_v25, %v828_v24  ;;  %v1615_v27 = vpack.c.bf16 %v835_v56, %v833_v29  ;;  %v865_v15 = vld [vmem:[%s2504_s3 + $0x208] sm:$0xff] }
 0x129   : > { %v516_v38 = vsel %vm235_vm0, %v512_v35, %v509_v62  ;;  %v528_v6 = vsel %vm255_vm2, %v524_v3, %v521_v51  ;;  %1612 = vmatprep.subr.bf16.mxu0 %v1611_v22  ;;  %v1617_v62 = vpack.c.bf16 %v834_v28, %v832_v34  ;;  %v846_v51 = vld [vmem:[%s2504_s3 + $0x170] sm:$0xff]  ;;  %v1645_v14 = vpack.c.bf16 %v862_v13, %v860_v12 }
 0x12a   : > { %1238 = vmatprep.mubr.msk.f32.mxu1 %vm1249_vm1, %v516_v38  ;;  %v514_v47 = vsel %vm235_vm0, %v510_v36, %v511_v43  ;;  %v513_v50 = vsel %vm235_vm0, %v511_v43, %v512_v35  ;;  %v526_v4 = vsel %vm255_vm2, %v522_v52, %v523_v2  ;;  %v525_v5 = vsel %vm255_vm2, %v523_v2, %v524_v3  ;;  %v837_v35 = vld [vmem:[%s2504_s3 + $0x128] sm:$0xff]  ;;  %v839_v36 = vld [vmem:[%s2504_s3 + $0x138] sm:$0xff]  ;;  %v836_v38 = vld [vmem:[%s2504_s3 + $0x120] sm:$0xff] }
 0x12b   : > { %655 = vmatmul.mubr.f32.vlgmr.msra.gmra.mrb[12].mxu1 %v2134_v32  ;;  %v1621_v43 = vpack.c.bf16 %v838_v40, %v836_v38  ;;  %v849_v52 = vld [vmem:[%s2504_s3 + $0x188] sm:$0xff]  ;;  %v1647_v17 = vpack.c.bf16 %v867_v16, %v865_v15  ;;  %v875_v15 = vld [vmem:[%s2504_s3 + $0x258] sm:$0xff] }
 0x12c   : > { %1554 = vmatpush3.bf16.msra.mxu1 %v2062_v23  ;;  %659 = vmatprep.mubr.f32.mxu1 %v515_v42  ;;  %v1563_v23 = vpack.c.bf16 %v1226_v46, %v1225_v45  ;;  %v843_v42 = vld [vmem:[%s2504_s3 + $0x158] sm:$0xff]  ;;  %v840_v45 = vld [vmem:[%s2504_s3 + $0x140] sm:$0xff]  ;;  %v842_v46 = vld [vmem:[%s2504_s3 + $0x150] sm:$0xff] }
 0x12d   : > { %1556 = vmatprep.subr.bf16.mxu1 %v1555_v39  ;;  %1614 = vmatpush1.bf16.msra.mxu0 %v1613_v26  ;;  %v1625_v48 = vpack.c.bf16 %v842_v46, %v840_v45  ;;  %v857_v3 = vld [vmem:[%s2504_s3 + $0x1c8] sm:$0xff] }
 0x12e   : > { %1616 = vmatprep.subr.bf16.mxu0 %v1615_v27 }
 0x12f   : > { %660 = vmatmul.mubr.f32.gmra.mrb[14].mxu1 %v2132_v30 }
 0x130   : > { %1558 = vmatpush3.bf16.msra.mxu1 %v1555_v39  ;;  %664 = vmatprep.mubr.f32.mxu1 %v514_v47  ;;  %v1619_v39 = vpack.c.bf16 %v839_v36, %v837_v35  ;;  %v845_v47 = vld [vmem:[%s2504_s3 + $0x168] sm:$0xff] }
 0x131   : > { %1560 = vmatprep.subr.bf16.mxu1 %v1559_v44  ;;  %1618 = vmatpush1.bf16.msra.mxu0 %v1617_v62  ;;  %v1236_v62 = vld [vmem:[%s2503_s2 + $0x1] ss:$0 sm:$0xff] }
 0x132   : > { %1620 = vmatprep.subr.bf16.mxu0 %v1619_v39 }
 0x133   : > { %665 = vmatmul.mubr.f32.gmra.mrb[16].mxu1 %v2147_v37 }
 0x134   : > { %1562 = vmatpush3.bf16.msra.mxu1 %v1559_v44  ;;  %669 = vmatprep.mubr.f32.mxu1 %v513_v50  ;;  %v1623_v44 = vpack.c.bf16 %v843_v42, %v841_v41  ;;  %v844_v50 = vld [vmem:[%s2504_s3 + $0x160] sm:$0xff] }
 0x135   : > { %1564 = vmatprep.subr.bf16.mxu1 %v1563_v23  ;;  %1622 = vmatpush1.bf16.msra.mxu0 %v1621_v43  ;;  %v1629_v54 = vpack.c.bf16 %v846_v51, %v844_v50 }
 0x136   : > { %1624 = vmatprep.subr.bf16.mxu0 %v1623_v44 }
 0x137   : > { %670 = vmatmul.mubr.f32.gmra.mrb[18].mxu1 %v2136_v33 }
 0x138   : > { %1566 = vmatpush3.bf16.msra.mxu1 %v1563_v23  ;;  %1449 = vmatprep.mubr.f32.mxu1 %v527_v57  ;;  %v847_v23 = vld [vmem:[%s2504_s3 + $0x178] sm:$0xff]  ;;  %v848_v57 = vld [vmem:[%s2504_s3 + $0x180] sm:$0xff] }
 0x139   : > { %1568 = vmatprep.subr.bf16.mxu1 %v1567_v53  ;;  %v1627_v49 = vpack.c.bf16 %v847_v23, %v845_v47  ;;  %1626 = vmatpush1.bf16.msra.mxu0 %v1625_v48 }
 0x13b   : > { %1628 = vmatprep.subr.bf16.mxu0 %v1627_v49 }
 0x13c   : > { %1570 = vmatpush3.bf16.msra.mxu1 %v1567_v53  ;;  %v851_v53 = vld [vmem:[%s2504_s3 + $0x198] sm:$0xff] }
 0x13d   : > { %1572 = vmatprep.subr.bf16.mxu1 %v1571_v58  ;;  %v1631_v55 = vpack.c.bf16 %v851_v53, %v849_v52  ;;  %1630 = vmatpush1.bf16.msra.mxu0 %v1629_v54 }
 0x13f   : > { %1632 = vmatprep.subr.bf16.mxu0 %v1631_v55 }
 0x140   : > { %1574 = vmatpush3.bf16.msra.mxu1 %v1571_v58  ;;  %v850_v58 = vld [vmem:[%s2504_s3 + $0x190] sm:$0xff] }
 0x141   : > { %1576 = vmatprep.subr.bf16.mxu1 %v1575_v61  ;;  %v1633_v59 = vpack.c.bf16 %v850_v58, %v848_v57 }
 0x143   : > { %1634 = vmatpush1.bf16.msra.mxu0 %v1633_v59 }
 0x144   : > { %1578 = vmatpush3.bf16.msra.mxu1 %v1575_v61  ;;  %v855_v61 = vld [vmem:[%s2504_s3 + $0x1b8] sm:$0xff] }
 0x145   : > { %1580 = vmatprep.subr.bf16.mxu1 %v1579_v1  ;;  %v1635_v63 = vpack.c.bf16 %v855_v61, %v853_v60  ;;  %v864_v60 = vld [vmem:[%s2504_s3 + $0x200] sm:$0xff]  ;;  %v866_v61 = vld [vmem:[%s2504_s3 + $0x210] sm:$0xff] }
 0x147   : > { %1636 = vmatprep.subr.bf16.mxu0 %v1635_v63 }
 0x148   : > { %1582 = vmatpush3.bf16.msra.mxu1 %v1579_v1  ;;  %v854_v1 = vld [vmem:[%s2504_s3 + $0x1b0] sm:$0xff] }
 0x149   : > { %v1637_v2 = vpack.c.bf16 %v854_v1, %v852_v0  ;;  %v871_v0 = vld [vmem:[%s2504_s3 + $0x238] sm:$0xff] }
 0x14b   : > { %1450 = vmatmul.mubr.f32.vlgmr.msra.gmra.mrb[20].mxu1 %v526_v4  ;;  %1638 = vmatpush1.bf16.msra.mxu0 %v1637_v2  ;;  %v859_v4 = vld [vmem:[%s2504_s3 + $0x1d8] sm:$0xff] }
 0x14c   : > { %1452 = vmatprep.mubr.f32.mxu1 %v525_v5  ;;  %v1639_v5 = vpack.c.bf16 %v859_v4, %v857_v3 }
 0x14e   : > { %1640 = vmatprep.subr.bf16.mxu0 %v1639_v5  ;;  %v1649_v5 = vpack.c.bf16 %v866_v61, %v864_v60  ;;  %v904_v60 = vsub.s32 1, %v1801_v20 }
 0x14f   : > { %1453 = vmatmul.mubr.msk.f32.gmra.mrb[22].mxu1 %vm1250_vm3, %v528_v6  ;;  %v856_v6 = vld [vmem:[%s2504_s3 + $0x1c0] sm:$0xff] }
 0x150   : > { %v1641_v8 = vpack.c.bf16 %v858_v7, %v856_v6 }
 0x152   : > { %1642 = vmatpush1.bf16.msra.mxu0 %v1641_v8 }
 0x153   : > { %1644 = vmatprep.subr.bf16.mxu0 %v1643_v11  ;;  %v870_v11 = vld [vmem:[%s2504_s3 + $0x230] sm:$0xff] }
 0x156   : > { %1646 = vmatpush1.bf16.msra.mxu0 %v1645_v14  ;;  %v873_v14 = vld [vmem:[%s2504_s3 + $0x248] sm:$0xff] }
 0x157   : > { %1648 = vmatprep.subr.bf16.mxu0 %v1647_v17 }
 0x1fe   : > { %v1347_v18 = vpop.f32.mrb[12].mxu1 }
 0x1ff   : > { %v1348_v19 = vpop.f32.mrb[13].mxu1 }
 0x200   : > { %v1349_v21 = vadd.f32 %v1348_v19, %v1347_v18  ;;  %v1653_v19 = vpack.c.bf16 %v870_v11, %v868_v10 }
 0x202   : > { %v1350_v22 = vpop.f32.mrb[14].mxu1  ;;  %v657_v38 = vadd.f32 %v1349_v21, %v1236_v62  ;;  %v1655_v21 = vpack.c.bf16 %v875_v15, %v873_v14 }
 0x203   : > { %v1351_v24 = vpop.f32.mrb[15].mxu1 }
 0x204   : > { %v1352_v25 = vadd.f32 %v1351_v24, %v1350_v22  ;;  %v872_v22 = vld [vmem:[%s2504_s3 + $0x240] sm:$0xff]  ;;  %v874_v24 = vld [vmem:[%s2504_s3 + $0x250] sm:$0xff] }
 0x206   : > { %v1353_v26 = vpop.f32.mrb[16].mxu1  ;;  %v662_v35 = vadd.f32 %v1352_v25, %v1236_v62  ;;  %v877_v25 = vld [vmem:[%s2504_s3 + $0x268] sm:$0xff] }
 0x207   : > { %v1354_v29 = vpop.f32.mrb[17].mxu1 }
 0x208   : > { %v1355_v56 = vadd.f32 %v1354_v29, %v1353_v26  ;;  %v879_v26 = vld [vmem:[%s2504_s3 + $0x278] sm:$0xff]  ;;  %v1657_v29 = vpack.c.bf16 %v874_v24, %v872_v22 }
 0x20a   : > { %v1356_v27 = vpop.f32.mrb[18].mxu1  ;;  %v667_v46 = vadd.f32 %v1355_v56, %v1236_v62  ;;  %v1659_v56 = vpack.c.bf16 %v879_v26, %v877_v25 }
 0x20b   : > { %v1357_v34 = vpop.f32.mrb[19].mxu1 }
 0x20c   : > { %v1358_v28 = vadd.f32 %v1357_v34, %v1356_v27  ;;  %v876_v27 = vld [vmem:[%s2504_s3 + $0x260] sm:$0xff]  ;;  %v878_v34 = vld [vmem:[%s2504_s3 + $0x270] sm:$0xff] }
 0x20e   : > { %v672_v43 = vadd.f32 %v1358_v28, %v1236_v62  ;;  %v881_v28 = vld [vmem:[%s2504_s3 + $0x288] sm:$0xff]  ;;  %v883_v62 = vld [vmem:[%s2504_s3 + $0x298] sm:$0xff] }
 0x21e   : > { %v1451_v36 = vpop.f32.mrb[20].mxu1 }
 0x21f   : > { %v747_v39 = vadd.f32 %v1451_v36, %v662_v35  ;;  %v741_v40 = vpop.f32.mrb[21].mxu1  ;;  %v1661_v35 = vpack.c.bf16 %v878_v34, %v876_v27  ;;  %v1663_v36 = vpack.c.bf16 %v883_v62, %v881_v28 }
 0x220   : > { %v742_v41 = vadd.f32 %v741_v40, %v657_v38  ;;  %v880_v38 = vld [vmem:[%s2504_s3 + $0x280] sm:$0xff]  ;;  %v885_v40 = vld [vmem:[%s2504_s3 + $0x2a8] sm:$0xff] }
 0x221   : > { %v761_v42 = vadd.f32 %v747_v39, %v2132_v30  ;;  %v882_v39 = vld [vmem:[%s2504_s3 + $0x290] sm:$0xff] }
 0x222   : > { %v760_v44 = vadd.f32 %v742_v41, %v2134_v32  ;;  %v1454_v45 = vpop.f32.mrb[22].mxu1  ;;  %v887_v41 = vld [vmem:[%s2504_s3 + $0x2b8] sm:$0xff] }
 0x223   : > { %vm765_vm8 = vcmp.ge.f32.partialorder %v761_v42, 0.0  ;;  %v769_v47 = vmul.f32 0.2, %v761_v42  ;;  %v757_v23 = vadd.f32 %v1454_v45, %v672_v43  ;;  %v751_v48 = vpop.f32.mrb[23].mxu1  ;;  %v1712_v43 = vmov 0.0   ;;  %v884_v45 = vld [vmem:[%s2504_s3 + $0x2a0] sm:$0xff] }
 0x224   : > { %vm764_vm9 = vcmp.ge.f32.partialorder %v760_v44, 0.0  ;;  %v768_v49 = vmul.f32 0.2, %v760_v44  ;;  %v752_v50 = vadd.f32 %v751_v48, %v667_v46  ;;  %v886_v46 = vld [vmem:[%s2504_s3 + $0x2b0] sm:$0xff] }
 0x225   : > { %v773_v51 = vsel %vm765_vm8, %v761_v42, %v769_v47  ;;  %v763_v52 = vadd.f32 %v757_v23, %v2136_v33  ;;  %v1665_v42 = vpack.c.bf16 %v882_v39, %v880_v38  ;;  %v889_v47 = vld [vmem:[%s2504_s3 + $0x2c8] sm:$0xff]  ;;  %v891_v23 = vld [vmem:[%s2504_s3 + $0x2d8] sm:$0xff]  ;;  %v1669_v48 = vpack.c.bf16 %v886_v46, %v884_v45 }
 0x226   : > { %v789_v53 = vrot.slane %v773_v51, 1  ;;  %v772_v54 = vsel %vm764_vm9, %v760_v44, %v768_v49  ;;  %v762_v55 = vadd.f32 %v752_v50, %v2147_v37  ;;  %v777_v30 = vrot.slane %v773_v51, 7  ;;  %v869_v37 = vld [vmem:[%s2504_s3 + $0x228] sm:$0xff]  ;;  %v888_v50 = vld [vmem:[%s2504_s3 + $0x2c0] sm:$0xff] }
 0x227   : > { %v788_v57 = vrot.slane %v772_v54, 1  ;;  %vm767_vm10 = vcmp.ge.f32.partialorder %v763_v52, 0.0  ;;  %v771_v32 = vmul.f32 0.2, %v763_v52  ;;  %v776_v58 = vrot.slane %v772_v54, 7 }
 0x228   : > { %vm766_vm11 = vcmp.ge.f32.partialorder %v762_v55, 0.0  ;;  %v770_v59 = vmul.f32 0.2, %v762_v55  ;;  %v1651_v9 = vpack.c.bf16 %v871_v0, %v869_v37  ;;  %v1667_v44 = vpack.c.bf16 %v887_v41, %v885_v40 }
 0x229   : > { %v775_v33 = vsel %vm767_vm10, %v763_v52, %v771_v32  ;;  %v782_v63 = vsel %vm235_vm0, %v776_v58, %v777_v30  ;;  %v2376_v1 = vsel %vm255_vm2, %v788_v57, %v789_v53  ;;  %v1671_v49 = vpack.c.bf16 %v891_v23, %v889_v47  ;;  %v893_v52 = vld [vmem:[%s2504_s3 + $0x2e8] sm:$0xff] }
 0x22a   : > { %v774_v2 = vsel %vm766_vm11, %v762_v55, %v770_v59  ;;  %v779_v3 = vrot.slane %v775_v33, 7  ;;  %v791_v4 = vrot.slane %v775_v33, 1  ;;  %v896_v59 = vld [vmem:[%s2505_s4] sm:$0x3] }
 0x22b   : > { %v778_v6 = vrot.slane %v774_v2, 7  ;;  %v790_v7 = vrot.slane %v774_v2, 1 }
 0x22c   : > { %v783_v8 = vsel %vm235_vm0, %v779_v3, %v776_v58  ;;  %v2388_v12 = vsel %vm255_vm2, %v791_v4, %v788_v57  ;;  %v894_v57 = vld [vmem:[%s2504_s3 + $0x2f0] sm:$0xff]  ;;  %v900_v58 = vsub.s32 0, %v1801_v20 }
 0x22d   : > { %1242 = vmatprep.mubr.msk.f32.mxu0 %vm1249_vm1, %v783_v8  ;;  %v781_v13 = vsel %vm235_vm0, %v777_v30, %v778_v6  ;;  %v780_v16 = vsel %vm235_vm0, %v778_v6, %v779_v3  ;;  %v793_v17 = vsel %vm255_vm2, %v789_v53, %v790_v7  ;;  %v2406_v18 = vsel %vm255_vm2, %v790_v7, %v791_v4  ;;  %v895_v53 = vld [vmem:[%s2504_s3 + $0x2f8] sm:$0xff]  ;;  %v892_v30 = vld [vmem:[%s2504_s3 + $0x2e0] sm:$0xff] }
 0x22e   : > { %973 = vmatmul.mubr.f32.vlgmr.msra.gmra.mrb[0].mxu0 %v772_v54  ;;  %v1675_v55 = vpack.c.bf16 %v895_v53, %v893_v52  ;;  %v1677_v32 = vpack.c.bf16 %v894_v57, %v892_v30  ;;  %v901_v61 = vrot.slane %v896_v59, %v900_v58 }
 0x22f   : > { %1650 = vmatpush1.bf16.msra.mxu0 %v1649_v5  ;;  %978 = vmatprep.mubr.f32.mxu0 %v782_v63 }
 0x230   : > { %1652 = vmatprep.subr.bf16.mxu0 %v1651_v9 }
 0x232   : > { %979 = vmatmul.mubr.f32.gmra.mrb[2].mxu0 %v773_v51  ;;  %v890_v51 = vld [vmem:[%s2504_s3 + $0x2d0] sm:$0xff] }
 0x233   : > { %1654 = vmatpush1.bf16.msra.mxu0 %v1653_v19  ;;  %984 = vmatprep.mubr.f32.mxu0 %v781_v13  ;;  %v1673_v54 = vpack.c.bf16 %v890_v51, %v888_v50 }
 0x234   : > { %1656 = vmatprep.subr.bf16.mxu0 %v1655_v21 }
 0x236   : > { %985 = vmatmul.mubr.f32.gmra.mrb[4].mxu0 %v774_v2 }
 0x237   : > { %1658 = vmatpush1.bf16.msra.mxu0 %v1657_v29  ;;  %990 = vmatprep.mubr.f32.mxu0 %v780_v16 }
 0x238   : > { %1660 = vmatprep.subr.bf16.mxu0 %v1659_v56 }
 0x23a   : > { %991 = vmatmul.mubr.f32.gmra.mrb[6].mxu0 %v775_v33  ;;  %v905_v33 = vrot.slane %v896_v59, %v904_v60 }
 0x23b   : > { %1662 = vmatpush1.bf16.msra.mxu0 %v1661_v35  ;;  %1061 = vmatprep.mubr.f32.mxu0 %v1712_v43 }
 0x23c   : > { %1664 = vmatprep.subr.bf16.mxu0 %v1663_v36 }
 0x23f   : > { %1666 = vmatpush1.bf16.msra.mxu0 %v1665_v42 }
 0x240   : > { %1668 = vmatprep.subr.bf16.mxu0 %v1667_v44 }
 0x243   : > { %1670 = vmatpush1.bf16.msra.mxu0 %v1669_v48 }
 0x244   : > { %1672 = vmatprep.subr.bf16.mxu0 %v1671_v49 }
 0x247   : > { %1674 = vmatpush1.bf16.msra.mxu0 %v1673_v54 }
 0x248   : > { %1676 = vmatprep.subr.bf16.mxu0 %v1675_v55 }
 0x24b   : > { %1678 = vmatpush1.bf16.msra.mxu0 %v1677_v32 }
 0x24e   : > { %1062 = vmatmul.mubr.f32.vlgmr.msra.gmra.mrb[0].mxu0 %v2376_v1 }
 0x24f   : > { %1067 = vmatprep.mubr.f32.mxu0 %v1712_v43 }
 0x252   : > { %1068 = vmatmul.mubr.f32.gmra.mrb[2].mxu0 %v793_v17 }
 0x253   : > { %1073 = vmatprep.mubr.f32.mxu0 %v1712_v43 }
 0x256   : > { %1074 = vmatmul.mubr.f32.gmra.mrb[4].mxu0 %v2406_v18 }
 0x257   : > { %1079 = vmatprep.mubr.f32.mxu0 %v1712_v43 }
 0x25a   : > { %1244 = vmatmul.mubr.msk.f32.gmra.mrb[6].mxu0 %vm1250_vm3, %v2388_v12 }
 0x321   : > { %v1063_v63 = vpop.f32.mrb[0].mxu0 }
 0x322   : > { %v1679_v37 = vadd.f32 %v1063_v63, %v901_v61  ;;  %v1065_v0 = vpop.f32.mrb[1].mxu0 }
 0x323   : > { %v1680_v1 = vadd.f32 %v1065_v0, %v905_v33 }
 0x324   : > { %vm1086_vm12 = vcmp.ge.f32.partialorder %v1679_v37, 0.0  ;;  %v1094_v31 = vmul.f32 0.2, %v1679_v37 }
 0x325   : > { %vm1087_vm13 = vcmp.ge.f32.partialorder %v1680_v1, 0.0  ;;  %v1095_v2 = vmul.f32 0.2, %v1680_v1  ;;  %v1069_v3 = vpop.f32.mrb[2].mxu0 }
 0x326   : > { %v1102_v20 = vsel %vm1086_vm12, %v1679_v37, %v1094_v31  ;;  %v1681_v4 = vadd.f32 %v1069_v3, %v901_v61  ;;  %v1071_v5 = vpop.f32.mrb[3].mxu0 }
 0x327   : > { %1110 = vst [vmem:[%s2488_s27] sm:$0xff] %v1102_v20  ;;  %v1103_v6 = vsel %vm1087_vm13, %v1680_v1, %v1095_v2  ;;  %v1682_v7 = vadd.f32 %v1071_v5, %v905_v33 }
 0x328   : > { %1111 = vst [vmem:[%s2488_s27 + $0x8] sm:$0xff] %v1103_v6  ;;  %vm1088_vm14 = vcmp.ge.f32.partialorder %v1681_v4, 0.0  ;;  %v1096_v8 = vmul.f32 0.2, %v1681_v4 }
 0x329   : > { %vm1089_vm15 = vcmp.ge.f32.partialorder %v1682_v7, 0.0  ;;  %v1097_v9 = vmul.f32 0.2, %v1682_v7  ;;  %v1075_v10 = vpop.f32.mrb[4].mxu0 }
 0x32a   : > { %v1104_v11 = vsel %vm1088_vm14, %v1681_v4, %v1096_v8  ;;  %v1683_v12 = vadd.f32 %v1075_v10, %v901_v61  ;;  %v1077_v13 = vpop.f32.mrb[5].mxu0 }
 0x32b   : > { %1112 = vst [vmem:[%s2488_s27 + $0x10] sm:$0xff] %v1104_v11  ;;  %v1105_v14 = vsel %vm1089_vm15, %v1682_v7, %v1097_v9  ;;  %v1684_v15 = vadd.f32 %v1077_v13, %v905_v33 }
 0x32c   : > { %1113 = vst [vmem:[%s2488_s27 + $0x18] sm:$0xff] %v1105_v14  ;;  %vm1090_vm0 = vcmp.ge.f32.partialorder %v1683_v12, 0.0  ;;  %v1098_v16 = vmul.f32 0.2, %v1683_v12 }
 0x32d   : > { %vm1091_vm1 = vcmp.ge.f32.partialorder %v1684_v15, 0.0  ;;  %v1099_v17 = vmul.f32 0.2, %v1684_v15  ;;  %v1081_v18 = vpop.f32.mrb[6].mxu0 }
 0x32e   : > { %v1106_v19 = vsel %vm1090_vm0, %v1683_v12, %v1098_v16  ;;  %v1685_v21 = vadd.f32 %v1081_v18, %v901_v61  ;;  %v1083_v22 = vpop.f32.mrb[7].mxu0 }
 0x32f   : > { %1114 = vst [vmem:[%s2488_s27 + $0x20] sm:$0xff] %v1106_v19  ;;  %v1107_v24 = vsel %vm1091_vm1, %v1684_v15, %v1099_v17  ;;  %v1686_v25 = vadd.f32 %v1083_v22, %v905_v33 }
 0x330   : > { %1115 = vst [vmem:[%s2488_s27 + $0x28] sm:$0xff] %v1107_v24  ;;  %vm1092_vm2 = vcmp.ge.f32.partialorder %v1685_v21, 0.0  ;;  %v1100_v26 = vmul.f32 0.2, %v1685_v21 }
 0x331   : > { %vm1093_vm3 = vcmp.ge.f32.partialorder %v1686_v25, 0.0  ;;  %v1101_v29 = vmul.f32 0.2, %v1686_v25 }
 0x332   : > { %v1108_v56 = vsel %vm1092_vm2, %v1685_v21, %v1100_v26 }
 0x333   : > { %1116 = vst [vmem:[%s2488_s27 + $0x30] sm:$0xff] %v1108_v56  ;;  %v1109_v27 = vsel %vm1093_vm3, %v1686_v25, %v1101_v29 }
 0x334   : > { %1117 = vst [vmem:[%s2488_s27 + $0x38] sm:$0xff] %v1109_v27 }
 0x335 PF: > { %s15_s18 = sadd.s32 1, %s1710_s18  }
 0x336   : > { %p12_p4 = scmp.ge.s32.totalorder %s15_s18, 4  }
 0x338   :  { %14 = sbr.rel (!%p12_p4) target bundleno = 1 (0x1), region = 72 }

</bundles_post_ra>
